<compile_context>
chip_gen: v7x
topology: tpu7x:2x2x1
jax: 0.10.0
libtpu: 0.0.40
codegen_flags: <defaults>
</compile_context>

<pallas_src>
import functools

import jax
import jax.numpy as jnp
from jax.experimental import pallas as pl
from jax.experimental.pallas import tpu as pltpu

LEAKY_SLOPE = 0.01   # InPlaceABN default activation_param
BN_EPS = 1e-5        # InPlaceABN default eps
TM_MAX = 8192        # max output lanes per grid step
MIN_TILES = 4        # target >= 4 grid steps (v7x megacore sharding)


def _cdiv(a, b):
    return -(-a // b)


def _round_up(a, b):
    return _cdiv(a, b) * b


def _make_compiler_params():
    vmem = 48 * 1024 * 1024            # conservative fallback (fits v7x 64 MiB)
    try:
        cap = getattr(pltpu.get_tpu_info(), "vmem_capacity_bytes", None)
        if cap:
            vmem = min(int(cap) * 3 // 4, 96 * 1024 * 1024)
    except Exception:
        pass
    return pltpu.CompilerParams(dimension_semantics=("parallel",),
                                vmem_limit_bytes=vmem)


_COMPILER_PARAMS = _make_compiler_params()


# ---------------------------------------------------------------------------
# Pallas kernel: flat shift-and-matmul conv with fused epilogue
# ---------------------------------------------------------------------------
def _conv_tap_kernel(*refs, tap_offsets, cin, has_halo, apply_act,
                     has_residual, has_second):
    """out(Cout, TM) = sum_t W_t(Cout,Cin) @ window(Cin, TM + halo)[:, t_off:]
    with fused f32 epilogue: +shift [, leaky_relu] [, 1x1 conv] [, residual]."""
    it = iter(refs)
    w_ref = next(it)
    x_ref = next(it)
    halo_ref = next(it) if has_halo else None
    shift_ref = next(it)
    r_ref = next(it) if has_residual else None
    w2_ref = next(it) if has_second else None
    s2_ref = next(it) if has_second else None
    o_ref = next(it)
    win_ref = next(it) if has_halo else None

    tm = x_ref.shape[1]
    if has_halo:
        tb = halo_ref.shape[2]
        # Assemble [tile | halo] once in VMEM; taps are static lane-offset
        # slices of it (in-kernel im2col — nothing k*k-inflated touches HBM).
        win_ref[:, pl.ds(0, tm)] = x_ref[...]
        win_ref[:, pl.ds(tm, tb)] = halo_ref[0, :, :]

    acc = None
    for t, off in enumerate(tap_offsets):            # unrolled at trace time
        xt = win_ref[:, pl.ds(off, tm)] if has_halo else x_ref[...]
        wt = w_ref[:, pl.ds(t * cin, cin)]           # (Cout, Cin) tap weights
        part = jnp.dot(wt, xt, preferred_element_type=jnp.float32)
        acc = part if acc is None else acc + part

    y = acc + shift_ref[...]                         # folded BN shift / bias
    if apply_act:
        y = jnp.maximum(y, LEAKY_SLOPE * y)          # leaky_relu(0.01)
    if has_second:                                   # fused trailing 1x1 conv
        y = jnp.dot(w2_ref[...], y.astype(w2_ref.dtype),
                    preferred_element_type=jnp.float32) + s2_ref[...]
    if has_residual:                                 # fused FPN upsample-add
        y = y + r_ref[...].astype(jnp.float32)
    o_ref[...] = y.astype(o_ref.dtype)


# ---------------------------------------------------------------------------
# pallas_call wrapper: flat tiled conv over a pre-padded channel-major image
# ---------------------------------------------------------------------------
def _conv_flat_call(xp, w, shift, ke, ho, wo, *, apply_act, residual=None,
                    second=None, out_dtype=jnp.float32):
    """ke x ke stride-1 conv over pre-padded xp (Cin, N, Himg, Wimg); returns
    (Cout_last, N, ho, wo).  Flat layout: per-image flat index m = h*Wimg + w;
    tap (a, b) reads flat offset a*Wimg + b; garbage border outputs are
    computed (cheap) and sliced away."""
    cin, n, himg, wimg = xp.shape
    cout = w.shape[0]
    ntaps = ke * ke
    assert w.shape[1] == ntaps * cin, (w.shape, ntaps, cin)

    l_valid = n * himg * wimg
    tap_offsets = tuple(a * wimg + b for a in range(ke) for b in range(ke))
    halo_len = tap_offsets[-1]
    has_halo = halo_len > 0
    tb = _round_up(halo_len, 128) if has_halo else 0

    tm = max(128, min(TM_MAX, _round_up(_cdiv(l_valid, MIN_TILES), 128)))
    tm = max(tm, tb)                       # halo must fit within the next tile
    l0 = _round_up(l_valid, tm)
    nt = l0 // tm

    x_flat = jnp.pad(xp.reshape(cin, l_valid),
                     ((0, 0), (0, l0 + tm - l_valid)))

    in_arrays = [w, x_flat]
    in_specs = [
        pl.BlockSpec((cout, ntaps * cin), lambda j: (0, 0)),
        pl.BlockSpec((cin, tm), lambda j: (0, j)),
    ]
    if has_halo:
        # Per-tile halo = first tb lanes of the *next* tile, materialized once
        # in XLA (~tb/tm extra input traffic vs k*k*x for HBM im2col).
        halo = x_flat[:, tm:tm + l0].reshape(cin, nt, tm)[:, :, :tb]
        in_arrays.append(jnp.transpose(halo, (1, 0, 2)))        # (nt, Cin, tb)
        in_specs.append(pl.BlockSpec((1, cin, tb), lambda j: (j, 0, 0)))

    in_arrays.append(shift)
    in_specs.append(pl.BlockSpec((cout, 1), lambda j: (0, 0)))

    has_residual = residual is not None
    c_last = cout
    if has_residual:
        assert ke == 1 and residual.shape[0] == cout
        r_flat = residual.astype(jnp.bfloat16).reshape(cout, -1)
        r_flat = jnp.pad(r_flat, ((0, 0), (0, l0 - l_valid)))
        in_arrays.append(r_flat)
        in_specs.append(pl.BlockSpec((cout, tm), lambda j: (0, j)))

    has_second = second is not None
    if has_second:
        w2, s2 = second
        c_last = w2.shape[0]
        in_arrays += [w2, s2]
        in_specs += [pl.BlockSpec(w2.shape, lambda j: (0, 0)),
                     pl.BlockSpec((c_last, 1), lambda j: (0, 0))]

    scratch = [pltpu.VMEM((cin, tm + tb), jnp.bfloat16)] if has_halo else []

    kernel = functools.partial(
        _conv_tap_kernel, tap_offsets=tap_offsets, cin=cin, has_halo=has_halo,
        apply_act=apply_act, has_residual=has_residual, has_second=has_second)

    out = pl.pallas_call(
        kernel,
        out_shape=jax.ShapeDtypeStruct((c_last, l0), out_dtype),
        grid=(nt,),
        in_specs=in_specs,
        out_specs=pl.BlockSpec((c_last, tm), lambda j: (0, j)),
        scratch_shapes=scratch,
        compiler_params=_COMPILER_PARAMS,
    )(*in_arrays)

    return out[:, :l_valid].reshape(c_last, n, himg, wimg)[:, :, :ho, :wo]


# ---------------------------------------------------------------------------
# XLA glue: padding / space-to-depth / bilinear upsample
# ---------------------------------------------------------------------------
def _space_to_depth2(x, p):
    # TODO(synk): 2x2 pixel-shuffle stays in XLA glue (pure relayout, ~1x the
    #             activation bytes) — not expressible as a rectangular BlockSpec.
    c, n, h, w = x.shape
    hp, wp = h + 2 * p, w + 2 * p
    hp2, wp2 = hp + (hp % 2), wp + (wp % 2)
    xp = jnp.pad(x, ((0, 0), (0, 0), (p, p + hp2 - hp), (p, p + wp2 - wp)))
    xp = xp.reshape(c, n, hp2 // 2, 2, wp2 // 2, 2)
    xs = jnp.transpose(xp, (3, 5, 0, 1, 2, 4))     # (r, s, C, N, Hs, Ws)
    return xs.reshape(4 * c, n, hp2 // 2, wp2 // 2)


def conv_layer(x, prm, k, stride, pad, *, apply_act, residual=None,
               second=None, out_dtype=jnp.bfloat16):
    """x: (Cin, N, H, W) channel-major; returns (Cout, N, Ho, Wo)."""
    cin0, n, h, w = x.shape
    xb = x.astype(jnp.bfloat16)
    ho = (h + 2 * pad - k) // stride + 1
    wo = (w + 2 * pad - k) // stride + 1
    if stride == 1:
        ke = k
        cin_k = prm["w"].shape[1] // (ke * ke)
        if cin_k != cin0:                      # e.g. RGB input padded 3 -> 8
            xb = jnp.pad(xb, ((0, cin_k - cin0), (0, 0), (0, 0), (0, 0)))
        if pad > 0:
            xb = jnp.pad(xb, ((0, 0), (0, 0), (pad, pad), (pad, pad)))
    elif stride == 2:
        # k x k stride-2 conv == ceil(k/2)^2 stride-1 conv over the 2x2
        # space-to-depth input (channel order: row parity, col parity, cin).
        ke = (k + 1) // 2
        xb = _space_to_depth2(xb, pad)
        assert prm["w"].shape[1] == ke * ke * xb.shape[0]
    else:
        raise ValueError("unsupported stride")
    return _conv_flat_call(xb, prm["w"], prm["shift"], ke, ho, wo,
                           apply_act=apply_act, residual=residual,
                           second=second, out_dtype=out_dtype)


def upsample2x_align_corners_cf(x):
    # F.interpolate(scale_factor=2, mode='bilinear', align_corners=True) on
    # a (C, N, H, W) tensor.
    # TODO(synk): data-dependent bilinear gather kept in plain JAX; its ADD is
    #             fused into the lateral-conv Pallas epilogue (bf16 stream).
    c, n, h, w = x.shape
    ho, wo = 2 * h, 2 * w
    xf = x.astype(jnp.float32)
    ys = jnp.arange(ho, dtype=jnp.float32) * ((h - 1) / (ho - 1))
    xs = jnp.arange(wo, dtype=jnp.float32) * ((w - 1) / (wo - 1))
    y0 = jnp.floor(ys).astype(jnp.int32)
    x0 = jnp.floor(xs).astype(jnp.int32)
    y1 = jnp.minimum(y0 + 1, h - 1)
    x1 = jnp.minimum(x0 + 1, w - 1)
    wy = (ys - y0.astype(jnp.float32))[None, None, :, None]
    wx = (xs - x0.astype(jnp.float32))[None, None, None, :]
    top = xf[:, :, y0, :] * (1.0 - wy) + xf[:, :, y1, :] * wy
    return top[:, :, :, x0] * (1.0 - wx) + top[:, :, :, x1] * wx


# ---------------------------------------------------------------------------
# Parameter init (deterministic). BN scale folded into weights.
# ---------------------------------------------------------------------------
def _rearrange_stride2_weight(w):
    # w: (cout, k, k, cin), k odd -> equivalent ke x ke stride-1 weight over the
    # space-to-depth input; channel order within each tap: (r, s, cin).
    cout, k, _, cin = w.shape
    ke = (k + 1) // 2
    w_eff = jnp.zeros((cout, ke, ke, 2, 2, cin), w.dtype)
    for a in range(ke):
        for b in range(ke):
            for r in range(2):
                for s in range(2):
                    kh, kw = 2 * a + r, 2 * b + s
                    if kh < k and kw < k:
                        w_eff = w_eff.at[:, a, b, r, s, :].set(w[:, kh, kw, :])
    return w_eff.reshape(cout, ke * ke * 4 * cin)


def _kernel_weight(wq, stride):
    cout, k, _, cin = wq.shape
    if stride == 2:
        return _rearrange_stride2_weight(wq).astype(jnp.bfloat16)
    cin_pad = _round_up(cin, 8)
    if cin_pad != cin:
        wq = jnp.concatenate(
            [wq, jnp.zeros((cout, k, k, cin_pad - cin), wq.dtype)], axis=-1)
    return wq.reshape(cout, k * k * cin_pad).astype(jnp.bfloat16)


def init_convbnrelu(key, cin, cout, k, stride=1):
    kw_, kg, kb = jax.random.split(key, 3)
    fan_in = k * k * cin
    w = jax.random.normal(kw_, (cout, k, k, cin), jnp.float32) / jnp.sqrt(float(fan_in))
    gamma = 1.0 + 0.1 * jax.random.normal(kg, (cout,), jnp.float32)
    beta = 0.1 * jax.random.normal(kb, (cout,), jnp.float32)
    running_mean = jnp.zeros((cout,), jnp.float32)
    running_var = jnp.ones((cout,), jnp.float32)
    scale = gamma / jnp.sqrt(running_var + BN_EPS)
    shift = (beta - running_mean * scale).reshape(cout, 1)
    wf = w * scale[:, None, None, None]                 # BN scale folded into W
    wq = wf.astype(jnp.bfloat16).astype(jnp.float32)    # kernel/reference share values
    return {"w": _kernel_weight(wq, stride), "shift": shift, "w_ref": wq}


def init_conv(key, cin, cout, k):
    kw_, kb = jax.random.split(key)
    fan_in = k * k * cin
    w = jax.random.normal(kw_, (cout, k, k, cin), jnp.float32) / jnp.sqrt(float(fan_in))
    b = 0.1 * jax.random.normal(kb, (cout,), jnp.float32)
    wq = w.astype(jnp.bfloat16).astype(jnp.float32)
    return {"w": _kernel_weight(wq, 1), "shift": b.reshape(cout, 1), "w_ref": wq}


def init_featurenet_params(key):
    keys = jax.random.split(key, 13)
    return {
        "conv0_0": init_convbnrelu(keys[0], 3, 8, 3),
        "conv0_1": init_convbnrelu(keys[1], 8, 8, 3),
        "conv1_0": init_convbnrelu(keys[2], 8, 16, 5, stride=2),
        "conv1_1": init_convbnrelu(keys[3], 16, 16, 3),
        "conv1_2": init_convbnrelu(keys[4], 16, 16, 3),
        "conv2_0": init_convbnrelu(keys[5], 16, 32, 5, stride=2),
        "conv2_1": init_convbnrelu(keys[6], 32, 32, 3),
        "conv2_2": init_convbnrelu(keys[7], 32, 32, 3),
        "toplayer": init_conv(keys[8], 32, 32, 1),
        "lat1": init_conv(keys[9], 16, 32, 1),
        "lat0": init_conv(keys[10], 8, 32, 1),
        "smooth1": init_conv(keys[11], 32, 16, 3),
        "smooth0": init_conv(keys[12], 32, 8, 3),
    }


# ---------------------------------------------------------------------------
# FeatureNet forward (NCHW in / NCHW out, like the PyTorch module)
# ---------------------------------------------------------------------------
def feature_net(x_nchw, params):
    x = jnp.transpose(x_nchw, (1, 0, 2, 3))             # NCHW -> CNHW
    bf16 = jnp.bfloat16
    # TODO(synk): conv0_0+conv0_1 and the low-res conv1/conv2 chains could be
    #             fused into single halo-recompute kernels for fewer activation
    #             round trips; kept as separate pallas_calls here.
    c = conv_layer(x, params["conv0_0"], 3, 1, 1, apply_act=True, out_dtype=bf16)
    conv0 = conv_layer(c, params["conv0_1"], 3, 1, 1, apply_act=True, out_dtype=bf16)

    c = conv_layer(conv0, params["conv1_0"], 5, 2, 2, apply_act=True, out_dtype=bf16)
    c = conv_layer(c, params["conv1_1"], 3, 1, 1, apply_act=True, out_dtype=bf16)
    conv1 = conv_layer(c, params["conv1_2"], 3, 1, 1, apply_act=True, out_dtype=bf16)

    c = conv_layer(conv1, params["conv2_0"], 5, 2, 2, apply_act=True, out_dtype=bf16)
    c = conv_layer(c, params["conv2_1"], 3, 1, 1, apply_act=True, out_dtype=bf16)
    # conv2_2 + toplayer fused: the conv2 activation never round-trips HBM.
    feat2 = conv_layer(c, params["conv2_2"], 3, 1, 1, apply_act=True,
                       second=(params["toplayer"]["w"], params["toplayer"]["shift"]),
                       out_dtype=jnp.float32)

    # FPN lateral 1x1 convs with the upsample-add fused into the conv epilogue.
    feat1p = conv_layer(conv1, params["lat1"], 1, 1, 0, apply_act=False,
                        residual=upsample2x_align_corners_cf(feat2),
                        out_dtype=bf16)
    feat0p = conv_layer(conv0, params["lat0"], 1, 1, 0, apply_act=False,
                        residual=upsample2x_align_corners_cf(feat1p),
                        out_dtype=bf16)
    feat1 = conv_layer(feat1p, params["smooth1"], 3, 1, 1, apply_act=False,
                       out_dtype=jnp.float32)
    feat0 = conv_layer(feat0p, params["smooth0"], 3, 1, 1, apply_act=False,
                       out_dtype=jnp.float32)

    to_nchw = lambda t: jnp.transpose(t, (1, 0, 2, 3)).astype(jnp.float32)
    return {"level_0": to_nchw(feat0),
            "level_1": to_nchw(feat1),
            "level_2": to_nchw(feat2)}


# ---------------------------------------------------------------------------
# Pure-JAX reference (lax.conv, f32 activations) for validation
# ---------------------------------------------------------------------------
def _ref_conv(x, prm, k, stride, pad, act):
    w = jnp.transpose(prm["w_ref"], (0, 3, 1, 2))       # (Cout,k,k,Cin)->OIHW
    y = jax.lax.conv_general_dilated(
        x, w, (stride, stride), [(pad, pad), (pad, pad)],
        dimension_numbers=("NCHW", "OIHW", "NCHW"),
        precision=jax.lax.Precision.HIGHEST)
    y = y + prm["shift"].reshape(1, -1, 1, 1)
    if act:
        y = jnp.where(y >= 0, y, LEAKY_SLOPE * y)
    return y


def _ref_upsample2x(x):
    n, c, h, w = x.shape
    ho, wo = 2 * h, 2 * w
    ys = jnp.arange(ho, dtype=jnp.float32) * ((h - 1) / (ho - 1))
    xs = jnp.arange(wo, dtype=jnp.float32) * ((w - 1) / (wo - 1))
    y0 = jnp.floor(ys).astype(jnp.int32); y1 = jnp.minimum(y0 + 1, h - 1)
    x0 = jnp.floor(xs).astype(jnp.int32); x1 = jnp.minimum(x0 + 1, w - 1)
    wy = (ys - y0.astype(jnp.float32))[None, None, :, None]
    wx = (xs - x0.astype(jnp.float32))[None, None, None, :]
    top = x[:, :, y0, :] * (1.0 - wy) + x[:, :, y1, :] * wy
    return top[:, :, :, x0] * (1.0 - wx) + top[:, :, :, x1] * wx


def feature_net_reference(x_nchw, params):
    x = x_nchw.astype(jnp.bfloat16).astype(jnp.float32)
    cbr = lambda h, nm, k, s, p: _ref_conv(h, params[nm], k, s, p, act=True)
    cv = lambda h, nm, k, s, p: _ref_conv(h, params[nm], k, s, p, act=False)
    conv0 = cbr(cbr(x, "conv0_0", 3, 1, 1), "conv0_1", 3, 1, 1)
    conv1 = cbr(cbr(cbr(conv0, "conv1_0", 5, 2, 2), "conv1_1", 3, 1, 1),
                "conv1_2", 3, 1, 1)
    conv2 = cbr(cbr(cbr(conv1, "conv2_0", 5, 2, 2), "conv2_1", 3, 1, 1),
                "conv2_2", 3, 1, 1)
    feat2 = cv(conv2, "toplayer", 1, 1, 0)
    feat1 = _ref_upsample2x(feat2) + cv(conv1, "lat1", 1, 1, 0)
    feat0 = _ref_upsample2x(feat1) + cv(conv0, "lat0", 1, 1, 0)
    return {"level_0": cv(feat0, "smooth0", 3, 1, 1),
            "level_1": cv(feat1, "smooth1", 3, 1, 1),
            "level_2": feat2}


if __name__ == "__main__":
    x = jax.random.normal(jax.random.PRNGKey(0), (2, 3, 16, 16), jnp.float32)
    params = init_featurenet_params(jax.random.PRNGKey(1))

    feats = jax.block_until_ready(jax.jit(feature_net)(x, params))
    assert feats["level_0"].shape == (2, 8, 16, 16)
    assert feats["level_1"].shape == (2, 16, 8, 8)
    assert feats["level_2"].shape == (2, 32, 4, 4)

    ref = jax.block_until_ready(jax.jit(feature_net_reference)(x, params))
    for name in ("level_0", "level_1", "level_2"):
        a, b = feats[name], ref[name]
        assert bool(jnp.all(jnp.isfinite(a))), name
        err = float(jnp.max(jnp.abs(a - b)) / (jnp.max(jnp.abs(b)) + 1e-6))
        assert err < 0.12, (name, err)

    print("KERNEL_OK")
</pallas_src>

<mosaic_0001>
module attributes {stable_mosaic.version = 11 : i64} {
  func.func @_conv_tap_kernel(%arg0: i32, %arg1: memref<8x72xbf16, #tpu.memory_space<vmem>>, %arg2: memref<8x256xbf16, #tpu.memory_space<vmem>>, %arg3: memref<1x8x128xbf16, #tpu.memory_space<vmem>>, %arg4: memref<8x1xf32, #tpu.memory_space<vmem>>, %arg5: memref<8x256xbf16, #tpu.memory_space<vmem>>, %arg6: memref<8x384xbf16, #tpu.memory_space<vmem>>) attributes {dimension_semantics = [#tpu.dimension_semantics<parallel>], iteration_bounds = array<i64: 3>, scalar_prefetch = 0 : i64, scratch_operands = 1 : i64, tpu.core_type = #tpu.core_type<tc>, window_params = [{pipeline_mode = #tpu.pipeline_mode<synchronous>, transform_indices = @transform_0, window_bounds = array<i64: 8, 72>}, {transform_indices = @transform_1, window_bounds = array<i64: 8, 256>}, {transform_indices = @transform_2, window_bounds = array<i64: 1, 8, 128>}, {pipeline_mode = #tpu.pipeline_mode<synchronous>, transform_indices = @transform_3, window_bounds = array<i64: 8, 1>}, {transform_indices = @transform_4, window_bounds = array<i64: 8, 256>}]} {
    %c0 = arith.constant 0 : index
    %c0_0 = arith.constant 0 : index
    %0 = vector.load %arg2[%c0, %c0_0] : memref<8x256xbf16, #tpu.memory_space<vmem>>, vector<8x256xbf16>
    %c0_1 = arith.constant 0 : index
    %c0_2 = arith.constant 0 : index
    %1 = vector.load %arg6[%c0_1, %c0_2] : memref<8x384xbf16, #tpu.memory_space<vmem>>, vector<8x256xbf16>
    tpu.vector_store %arg6[%c0_1, %c0_2], %0 {strides = array<i32>} : memref<8x384xbf16, #tpu.memory_space<vmem>>, vector<8x256xbf16>,
    %c0_3 = arith.constant 0 : index
    %c0_4 = arith.constant 0 : index
    %c0_5 = arith.constant 0 : index
    %2 = vector.load %arg3[%c0_3, %c0_4, %c0_5] : memref<1x8x128xbf16, #tpu.memory_space<vmem>>, vector<1x8x128xbf16>
    %3 = vector.shape_cast %2 : vector<1x8x128xbf16> to vector<8x128xbf16>
    %c0_6 = arith.constant 0 : index
    %c256 = arith.constant 256 : index
    %4 = vector.load %arg6[%c0_6, %c256] : memref<8x384xbf16, #tpu.memory_space<vmem>>, vector<8x128xbf16>
    tpu.vector_store %arg6[%c0_6, %c256], %3 {strides = array<i32>} : memref<8x384xbf16, #tpu.memory_space<vmem>>, vector<8x128xbf16>,
    %c0_7 = arith.constant 0 : index
    %c0_8 = arith.constant 0 : index
    %5 = vector.load %arg6[%c0_7, %c0_8] : memref<8x384xbf16, #tpu.memory_space<vmem>>, vector<8x256xbf16>
    %c0_9 = arith.constant 0 : index
    %c0_10 = arith.constant 0 : index
    %6 = vector.load %arg1[%c0_9, %c0_10] : memref<8x72xbf16, #tpu.memory_space<vmem>>, vector<8x8xbf16>
    %cst = arith.constant dense<0.000000e+00> : vector<8x256xf32>
    %7 = tpu.matmul %6, %5, %cst {dimension_numbers = #tpu.dot_dimension_numbers<[1], [0], [0], [1], [0, 0, 1, 1], [], []>} : vector<8x8xbf16>, vector<8x256xbf16>, vector<8x256xf32> -> vector<8x256xf32>
    %c0_11 = arith.constant 0 : index
    %c1 = arith.constant 1 : index
    %8 = vector.load %arg6[%c0_11, %c1] : memref<8x384xbf16, #tpu.memory_space<vmem>>, vector<8x256xbf16>
    %c0_12 = arith.constant 0 : index
    %c8 = arith.constant 8 : index
    %9 = vector.load %arg1[%c0_12, %c8] : memref<8x72xbf16, #tpu.memory_space<vmem>>, vector<8x8xbf16>
    %cst_13 = arith.constant dense<0.000000e+00> : vector<8x256xf32>
    %10 = tpu.matmul %9, %8, %cst_13 {dimension_numbers = #tpu.dot_dimension_numbers<[1], [0], [0], [1], [0, 0, 1, 1], [], []>} : vector<8x8xbf16>, vector<8x256xbf16>, vector<8x256xf32> -> vector<8x256xf32>
    %11 = arith.addf %7, %10 : vector<8x256xf32>
    %c0_14 = arith.constant 0 : index
    %c2 = arith.constant 2 : index
    %12 = vector.load %arg6[%c0_14, %c2] : memref<8x384xbf16, #tpu.memory_space<vmem>>, vector<8x256xbf16>
    %c0_15 = arith.constant 0 : index
    %c16 = arith.constant 16 : index
    %13 = vector.load %arg1[%c0_15, %c16] : memref<8x72xbf16, #tpu.memory_space<vmem>>, vector<8x8xbf16>
    %cst_16 = arith.constant dense<0.000000e+00> : vector<8x256xf32>
    %14 = tpu.matmul %13, %12, %cst_16 {dimension_numbers = #tpu.dot_dimension_numbers<[1], [0], [0], [1], [0, 0, 1, 1], [], []>} : vector<8x8xbf16>, vector<8x256xbf16>, vector<8x256xf32> -> vector<8x256xf32>
    %15 = arith.addf %11, %14 : vector<8x256xf32>
    %c0_17 = arith.constant 0 : index
    %c18 = arith.constant 18 : index
    %16 = vector.load %arg6[%c0_17, %c18] : memref<8x384xbf16, #tpu.memory_space<vmem>>, vector<8x256xbf16>
    %c0_18 = arith.constant 0 : index
    %c24 = arith.constant 24 : index
    %17 = vector.load %arg1[%c0_18, %c24] : memref<8x72xbf16, #tpu.memory_space<vmem>>, vector<8x8xbf16>
    %cst_19 = arith.constant dense<0.000000e+00> : vector<8x256xf32>
    %18 = tpu.matmul %17, %16, %cst_19 {dimension_numbers = #tpu.dot_dimension_numbers<[1], [0], [0], [1], [0, 0, 1, 1], [], []>} : vector<8x8xbf16>, vector<8x256xbf16>, vector<8x256xf32> -> vector<8x256xf32>
    %19 = arith.addf %15, %18 : vector<8x256xf32>
    %c0_20 = arith.constant 0 : index
    %c19 = arith.constant 19 : index
    %20 = vector.load %arg6[%c0_20, %c19] : memref<8x384xbf16, #tpu.memory_space<vmem>>, vector<8x256xbf16>
    %c0_21 = arith.constant 0 : index
    %c32 = arith.constant 32 : index
    %21 = vector.load %arg1[%c0_21, %c32] : memref<8x72xbf16, #tpu.memory_space<vmem>>, vector<8x8xbf16>
    %cst_22 = arith.constant dense<0.000000e+00> : vector<8x256xf32>
    %22 = tpu.matmul %21, %20, %cst_22 {dimension_numbers = #tpu.dot_dimension_numbers<[1], [0], [0], [1], [0, 0, 1, 1], [], []>} : vector<8x8xbf16>, vector<8x256xbf16>, vector<8x256xf32> -> vector<8x256xf32>
    %23 = arith.addf %19, %22 : vector<8x256xf32>
    %c0_23 = arith.constant 0 : index
    %c20 = arith.constant 20 : index
    %24 = vector.load %arg6[%c0_23, %c20] : memref<8x384xbf16, #tpu.memory_space<vmem>>, vector<8x256xbf16>
    %c0_24 = arith.constant 0 : index
    %c40 = arith.constant 40 : index
    %25 = vector.load %arg1[%c0_24, %c40] : memref<8x72xbf16, #tpu.memory_space<vmem>>, vector<8x8xbf16>
    %cst_25 = arith.constant dense<0.000000e+00> : vector<8x256xf32>
    %26 = tpu.matmul %25, %24, %cst_25 {dimension_numbers = #tpu.dot_dimension_numbers<[1], [0], [0], [1], [0, 0, 1, 1], [], []>} : vector<8x8xbf16>, vector<8x256xbf16>, vector<8x256xf32> -> vector<8x256xf32>
    %27 = arith.addf %23, %26 : vector<8x256xf32>
    %c0_26 = arith.constant 0 : index
    %c36 = arith.constant 36 : index
    %28 = vector.load %arg6[%c0_26, %c36] : memref<8x384xbf16, #tpu.memory_space<vmem>>, vector<8x256xbf16>
    %c0_27 = arith.constant 0 : index
    %c48 = arith.constant 48 : index
    %29 = vector.load %arg1[%c0_27, %c48] : memref<8x72xbf16, #tpu.memory_space<vmem>>, vector<8x8xbf16>
    %cst_28 = arith.constant dense<0.000000e+00> : vector<8x256xf32>
    %30 = tpu.matmul %29, %28, %cst_28 {dimension_numbers = #tpu.dot_dimension_numbers<[1], [0], [0], [1], [0, 0, 1, 1], [], []>} : vector<8x8xbf16>, vector<8x256xbf16>, vector<8x256xf32> -> vector<8x256xf32>
    %31 = arith.addf %27, %30 : vector<8x256xf32>
    %c0_29 = arith.constant 0 : index
    %c37 = arith.constant 37 : index
    %32 = vector.load %arg6[%c0_29, %c37] : memref<8x384xbf16, #tpu.memory_space<vmem>>, vector<8x256xbf16>
    %c0_30 = arith.constant 0 : index
    %c56 = arith.constant 56 : index
    %33 = vector.load %arg1[%c0_30, %c56] : memref<8x72xbf16, #tpu.memory_space<vmem>>, vector<8x8xbf16>
    %cst_31 = arith.constant dense<0.000000e+00> : vector<8x256xf32>
    %34 = tpu.matmul %33, %32, %cst_31 {dimension_numbers = #tpu.dot_dimension_numbers<[1], [0], [0], [1], [0, 0, 1, 1], [], []>} : vector<8x8xbf16>, vector<8x256xbf16>, vector<8x256xf32> -> vector<8x256xf32>
    %35 = arith.addf %31, %34 : vector<8x256xf32>
    %c0_32 = arith.constant 0 : index
    %c38 = arith.constant 38 : index
    %36 = vector.load %arg6[%c0_32, %c38] : memref<8x384xbf16, #tpu.memory_space<vmem>>, vector<8x256xbf16>
    %c0_33 = arith.constant 0 : index
    %c64 = arith.constant 64 : index
    %37 = vector.load %arg1[%c0_33, %c64] : memref<8x72xbf16, #tpu.memory_space<vmem>>, vector<8x8xbf16>
    %cst_34 = arith.constant dense<0.000000e+00> : vector<8x256xf32>
    %38 = tpu.matmul %37, %36, %cst_34 {dimension_numbers = #tpu.dot_dimension_numbers<[1], [0], [0], [1], [0, 0, 1, 1], [], []>} : vector<8x8xbf16>, vector<8x256xbf16>, vector<8x256xf32> -> vector<8x256xf32>
    %39 = arith.addf %35, %38 : vector<8x256xf32>
    %c0_35 = arith.constant 0 : index
    %c0_36 = arith.constant 0 : index
    %40 = vector.load %arg4[%c0_35, %c0_36] : memref<8x1xf32, #tpu.memory_space<vmem>>, vector<8x1xf32>
    %41 = vector.broadcast %40 : vector<8x1xf32> to vector<8x256xf32>
    %42 = arith.addf %39, %41 : vector<8x256xf32>
    %cst_37 = arith.constant 0.00999999977 : f32
    %43 = vector.broadcast %cst_37 : f32 to vector<8x256xf32>
    %44 = arith.mulf %43, %42 : vector<8x256xf32>
    %45 = arith.maximumf %42, %44 : vector<8x256xf32>
    %46 = arith.truncf %45 : vector<8x256xf32> to vector<8x256xbf16>
    %c0_38 = arith.constant 0 : index
    %c0_39 = arith.constant 0 : index
    %47 = vector.load %arg5[%c0_38, %c0_39] : memref<8x256xbf16, #tpu.memory_space<vmem>>, vector<8x256xbf16>
    tpu.vector_store %arg5[%c0_38, %c0_39], %46 {strides = array<i32>} : memref<8x256xbf16, #tpu.memory_space<vmem>>, vector<8x256xbf16>,
    return
  }
  func.func @transform_0(%arg0: i32) -> (i32, i32) {
    %c0_i32 = arith.constant 0 : i32
    %c0_i32_0 = arith.constant 0 : i32
    %c0_i32_1 = arith.constant 0 : i32
    return %c0_i32, %c0_i32_0 : i32, i32
  }
  func.func @transform_1(%arg0: i32) -> (i32, i32) {
    %c0_i32 = arith.constant 0 : i32
    %c0_i32_0 = arith.constant 0 : i32
    return %c0_i32, %arg0 : i32, i32
  }
  func.func @transform_2(%arg0: i32) -> (i32, i32, i32) {
    %c0_i32 = arith.constant 0 : i32
    %c0_i32_0 = arith.constant 0 : i32
    %c0_i32_1 = arith.constant 0 : i32
    return %arg0, %c0_i32, %c0_i32_0 : i32, i32, i32
  }
  func.func @transform_3(%arg0: i32) -> (i32, i32) {
    %c0_i32 = arith.constant 0 : i32
    %c0_i32_0 = arith.constant 0 : i32
    %c0_i32_1 = arith.constant 0 : i32
    return %c0_i32, %c0_i32_0 : i32, i32
  }
  func.func @transform_4(%arg0: i32) -> (i32, i32) {
    %c0_i32 = arith.constant 0 : i32
    %c0_i32_0 = arith.constant 0 : i32
    return %c0_i32, %arg0 : i32, i32
  }
}

module attributes {stable_mosaic.version = 11 : i64} {
  func.func @_conv_tap_kernel(%arg0: i32, %arg1: memref<16x288xbf16, #tpu.memory_space<vmem>>, %arg2: memref<32x128xbf16, #tpu.memory_space<vmem>>, %arg3: memref<1x32x128xbf16, #tpu.memory_space<vmem>>, %arg4: memref<16x1xf32, #tpu.memory_space<vmem>>, %arg5: memref<16x128xbf16, #tpu.memory_space<vmem>>, %arg6: memref<32x256xbf16, #tpu.memory_space<vmem>>) attributes {dimension_semantics = [#tpu.dimension_semantics<parallel>], iteration_bounds = array<i64: 2>, scalar_prefetch = 0 : i64, scratch_operands = 1 : i64, tpu.core_type = #tpu.core_type<tc>, window_params = [{pipeline_mode = #tpu.pipeline_mode<synchronous>, transform_indices = @transform_0, window_bounds = array<i64: 16, 288>}, {transform_indices = @transform_1, window_bounds = array<i64: 32, 128>}, {transform_indices = @transform_2, window_bounds = array<i64: 1, 32, 128>}, {pipeline_mode = #tpu.pipeline_mode<synchronous>, transform_indices = @transform_3, window_bounds = array<i64: 16, 1>}, {transform_indices = @transform_4, window_bounds = array<i64: 16, 128>}]} {
    %c0 = arith.constant 0 : index
    %c0_0 = arith.constant 0 : index
    %0 = vector.load %arg2[%c0, %c0_0] : memref<32x128xbf16, #tpu.memory_space<vmem>>, vector<32x128xbf16>
    %c0_1 = arith.constant 0 : index
    %c0_2 = arith.constant 0 : index
    %1 = vector.load %arg6[%c0_1, %c0_2] : memref<32x256xbf16, #tpu.memory_space<vmem>>, vector<32x128xbf16>
    tpu.vector_store %arg6[%c0_1, %c0_2], %0 {strides = array<i32>} : memref<32x256xbf16, #tpu.memory_space<vmem>>, vector<32x128xbf16>,
    %c0_3 = arith.constant 0 : index
    %c0_4 = arith.constant 0 : index
    %c0_5 = arith.constant 0 : index
    %2 = vector.load %arg3[%c0_3, %c0_4, %c0_5] : memref<1x32x128xbf16, #tpu.memory_space<vmem>>, vector<1x32x128xbf16>
    %3 = vector.shape_cast %2 : vector<1x32x128xbf16> to vector<32x128xbf16>
    %c0_6 = arith.constant 0 : index
    %c128 = arith.constant 128 : index
    %4 = vector.load %arg6[%c0_6, %c128] : memref<32x256xbf16, #tpu.memory_space<vmem>>, vector<32x128xbf16>
    tpu.vector_store %arg6[%c0_6, %c128], %3 {strides = array<i32>} : memref<32x256xbf16, #tpu.memory_space<vmem>>, vector<32x128xbf16>,
    %c0_7 = arith.constant 0 : index
    %c0_8 = arith.constant 0 : index
    %5 = vector.load %arg6[%c0_7, %c0_8] : memref<32x256xbf16, #tpu.memory_space<vmem>>, vector<32x128xbf16>
    %c0_9 = arith.constant 0 : index
    %c0_10 = arith.constant 0 : index
    %6 = vector.load %arg1[%c0_9, %c0_10] : memref<16x288xbf16, #tpu.memory_space<vmem>>, vector<16x32xbf16>
    %cst = arith.constant dense<0.000000e+00> : vector<16x128xf32>
    %7 = tpu.matmul %6, %5, %cst {dimension_numbers = #tpu.dot_dimension_numbers<[1], [0], [0], [1], [0, 0, 1, 1], [], []>} : vector<16x32xbf16>, vector<32x128xbf16>, vector<16x128xf32> -> vector<16x128xf32>
    %c0_11 = arith.constant 0 : index
    %c1 = arith.constant 1 : index
    %8 = vector.load %arg6[%c0_11, %c1] : memref<32x256xbf16, #tpu.memory_space<vmem>>, vector<32x128xbf16>
    %c0_12 = arith.constant 0 : index
    %c32 = arith.constant 32 : index
    %9 = vector.load %arg1[%c0_12, %c32] : memref<16x288xbf16, #tpu.memory_space<vmem>>, vector<16x32xbf16>
    %cst_13 = arith.constant dense<0.000000e+00> : vector<16x128xf32>
    %10 = tpu.matmul %9, %8, %cst_13 {dimension_numbers = #tpu.dot_dimension_numbers<[1], [0], [0], [1], [0, 0, 1, 1], [], []>} : vector<16x32xbf16>, vector<32x128xbf16>, vector<16x128xf32> -> vector<16x128xf32>
    %11 = arith.addf %7, %10 : vector<16x128xf32>
    %c0_14 = arith.constant 0 : index
    %c2 = arith.constant 2 : index
    %12 = vector.load %arg6[%c0_14, %c2] : memref<32x256xbf16, #tpu.memory_space<vmem>>, vector<32x128xbf16>
    %c0_15 = arith.constant 0 : index
    %c64 = arith.constant 64 : index
    %13 = vector.load %arg1[%c0_15, %c64] : memref<16x288xbf16, #tpu.memory_space<vmem>>, vector<16x32xbf16>
    %cst_16 = arith.constant dense<0.000000e+00> : vector<16x128xf32>
    %14 = tpu.matmul %13, %12, %cst_16 {dimension_numbers = #tpu.dot_dimension_numbers<[1], [0], [0], [1], [0, 0, 1, 1], [], []>} : vector<16x32xbf16>, vector<32x128xbf16>, vector<16x128xf32> -> vector<16x128xf32>
    %15 = arith.addf %11, %14 : vector<16x128xf32>
    %c0_17 = arith.constant 0 : index
    %c10 = arith.constant 10 : index
    %16 = vector.load %arg6[%c0_17, %c10] : memref<32x256xbf16, #tpu.memory_space<vmem>>, vector<32x128xbf16>
    %c0_18 = arith.constant 0 : index
    %c96 = arith.constant 96 : index
    %17 = vector.load %arg1[%c0_18, %c96] : memref<16x288xbf16, #tpu.memory_space<vmem>>, vector<16x32xbf16>
    %cst_19 = arith.constant dense<0.000000e+00> : vector<16x128xf32>
    %18 = tpu.matmul %17, %16, %cst_19 {dimension_numbers = #tpu.dot_dimension_numbers<[1], [0], [0], [1], [0, 0, 1, 1], [], []>} : vector<16x32xbf16>, vector<32x128xbf16>, vector<16x128xf32> -> vector<16x128xf32>
    %19 = arith.addf %15, %18 : vector<16x128xf32>
    %c0_20 = arith.constant 0 : index
    %c11 = arith.constant 11 : index
    %20 = vector.load %arg6[%c0_20, %c11] : memref<32x256xbf16, #tpu.memory_space<vmem>>, vector<32x128xbf16>
    %c0_21 = arith.constant 0 : index
    %c128_22 = arith.constant 128 : index
    %21 = vector.load %arg1[%c0_21, %c128_22] : memref<16x288xbf16, #tpu.memory_space<vmem>>, vector<16x32xbf16>
    %cst_23 = arith.constant dense<0.000000e+00> : vector<16x128xf32>
    %22 = tpu.matmul %21, %20, %cst_23 {dimension_numbers = #tpu.dot_dimension_numbers<[1], [0], [0], [1], [0, 0, 1, 1], [], []>} : vector<16x32xbf16>, vector<32x128xbf16>, vector<16x128xf32> -> vector<16x128xf32>
    %23 = arith.addf %19, %22 : vector<16x128xf32>
    %c0_24 = arith.constant 0 : index
    %c12 = arith.constant 12 : index
    %24 = vector.load %arg6[%c0_24, %c12] : memref<32x256xbf16, #tpu.memory_space<vmem>>, vector<32x128xbf16>
    %c0_25 = arith.constant 0 : index
    %c160 = arith.constant 160 : index
    %25 = vector.load %arg1[%c0_25, %c160] : memref<16x288xbf16, #tpu.memory_space<vmem>>, vector<16x32xbf16>
    %cst_26 = arith.constant dense<0.000000e+00> : vector<16x128xf32>
    %26 = tpu.matmul %25, %24, %cst_26 {dimension_numbers = #tpu.dot_dimension_numbers<[1], [0], [0], [1], [0, 0, 1, 1], [], []>} : vector<16x32xbf16>, vector<32x128xbf16>, vector<16x128xf32> -> vector<16x128xf32>
    %27 = arith.addf %23, %26 : vector<16x128xf32>
    %c0_27 = arith.constant 0 : index
    %c20 = arith.constant 20 : index
    %28 = vector.load %arg6[%c0_27, %c20] : memref<32x256xbf16, #tpu.memory_space<vmem>>, vector<32x128xbf16>
    %c0_28 = arith.constant 0 : index
    %c192 = arith.constant 192 : index
    %29 = vector.load %arg1[%c0_28, %c192] : memref<16x288xbf16, #tpu.memory_space<vmem>>, vector<16x32xbf16>
    %cst_29 = arith.constant dense<0.000000e+00> : vector<16x128xf32>
    %30 = tpu.matmul %29, %28, %cst_29 {dimension_numbers = #tpu.dot_dimension_numbers<[1], [0], [0], [1], [0, 0, 1, 1], [], []>} : vector<16x32xbf16>, vector<32x128xbf16>, vector<16x128xf32> -> vector<16x128xf32>
    %31 = arith.addf %27, %30 : vector<16x128xf32>
    %c0_30 = arith.constant 0 : index
    %c21 = arith.constant 21 : index
    %32 = vector.load %arg6[%c0_30, %c21] : memref<32x256xbf16, #tpu.memory_space<vmem>>, vector<32x128xbf16>
    %c0_31 = arith.constant 0 : index
    %c224 = arith.constant 224 : index
    %33 = vector.load %arg1[%c0_31, %c224] : memref<16x288xbf16, #tpu.memory_space<vmem>>, vector<16x32xbf16>
    %cst_32 = arith.constant dense<0.000000e+00> : vector<16x128xf32>
    %34 = tpu.matmul %33, %32, %cst_32 {dimension_numbers = #tpu.dot_dimension_numbers<[1], [0], [0], [1], [0, 0, 1, 1], [], []>} : vector<16x32xbf16>, vector<32x128xbf16>, vector<16x128xf32> -> vector<16x128xf32>
    %35 = arith.addf %31, %34 : vector<16x128xf32>
    %c0_33 = arith.constant 0 : index
    %c22 = arith.constant 22 : index
    %36 = vector.load %arg6[%c0_33, %c22] : memref<32x256xbf16, #tpu.memory_space<vmem>>, vector<32x128xbf16>
    %c0_34 = arith.constant 0 : index
    %c256 = arith.constant 256 : index
    %37 = vector.load %arg1[%c0_34, %c256] : memref<16x288xbf16, #tpu.memory_space<vmem>>, vector<16x32xbf16>
    %cst_35 = arith.constant dense<0.000000e+00> : vector<16x128xf32>
    %38 = tpu.matmul %37, %36, %cst_35 {dimension_numbers = #tpu.dot_dimension_numbers<[1], [0], [0], [1], [0, 0, 1, 1], [], []>} : vector<16x32xbf16>, vector<32x128xbf16>, vector<16x128xf32> -> vector<16x128xf32>
    %39 = arith.addf %35, %38 : vector<16x128xf32>
    %c0_36 = arith.constant 0 : index
    %c0_37 = arith.constant 0 : index
    %40 = vector.load %arg4[%c0_36, %c0_37] : memref<16x1xf32, #tpu.memory_space<vmem>>, vector<16x1xf32>
    %41 = vector.broadcast %40 : vector<16x1xf32> to vector<16x128xf32>
    %42 = arith.addf %39, %41 : vector<16x128xf32>
    %cst_38 = arith.constant 0.00999999977 : f32
    %43 = vector.broadcast %cst_38 : f32 to vector<16x128xf32>
    %44 = arith.mulf %43, %42 : vector<16x128xf32>
    %45 = arith.maximumf %42, %44 : vector<16x128xf32>
    %46 = arith.truncf %45 : vector<16x128xf32> to vector<16x128xbf16>
    %c0_39 = arith.constant 0 : index
    %c0_40 = arith.constant 0 : index
    %47 = vector.load %arg5[%c0_39, %c0_40] : memref<16x128xbf16, #tpu.memory_space<vmem>>, vector<16x128xbf16>
    tpu.vector_store %arg5[%c0_39, %c0_40], %46 {strides = array<i32>} : memref<16x128xbf16, #tpu.memory_space<vmem>>, vector<16x128xbf16>,
    return
  }
  func.func @transform_0(%arg0: i32) -> (i32, i32) {
    %c0_i32 = arith.constant 0 : i32
    %c0_i32_0 = arith.constant 0 : i32
    %c0_i32_1 = arith.constant 0 : i32
    return %c0_i32, %c0_i32_0 : i32, i32
  }
  func.func @transform_1(%arg0: i32) -> (i32, i32) {
    %c0_i32 = arith.constant 0 : i32
    %c0_i32_0 = arith.constant 0 : i32
    return %c0_i32, %arg0 : i32, i32
  }
  func.func @transform_2(%arg0: i32) -> (i32, i32, i32) {
    %c0_i32 = arith.constant 0 : i32
    %c0_i32_0 = arith.constant 0 : i32
    %c0_i32_1 = arith.constant 0 : i32
    return %arg0, %c0_i32, %c0_i32_0 : i32, i32, i32
  }
  func.func @transform_3(%arg0: i32) -> (i32, i32) {
    %c0_i32 = arith.constant 0 : i32
    %c0_i32_0 = arith.constant 0 : i32
    %c0_i32_1 = arith.constant 0 : i32
    return %c0_i32, %c0_i32_0 : i32, i32
  }
  func.func @transform_4(%arg0: i32) -> (i32, i32) {
    %c0_i32 = arith.constant 0 : i32
    %c0_i32_0 = arith.constant 0 : i32
    return %c0_i32, %arg0 : i32, i32
  }
}

module attributes {stable_mosaic.version = 11 : i64} {
  func.func @_conv_tap_kernel(%arg0: i32, %arg1: memref<16x144xbf16, #tpu.memory_space<vmem>>, %arg2: memref<16x128xbf16, #tpu.memory_space<vmem>>, %arg3: memref<1x16x128xbf16, #tpu.memory_space<vmem>>, %arg4: memref<16x1xf32, #tpu.memory_space<vmem>>, %arg5: memref<16x128xbf16, #tpu.memory_space<vmem>>, %arg6: memref<16x256xbf16, #tpu.memory_space<vmem>>) attributes {dimension_semantics = [#tpu.dimension_semantics<parallel>], iteration_bounds = array<i64: 2>, scalar_prefetch = 0 : i64, scratch_operands = 1 : i64, tpu.core_type = #tpu.core_type<tc>, window_params = [{pipeline_mode = #tpu.pipeline_mode<synchronous>, transform_indices = @transform_0, window_bounds = array<i64: 16, 144>}, {transform_indices = @transform_1, window_bounds = array<i64: 16, 128>}, {transform_indices = @transform_2, window_bounds = array<i64: 1, 16, 128>}, {pipeline_mode = #tpu.pipeline_mode<synchronous>, transform_indices = @transform_3, window_bounds = array<i64: 16, 1>}, {transform_indices = @transform_4, window_bounds = array<i64: 16, 128>}]} {
    %c0 = arith.constant 0 : index
    %c0_0 = arith.constant 0 : index
    %0 = vector.load %arg2[%c0, %c0_0] : memref<16x128xbf16, #tpu.memory_space<vmem>>, vector<16x128xbf16>
    %c0_1 = arith.constant 0 : index
    %c0_2 = arith.constant 0 : index
    %1 = vector.load %arg6[%c0_1, %c0_2] : memref<16x256xbf16, #tpu.memory_space<vmem>>, vector<16x128xbf16>
    tpu.vector_store %arg6[%c0_1, %c0_2], %0 {strides = array<i32>} : memref<16x256xbf16, #tpu.memory_space<vmem>>, vector<16x128xbf16>,
    %c0_3 = arith.constant 0 : index
    %c0_4 = arith.constant 0 : index
    %c0_5 = arith.constant 0 : index
    %2 = vector.load %arg3[%c0_3, %c0_4, %c0_5] : memref<1x16x128xbf16, #tpu.memory_space<vmem>>, vector<1x16x128xbf16>
    %3 = vector.shape_cast %2 : vector<1x16x128xbf16> to vector<16x128xbf16>
    %c0_6 = arith.constant 0 : index
    %c128 = arith.constant 128 : index
    %4 = vector.load %arg6[%c0_6, %c128] : memref<16x256xbf16, #tpu.memory_space<vmem>>, vector<16x128xbf16>
    tpu.vector_store %arg6[%c0_6, %c128], %3 {strides = array<i32>} : memref<16x256xbf16, #tpu.memory_space<vmem>>, vector<16x128xbf16>,
    %c0_7 = arith.constant 0 : index
    %c0_8 = arith.constant 0 : index
    %5 = vector.load %arg6[%c0_7, %c0_8] : memref<16x256xbf16, #tpu.memory_space<vmem>>, vector<16x128xbf16>
    %c0_9 = arith.constant 0 : index
    %c0_10 = arith.constant 0 : index
    %6 = vector.load %arg1[%c0_9, %c0_10] : memref<16x144xbf16, #tpu.memory_space<vmem>>, vector<16x16xbf16>
    %cst = arith.constant dense<0.000000e+00> : vector<16x128xf32>
    %7 = tpu.matmul %6, %5, %cst {dimension_numbers = #tpu.dot_dimension_numbers<[1], [0], [0], [1], [0, 0, 1, 1], [], []>} : vector<16x16xbf16>, vector<16x128xbf16>, vector<16x128xf32> -> vector<16x128xf32>
    %c0_11 = arith.constant 0 : index
    %c1 = arith.constant 1 : index
    %8 = vector.load %arg6[%c0_11, %c1] : memref<16x256xbf16, #tpu.memory_space<vmem>>, vector<16x128xbf16>
    %c0_12 = arith.constant 0 : index
    %c16 = arith.constant 16 : index
    %9 = vector.load %arg1[%c0_12, %c16] : memref<16x144xbf16, #tpu.memory_space<vmem>>, vector<16x16xbf16>
    %cst_13 = arith.constant dense<0.000000e+00> : vector<16x128xf32>
    %10 = tpu.matmul %9, %8, %cst_13 {dimension_numbers = #tpu.dot_dimension_numbers<[1], [0], [0], [1], [0, 0, 1, 1], [], []>} : vector<16x16xbf16>, vector<16x128xbf16>, vector<16x128xf32> -> vector<16x128xf32>
    %11 = arith.addf %7, %10 : vector<16x128xf32>
    %c0_14 = arith.constant 0 : index
    %c2 = arith.constant 2 : index
    %12 = vector.load %arg6[%c0_14, %c2] : memref<16x256xbf16, #tpu.memory_space<vmem>>, vector<16x128xbf16>
    %c0_15 = arith.constant 0 : index
    %c32 = arith.constant 32 : index
    %13 = vector.load %arg1[%c0_15, %c32] : memref<16x144xbf16, #tpu.memory_space<vmem>>, vector<16x16xbf16>
    %cst_16 = arith.constant dense<0.000000e+00> : vector<16x128xf32>
    %14 = tpu.matmul %13, %12, %cst_16 {dimension_numbers = #tpu.dot_dimension_numbers<[1], [0], [0], [1], [0, 0, 1, 1], [], []>} : vector<16x16xbf16>, vector<16x128xbf16>, vector<16x128xf32> -> vector<16x128xf32>
    %15 = arith.addf %11, %14 : vector<16x128xf32>
    %c0_17 = arith.constant 0 : index
    %c10 = arith.constant 10 : index
    %16 = vector.load %arg6[%c0_17, %c10] : memref<16x256xbf16, #tpu.memory_space<vmem>>, vector<16x128xbf16>
    %c0_18 = arith.constant 0 : index
    %c48 = arith.constant 48 : index
    %17 = vector.load %arg1[%c0_18, %c48] : memref<16x144xbf16, #tpu.memory_space<vmem>>, vector<16x16xbf16>
    %cst_19 = arith.constant dense<0.000000e+00> : vector<16x128xf32>
    %18 = tpu.matmul %17, %16, %cst_19 {dimension_numbers = #tpu.dot_dimension_numbers<[1], [0], [0], [1], [0, 0, 1, 1], [], []>} : vector<16x16xbf16>, vector<16x128xbf16>, vector<16x128xf32> -> vector<16x128xf32>
    %19 = arith.addf %15, %18 : vector<16x128xf32>
    %c0_20 = arith.constant 0 : index
    %c11 = arith.constant 11 : index
    %20 = vector.load %arg6[%c0_20, %c11] : memref<16x256xbf16, #tpu.memory_space<vmem>>, vector<16x128xbf16>
    %c0_21 = arith.constant 0 : index
    %c64 = arith.constant 64 : index
    %21 = vector.load %arg1[%c0_21, %c64] : memref<16x144xbf16, #tpu.memory_space<vmem>>, vector<16x16xbf16>
    %cst_22 = arith.constant dense<0.000000e+00> : vector<16x128xf32>
    %22 = tpu.matmul %21, %20, %cst_22 {dimension_numbers = #tpu.dot_dimension_numbers<[1], [0], [0], [1], [0, 0, 1, 1], [], []>} : vector<16x16xbf16>, vector<16x128xbf16>, vector<16x128xf32> -> vector<16x128xf32>
    %23 = arith.addf %19, %22 : vector<16x128xf32>
    %c0_23 = arith.constant 0 : index
    %c12 = arith.constant 12 : index
    %24 = vector.load %arg6[%c0_23, %c12] : memref<16x256xbf16, #tpu.memory_space<vmem>>, vector<16x128xbf16>
    %c0_24 = arith.constant 0 : index
    %c80 = arith.constant 80 : index
    %25 = vector.load %arg1[%c0_24, %c80] : memref<16x144xbf16, #tpu.memory_space<vmem>>, vector<16x16xbf16>
    %cst_25 = arith.constant dense<0.000000e+00> : vector<16x128xf32>
    %26 = tpu.matmul %25, %24, %cst_25 {dimension_numbers = #tpu.dot_dimension_numbers<[1], [0], [0], [1], [0, 0, 1, 1], [], []>} : vector<16x16xbf16>, vector<16x128xbf16>, vector<16x128xf32> -> vector<16x128xf32>
    %27 = arith.addf %23, %26 : vector<16x128xf32>
    %c0_26 = arith.constant 0 : index
    %c20 = arith.constant 20 : index
    %28 = vector.load %arg6[%c0_26, %c20] : memref<16x256xbf16, #tpu.memory_space<vmem>>, vector<16x128xbf16>
    %c0_27 = arith.constant 0 : index
    %c96 = arith.constant 96 : index
    %29 = vector.load %arg1[%c0_27, %c96] : memref<16x144xbf16, #tpu.memory_space<vmem>>, vector<16x16xbf16>
    %cst_28 = arith.constant dense<0.000000e+00> : vector<16x128xf32>
    %30 = tpu.matmul %29, %28, %cst_28 {dimension_numbers = #tpu.dot_dimension_numbers<[1], [0], [0], [1], [0, 0, 1, 1], [], []>} : vector<16x16xbf16>, vector<16x128xbf16>, vector<16x128xf32> -> vector<16x128xf32>
    %31 = arith.addf %27, %30 : vector<16x128xf32>
    %c0_29 = arith.constant 0 : index
    %c21 = arith.constant 21 : index
    %32 = vector.load %arg6[%c0_29, %c21] : memref<16x256xbf16, #tpu.memory_space<vmem>>, vector<16x128xbf16>
    %c0_30 = arith.constant 0 : index
    %c112 = arith.constant 112 : index
    %33 = vector.load %arg1[%c0_30, %c112] : memref<16x144xbf16, #tpu.memory_space<vmem>>, vector<16x16xbf16>
    %cst_31 = arith.constant dense<0.000000e+00> : vector<16x128xf32>
    %34 = tpu.matmul %33, %32, %cst_31 {dimension_numbers = #tpu.dot_dimension_numbers<[1], [0], [0], [1], [0, 0, 1, 1], [], []>} : vector<16x16xbf16>, vector<16x128xbf16>, vector<16x128xf32> -> vector<16x128xf32>
    %35 = arith.addf %31, %34 : vector<16x128xf32>
    %c0_32 = arith.constant 0 : index
    %c22 = arith.constant 22 : index
    %36 = vector.load %arg6[%c0_32, %c22] : memref<16x256xbf16, #tpu.memory_space<vmem>>, vector<16x128xbf16>
    %c0_33 = arith.constant 0 : index
    %c128_34 = arith.constant 128 : index
    %37 = vector.load %arg1[%c0_33, %c128_34] : memref<16x144xbf16, #tpu.memory_space<vmem>>, vector<16x16xbf16>
    %cst_35 = arith.constant dense<0.000000e+00> : vector<16x128xf32>
    %38 = tpu.matmul %37, %36, %cst_35 {dimension_numbers = #tpu.dot_dimension_numbers<[1], [0], [0], [1], [0, 0, 1, 1], [], []>} : vector<16x16xbf16>, vector<16x128xbf16>, vector<16x128xf32> -> vector<16x128xf32>
    %39 = arith.addf %35, %38 : vector<16x128xf32>
    %c0_36 = arith.constant 0 : index
    %c0_37 = arith.constant 0 : index
    %40 = vector.load %arg4[%c0_36, %c0_37] : memref<16x1xf32, #tpu.memory_space<vmem>>, vector<16x1xf32>
    %41 = vector.broadcast %40 : vector<16x1xf32> to vector<16x128xf32>
    %42 = arith.addf %39, %41 : vector<16x128xf32>
    %cst_38 = arith.constant 0.00999999977 : f32
    %43 = vector.broadcast %cst_38 : f32 to vector<16x128xf32>
    %44 = arith.mulf %43, %42 : vector<16x128xf32>
    %45 = arith.maximumf %42, %44 : vector<16x128xf32>
    %46 = arith.truncf %45 : vector<16x128xf32> to vector<16x128xbf16>
    %c0_39 = arith.constant 0 : index
    %c0_40 = arith.constant 0 : index
    %47 = vector.load %arg5[%c0_39, %c0_40] : memref<16x128xbf16, #tpu.memory_space<vmem>>, vector<16x128xbf16>
    tpu.vector_store %arg5[%c0_39, %c0_40], %46 {strides = array<i32>} : memref<16x128xbf16, #tpu.memory_space<vmem>>, vector<16x128xbf16>,
    return
  }
  func.func @transform_0(%arg0: i32) -> (i32, i32) {
    %c0_i32 = arith.constant 0 : i32
    %c0_i32_0 = arith.constant 0 : i32
    %c0_i32_1 = arith.constant 0 : i32
    return %c0_i32, %c0_i32_0 : i32, i32
  }
  func.func @transform_1(%arg0: i32) -> (i32, i32) {
    %c0_i32 = arith.constant 0 : i32
    %c0_i32_0 = arith.constant 0 : i32
    return %c0_i32, %arg0 : i32, i32
  }
  func.func @transform_2(%arg0: i32) -> (i32, i32, i32) {
    %c0_i32 = arith.constant 0 : i32
    %c0_i32_0 = arith.constant 0 : i32
    %c0_i32_1 = arith.constant 0 : i32
    return %arg0, %c0_i32, %c0_i32_0 : i32, i32, i32
  }
  func.func @transform_3(%arg0: i32) -> (i32, i32) {
    %c0_i32 = arith.constant 0 : i32
    %c0_i32_0 = arith.constant 0 : i32
    %c0_i32_1 = arith.constant 0 : i32
    return %c0_i32, %c0_i32_0 : i32, i32
  }
  func.func @transform_4(%arg0: i32) -> (i32, i32) {
    %c0_i32 = arith.constant 0 : i32
    %c0_i32_0 = arith.constant 0 : i32
    return %c0_i32, %arg0 : i32, i32
  }
}

module attributes {stable_mosaic.version = 11 : i64} {
  func.func @_conv_tap_kernel(%arg0: i32, %arg1: memref<32x576xbf16, #tpu.memory_space<vmem>>, %arg2: memref<64x128xbf16, #tpu.memory_space<vmem>>, %arg3: memref<1x64x128xbf16, #tpu.memory_space<vmem>>, %arg4: memref<32x1xf32, #tpu.memory_space<vmem>>, %arg5: memref<32x128xbf16, #tpu.memory_space<vmem>>, %arg6: memref<64x256xbf16, #tpu.memory_space<vmem>>) attributes {dimension_semantics = [#tpu.dimension_semantics<parallel>], iteration_bounds = array<i64: 1>, scalar_prefetch = 0 : i64, scratch_operands = 1 : i64, tpu.core_type = #tpu.core_type<tc>, window_params = [{pipeline_mode = #tpu.pipeline_mode<synchronous>, transform_indices = @transform_0, window_bounds = array<i64: 32, 576>}, {transform_indices = @transform_1, window_bounds = array<i64: 64, 128>}, {transform_indices = @transform_2, window_bounds = array<i64: 1, 64, 128>}, {pipeline_mode = #tpu.pipeline_mode<synchronous>, transform_indices = @transform_3, window_bounds = array<i64: 32, 1>}, {transform_indices = @transform_4, window_bounds = array<i64: 32, 128>}]} {
    %c0 = arith.constant 0 : index
    %c0_0 = arith.constant 0 : index
    %0 = vector.load %arg2[%c0, %c0_0] : memref<64x128xbf16, #tpu.memory_space<vmem>>, vector<64x128xbf16>
    %c0_1 = arith.constant 0 : index
    %c0_2 = arith.constant 0 : index
    %1 = vector.load %arg6[%c0_1, %c0_2] : memref<64x256xbf16, #tpu.memory_space<vmem>>, vector<64x128xbf16>
    tpu.vector_store %arg6[%c0_1, %c0_2], %0 {strides = array<i32>} : memref<64x256xbf16, #tpu.memory_space<vmem>>, vector<64x128xbf16>,
    %c0_3 = arith.constant 0 : index
    %c0_4 = arith.constant 0 : index
    %c0_5 = arith.constant 0 : index
    %2 = vector.load %arg3[%c0_3, %c0_4, %c0_5] : memref<1x64x128xbf16, #tpu.memory_space<vmem>>, vector<1x64x128xbf16>
    %3 = vector.shape_cast %2 : vector<1x64x128xbf16> to vector<64x128xbf16>
    %c0_6 = arith.constant 0 : index
    %c128 = arith.constant 128 : index
    %4 = vector.load %arg6[%c0_6, %c128] : memref<64x256xbf16, #tpu.memory_space<vmem>>, vector<64x128xbf16>
    tpu.vector_store %arg6[%c0_6, %c128], %3 {strides = array<i32>} : memref<64x256xbf16, #tpu.memory_space<vmem>>, vector<64x128xbf16>,
    %c0_7 = arith.constant 0 : index
    %c0_8 = arith.constant 0 : index
    %5 = vector.load %arg6[%c0_7, %c0_8] : memref<64x256xbf16, #tpu.memory_space<vmem>>, vector<64x128xbf16>
    %c0_9 = arith.constant 0 : index
    %c0_10 = arith.constant 0 : index
    %6 = vector.load %arg1[%c0_9, %c0_10] : memref<32x576xbf16, #tpu.memory_space<vmem>>, vector<32x64xbf16>
    %cst = arith.constant dense<0.000000e+00> : vector<32x128xf32>
    %7 = tpu.matmul %6, %5, %cst {dimension_numbers = #tpu.dot_dimension_numbers<[1], [0], [0], [1], [0, 0, 1, 1], [], []>} : vector<32x64xbf16>, vector<64x128xbf16>, vector<32x128xf32> -> vector<32x128xf32>
    %c0_11 = arith.constant 0 : index
    %c1 = arith.constant 1 : index
    %8 = vector.load %arg6[%c0_11, %c1] : memref<64x256xbf16, #tpu.memory_space<vmem>>, vector<64x128xbf16>
    %c0_12 = arith.constant 0 : index
    %c64 = arith.constant 64 : index
    %9 = vector.load %arg1[%c0_12, %c64] : memref<32x576xbf16, #tpu.memory_space<vmem>>, vector<32x64xbf16>
    %cst_13 = arith.constant dense<0.000000e+00> : vector<32x128xf32>
    %10 = tpu.matmul %9, %8, %cst_13 {dimension_numbers = #tpu.dot_dimension_numbers<[1], [0], [0], [1], [0, 0, 1, 1], [], []>} : vector<32x64xbf16>, vector<64x128xbf16>, vector<32x128xf32> -> vector<32x128xf32>
    %11 = arith.addf %7, %10 : vector<32x128xf32>
    %c0_14 = arith.constant 0 : index
    %c2 = arith.constant 2 : index
    %12 = vector.load %arg6[%c0_14, %c2] : memref<64x256xbf16, #tpu.memory_space<vmem>>, vector<64x128xbf16>
    %c0_15 = arith.constant 0 : index
    %c128_16 = arith.constant 128 : index
    %13 = vector.load %arg1[%c0_15, %c128_16] : memref<32x576xbf16, #tpu.memory_space<vmem>>, vector<32x64xbf16>
    %cst_17 = arith.constant dense<0.000000e+00> : vector<32x128xf32>
    %14 = tpu.matmul %13, %12, %cst_17 {dimension_numbers = #tpu.dot_dimension_numbers<[1], [0], [0], [1], [0, 0, 1, 1], [], []>} : vector<32x64xbf16>, vector<64x128xbf16>, vector<32x128xf32> -> vector<32x128xf32>
    %15 = arith.addf %11, %14 : vector<32x128xf32>
    %c0_18 = arith.constant 0 : index
    %c6 = arith.constant 6 : index
    %16 = vector.load %arg6[%c0_18, %c6] : memref<64x256xbf16, #tpu.memory_space<vmem>>, vector<64x128xbf16>
    %c0_19 = arith.constant 0 : index
    %c192 = arith.constant 192 : index
    %17 = vector.load %arg1[%c0_19, %c192] : memref<32x576xbf16, #tpu.memory_space<vmem>>, vector<32x64xbf16>
    %cst_20 = arith.constant dense<0.000000e+00> : vector<32x128xf32>
    %18 = tpu.matmul %17, %16, %cst_20 {dimension_numbers = #tpu.dot_dimension_numbers<[1], [0], [0], [1], [0, 0, 1, 1], [], []>} : vector<32x64xbf16>, vector<64x128xbf16>, vector<32x128xf32> -> vector<32x128xf32>
    %19 = arith.addf %15, %18 : vector<32x128xf32>
    %c0_21 = arith.constant 0 : index
    %c7 = arith.constant 7 : index
    %20 = vector.load %arg6[%c0_21, %c7] : memref<64x256xbf16, #tpu.memory_space<vmem>>, vector<64x128xbf16>
    %c0_22 = arith.constant 0 : index
    %c256 = arith.constant 256 : index
    %21 = vector.load %arg1[%c0_22, %c256] : memref<32x576xbf16, #tpu.memory_space<vmem>>, vector<32x64xbf16>
    %cst_23 = arith.constant dense<0.000000e+00> : vector<32x128xf32>
    %22 = tpu.matmul %21, %20, %cst_23 {dimension_numbers = #tpu.dot_dimension_numbers<[1], [0], [0], [1], [0, 0, 1, 1], [], []>} : vector<32x64xbf16>, vector<64x128xbf16>, vector<32x128xf32> -> vector<32x128xf32>
    %23 = arith.addf %19, %22 : vector<32x128xf32>
    %c0_24 = arith.constant 0 : index
    %c8 = arith.constant 8 : index
    %24 = vector.load %arg6[%c0_24, %c8] : memref<64x256xbf16, #tpu.memory_space<vmem>>, vector<64x128xbf16>
    %c0_25 = arith.constant 0 : index
    %c320 = arith.constant 320 : index
    %25 = vector.load %arg1[%c0_25, %c320] : memref<32x576xbf16, #tpu.memory_space<vmem>>, vector<32x64xbf16>
    %cst_26 = arith.constant dense<0.000000e+00> : vector<32x128xf32>
    %26 = tpu.matmul %25, %24, %cst_26 {dimension_numbers = #tpu.dot_dimension_numbers<[1], [0], [0], [1], [0, 0, 1, 1], [], []>} : vector<32x64xbf16>, vector<64x128xbf16>, vector<32x128xf32> -> vector<32x128xf32>
    %27 = arith.addf %23, %26 : vector<32x128xf32>
    %c0_27 = arith.constant 0 : index
    %c12 = arith.constant 12 : index
    %28 = vector.load %arg6[%c0_27, %c12] : memref<64x256xbf16, #tpu.memory_space<vmem>>, vector<64x128xbf16>
    %c0_28 = arith.constant 0 : index
    %c384 = arith.constant 384 : index
    %29 = vector.load %arg1[%c0_28, %c384] : memref<32x576xbf16, #tpu.memory_space<vmem>>, vector<32x64xbf16>
    %cst_29 = arith.constant dense<0.000000e+00> : vector<32x128xf32>
    %30 = tpu.matmul %29, %28, %cst_29 {dimension_numbers = #tpu.dot_dimension_numbers<[1], [0], [0], [1], [0, 0, 1, 1], [], []>} : vector<32x64xbf16>, vector<64x128xbf16>, vector<32x128xf32> -> vector<32x128xf32>
    %31 = arith.addf %27, %30 : vector<32x128xf32>
    %c0_30 = arith.constant 0 : index
    %c13 = arith.constant 13 : index
    %32 = vector.load %arg6[%c0_30, %c13] : memref<64x256xbf16, #tpu.memory_space<vmem>>, vector<64x128xbf16>
    %c0_31 = arith.constant 0 : index
    %c448 = arith.constant 448 : index
    %33 = vector.load %arg1[%c0_31, %c448] : memref<32x576xbf16, #tpu.memory_space<vmem>>, vector<32x64xbf16>
    %cst_32 = arith.constant dense<0.000000e+00> : vector<32x128xf32>
    %34 = tpu.matmul %33, %32, %cst_32 {dimension_numbers = #tpu.dot_dimension_numbers<[1], [0], [0], [1], [0, 0, 1, 1], [], []>} : vector<32x64xbf16>, vector<64x128xbf16>, vector<32x128xf32> -> vector<32x128xf32>
    %35 = arith.addf %31, %34 : vector<32x128xf32>
    %c0_33 = arith.constant 0 : index
    %c14 = arith.constant 14 : index
    %36 = vector.load %arg6[%c0_33, %c14] : memref<64x256xbf16, #tpu.memory_space<vmem>>, vector<64x128xbf16>
    %c0_34 = arith.constant 0 : index
    %c512 = arith.constant 512 : index
    %37 = vector.load %arg1[%c0_34, %c512] : memref<32x576xbf16, #tpu.memory_space<vmem>>, vector<32x64xbf16>
    %cst_35 = arith.constant dense<0.000000e+00> : vector<32x128xf32>
    %38 = tpu.matmul %37, %36, %cst_35 {dimension_numbers = #tpu.dot_dimension_numbers<[1], [0], [0], [1], [0, 0, 1, 1], [], []>} : vector<32x64xbf16>, vector<64x128xbf16>, vector<32x128xf32> -> vector<32x128xf32>
    %39 = arith.addf %35, %38 : vector<32x128xf32>
    %c0_36 = arith.constant 0 : index
    %c0_37 = arith.constant 0 : index
    %40 = vector.load %arg4[%c0_36, %c0_37] : memref<32x1xf32, #tpu.memory_space<vmem>>, vector<32x1xf32>
    %41 = vector.broadcast %40 : vector<32x1xf32> to vector<32x128xf32>
    %42 = arith.addf %39, %41 : vector<32x128xf32>
    %cst_38 = arith.constant 0.00999999977 : f32
    %43 = vector.broadcast %cst_38 : f32 to vector<32x128xf32>
    %44 = arith.mulf %43, %42 : vector<32x128xf32>
    %45 = arith.maximumf %42, %44 : vector<32x128xf32>
    %46 = arith.truncf %45 : vector<32x128xf32> to vector<32x128xbf16>
    %c0_39 = arith.constant 0 : index
    %c0_40 = arith.constant 0 : index
    %47 = vector.load %arg5[%c0_39, %c0_40] : memref<32x128xbf16, #tpu.memory_space<vmem>>, vector<32x128xbf16>
    tpu.vector_store %arg5[%c0_39, %c0_40], %46 {strides = array<i32>} : memref<32x128xbf16, #tpu.memory_space<vmem>>, vector<32x128xbf16>,
    return
  }
  func.func @transform_0(%arg0: i32) -> (i32, i32) {
    %c0_i32 = arith.constant 0 : i32
    %c0_i32_0 = arith.constant 0 : i32
    %c0_i32_1 = arith.constant 0 : i32
    return %c0_i32, %c0_i32_0 : i32, i32
  }
  func.func @transform_1(%arg0: i32) -> (i32, i32) {
    %c0_i32 = arith.constant 0 : i32
    %c0_i32_0 = arith.constant 0 : i32
    return %c0_i32, %arg0 : i32, i32
  }
  func.func @transform_2(%arg0: i32) -> (i32, i32, i32) {
    %c0_i32 = arith.constant 0 : i32
    %c0_i32_0 = arith.constant 0 : i32
    %c0_i32_1 = arith.constant 0 : i32
    return %arg0, %c0_i32, %c0_i32_0 : i32, i32, i32
  }
  func.func @transform_3(%arg0: i32) -> (i32, i32) {
    %c0_i32 = arith.constant 0 : i32
    %c0_i32_0 = arith.constant 0 : i32
    %c0_i32_1 = arith.constant 0 : i32
    return %c0_i32, %c0_i32_0 : i32, i32
  }
  func.func @transform_4(%arg0: i32) -> (i32, i32) {
    %c0_i32 = arith.constant 0 : i32
    %c0_i32_0 = arith.constant 0 : i32
    return %c0_i32, %arg0 : i32, i32
  }
}

module attributes {stable_mosaic.version = 11 : i64} {
  func.func @_conv_tap_kernel(%arg0: i32, %arg1: memref<32x288xbf16, #tpu.memory_space<vmem>>, %arg2: memref<32x128xbf16, #tpu.memory_space<vmem>>, %arg3: memref<1x32x128xbf16, #tpu.memory_space<vmem>>, %arg4: memref<32x1xf32, #tpu.memory_space<vmem>>, %arg5: memref<32x32xbf16, #tpu.memory_space<vmem>>, %arg6: memref<32x1xf32, #tpu.memory_space<vmem>>, %arg7: memref<32x128xf32, #tpu.memory_space<vmem>>, %arg8: memref<32x256xbf16, #tpu.memory_space<vmem>>) attributes {dimension_semantics = [#tpu.dimension_semantics<parallel>], iteration_bounds = array<i64: 1>, scalar_prefetch = 0 : i64, scratch_operands = 1 : i64, tpu.core_type = #tpu.core_type<tc>, window_params = [{pipeline_mode = #tpu.pipeline_mode<synchronous>, transform_indices = @transform_0, window_bounds = array<i64: 32, 288>}, {transform_indices = @transform_1, window_bounds = array<i64: 32, 128>}, {transform_indices = @transform_2, window_bounds = array<i64: 1, 32, 128>}, {pipeline_mode = #tpu.pipeline_mode<synchronous>, transform_indices = @transform_3, window_bounds = array<i64: 32, 1>}, {pipeline_mode = #tpu.pipeline_mode<synchronous>, transform_indices = @transform_4, window_bounds = array<i64: 32, 32>}, {pipeline_mode = #tpu.pipeline_mode<synchronous>, transform_indices = @transform_5, window_bounds = array<i64: 32, 1>}, {transform_indices = @transform_6, window_bounds = array<i64: 32, 128>}]} {
    %c0 = arith.constant 0 : index
    %c0_0 = arith.constant 0 : index
    %0 = vector.load %arg2[%c0, %c0_0] : memref<32x128xbf16, #tpu.memory_space<vmem>>, vector<32x128xbf16>
    %c0_1 = arith.constant 0 : index
    %c0_2 = arith.constant 0 : index
    %1 = vector.load %arg8[%c0_1, %c0_2] : memref<32x256xbf16, #tpu.memory_space<vmem>>, vector<32x128xbf16>
    tpu.vector_store %arg8[%c0_1, %c0_2], %0 {strides = array<i32>} : memref<32x256xbf16, #tpu.memory_space<vmem>>, vector<32x128xbf16>,
    %c0_3 = arith.constant 0 : index
    %c0_4 = arith.constant 0 : index
    %c0_5 = arith.constant 0 : index
    %2 = vector.load %arg3[%c0_3, %c0_4, %c0_5] : memref<1x32x128xbf16, #tpu.memory_space<vmem>>, vector<1x32x128xbf16>
    %3 = vector.shape_cast %2 : vector<1x32x128xbf16> to vector<32x128xbf16>
    %c0_6 = arith.constant 0 : index
    %c128 = arith.constant 128 : index
    %4 = vector.load %arg8[%c0_6, %c128] : memref<32x256xbf16, #tpu.memory_space<vmem>>, vector<32x128xbf16>
    tpu.vector_store %arg8[%c0_6, %c128], %3 {strides = array<i32>} : memref<32x256xbf16, #tpu.memory_space<vmem>>, vector<32x128xbf16>,
    %c0_7 = arith.constant 0 : index
    %c0_8 = arith.constant 0 : index
    %5 = vector.load %arg8[%c0_7, %c0_8] : memref<32x256xbf16, #tpu.memory_space<vmem>>, vector<32x128xbf16>
    %c0_9 = arith.constant 0 : index
    %c0_10 = arith.constant 0 : index
    %6 = vector.load %arg1[%c0_9, %c0_10] : memref<32x288xbf16, #tpu.memory_space<vmem>>, vector<32x32xbf16>
    %cst = arith.constant dense<0.000000e+00> : vector<32x128xf32>
    %7 = tpu.matmul %6, %5, %cst {dimension_numbers = #tpu.dot_dimension_numbers<[1], [0], [0], [1], [0, 0, 1, 1], [], []>} : vector<32x32xbf16>, vector<32x128xbf16>, vector<32x128xf32> -> vector<32x128xf32>
    %c0_11 = arith.constant 0 : index
    %c1 = arith.constant 1 : index
    %8 = vector.load %arg8[%c0_11, %c1] : memref<32x256xbf16, #tpu.memory_space<vmem>>, vector<32x128xbf16>
    %c0_12 = arith.constant 0 : index
    %c32 = arith.constant 32 : index
    %9 = vector.load %arg1[%c0_12, %c32] : memref<32x288xbf16, #tpu.memory_space<vmem>>, vector<32x32xbf16>
    %cst_13 = arith.constant dense<0.000000e+00> : vector<32x128xf32>
    %10 = tpu.matmul %9, %8, %cst_13 {dimension_numbers = #tpu.dot_dimension_numbers<[1], [0], [0], [1], [0, 0, 1, 1], [], []>} : vector<32x32xbf16>, vector<32x128xbf16>, vector<32x128xf32> -> vector<32x128xf32>
    %11 = arith.addf %7, %10 : vector<32x128xf32>
    %c0_14 = arith.constant 0 : index
    %c2 = arith.constant 2 : index
    %12 = vector.load %arg8[%c0_14, %c2] : memref<32x256xbf16, #tpu.memory_space<vmem>>, vector<32x128xbf16>
    %c0_15 = arith.constant 0 : index
    %c64 = arith.constant 64 : index
    %13 = vector.load %arg1[%c0_15, %c64] : memref<32x288xbf16, #tpu.memory_space<vmem>>, vector<32x32xbf16>
    %cst_16 = arith.constant dense<0.000000e+00> : vector<32x128xf32>
    %14 = tpu.matmul %13, %12, %cst_16 {dimension_numbers = #tpu.dot_dimension_numbers<[1], [0], [0], [1], [0, 0, 1, 1], [], []>} : vector<32x32xbf16>, vector<32x128xbf16>, vector<32x128xf32> -> vector<32x128xf32>
    %15 = arith.addf %11, %14 : vector<32x128xf32>
    %c0_17 = arith.constant 0 : index
    %c6 = arith.constant 6 : index
    %16 = vector.load %arg8[%c0_17, %c6] : memref<32x256xbf16, #tpu.memory_space<vmem>>, vector<32x128xbf16>
    %c0_18 = arith.constant 0 : index
    %c96 = arith.constant 96 : index
    %17 = vector.load %arg1[%c0_18, %c96] : memref<32x288xbf16, #tpu.memory_space<vmem>>, vector<32x32xbf16>
    %cst_19 = arith.constant dense<0.000000e+00> : vector<32x128xf32>
    %18 = tpu.matmul %17, %16, %cst_19 {dimension_numbers = #tpu.dot_dimension_numbers<[1], [0], [0], [1], [0, 0, 1, 1], [], []>} : vector<32x32xbf16>, vector<32x128xbf16>, vector<32x128xf32> -> vector<32x128xf32>
    %19 = arith.addf %15, %18 : vector<32x128xf32>
    %c0_20 = arith.constant 0 : index
    %c7 = arith.constant 7 : index
    %20 = vector.load %arg8[%c0_20, %c7] : memref<32x256xbf16, #tpu.memory_space<vmem>>, vector<32x128xbf16>
    %c0_21 = arith.constant 0 : index
    %c128_22 = arith.constant 128 : index
    %21 = vector.load %arg1[%c0_21, %c128_22] : memref<32x288xbf16, #tpu.memory_space<vmem>>, vector<32x32xbf16>
    %cst_23 = arith.constant dense<0.000000e+00> : vector<32x128xf32>
    %22 = tpu.matmul %21, %20, %cst_23 {dimension_numbers = #tpu.dot_dimension_numbers<[1], [0], [0], [1], [0, 0, 1, 1], [], []>} : vector<32x32xbf16>, vector<32x128xbf16>, vector<32x128xf32> -> vector<32x128xf32>
    %23 = arith.addf %19, %22 : vector<32x128xf32>
    %c0_24 = arith.constant 0 : index
    %c8 = arith.constant 8 : index
    %24 = vector.load %arg8[%c0_24, %c8] : memref<32x256xbf16, #tpu.memory_space<vmem>>, vector<32x128xbf16>
    %c0_25 = arith.constant 0 : index
    %c160 = arith.constant 160 : index
    %25 = vector.load %arg1[%c0_25, %c160] : memref<32x288xbf16, #tpu.memory_space<vmem>>, vector<32x32xbf16>
    %cst_26 = arith.constant dense<0.000000e+00> : vector<32x128xf32>
    %26 = tpu.matmul %25, %24, %cst_26 {dimension_numbers = #tpu.dot_dimension_numbers<[1], [0], [0], [1], [0, 0, 1, 1], [], []>} : vector<32x32xbf16>, vector<32x128xbf16>, vector<32x128xf32> -> vector<32x128xf32>
    %27 = arith.addf %23, %26 : vector<32x128xf32>
    %c0_27 = arith.constant 0 : index
    %c12 = arith.constant 12 : index
    %28 = vector.load %arg8[%c0_27, %c12] : memref<32x256xbf16, #tpu.memory_space<vmem>>, vector<32x128xbf16>
    %c0_28 = arith.constant 0 : index
    %c192 = arith.constant 192 : index
    %29 = vector.load %arg1[%c0_28, %c192] : memref<32x288xbf16, #tpu.memory_space<vmem>>, vector<32x32xbf16>
    %cst_29 = arith.constant dense<0.000000e+00> : vector<32x128xf32>
    %30 = tpu.matmul %29, %28, %cst_29 {dimension_numbers = #tpu.dot_dimension_numbers<[1], [0], [0], [1], [0, 0, 1, 1], [], []>} : vector<32x32xbf16>, vector<32x128xbf16>, vector<32x128xf32> -> vector<32x128xf32>
    %31 = arith.addf %27, %30 : vector<32x128xf32>
    %c0_30 = arith.constant 0 : index
    %c13 = arith.constant 13 : index
    %32 = vector.load %arg8[%c0_30, %c13] : memref<32x256xbf16, #tpu.memory_space<vmem>>, vector<32x128xbf16>
    %c0_31 = arith.constant 0 : index
    %c224 = arith.constant 224 : index
    %33 = vector.load %arg1[%c0_31, %c224] : memref<32x288xbf16, #tpu.memory_space<vmem>>, vector<32x32xbf16>
    %cst_32 = arith.constant dense<0.000000e+00> : vector<32x128xf32>
    %34 = tpu.matmul %33, %32, %cst_32 {dimension_numbers = #tpu.dot_dimension_numbers<[1], [0], [0], [1], [0, 0, 1, 1], [], []>} : vector<32x32xbf16>, vector<32x128xbf16>, vector<32x128xf32> -> vector<32x128xf32>
    %35 = arith.addf %31, %34 : vector<32x128xf32>
    %c0_33 = arith.constant 0 : index
    %c14 = arith.constant 14 : index
    %36 = vector.load %arg8[%c0_33, %c14] : memref<32x256xbf16, #tpu.memory_space<vmem>>, vector<32x128xbf16>
    %c0_34 = arith.constant 0 : index
    %c256 = arith.constant 256 : index
    %37 = vector.load %arg1[%c0_34, %c256] : memref<32x288xbf16, #tpu.memory_space<vmem>>, vector<32x32xbf16>
    %cst_35 = arith.constant dense<0.000000e+00> : vector<32x128xf32>
    %38 = tpu.matmul %37, %36, %cst_35 {dimension_numbers = #tpu.dot_dimension_numbers<[1], [0], [0], [1], [0, 0, 1, 1], [], []>} : vector<32x32xbf16>, vector<32x128xbf16>, vector<32x128xf32> -> vector<32x128xf32>
    %39 = arith.addf %35, %38 : vector<32x128xf32>
    %c0_36 = arith.constant 0 : index
    %c0_37 = arith.constant 0 : index
    %40 = vector.load %arg4[%c0_36, %c0_37] : memref<32x1xf32, #tpu.memory_space<vmem>>, vector<32x1xf32>
    %41 = vector.broadcast %40 : vector<32x1xf32> to vector<32x128xf32>
    %42 = arith.addf %39, %41 : vector<32x128xf32>
    %cst_38 = arith.constant 0.00999999977 : f32
    %43 = vector.broadcast %cst_38 : f32 to vector<32x128xf32>
    %44 = arith.mulf %43, %42 : vector<32x128xf32>
    %45 = arith.maximumf %42, %44 : vector<32x128xf32>
    %c0_39 = arith.constant 0 : index
    %c0_40 = arith.constant 0 : index
    %46 = vector.load %arg5[%c0_39, %c0_40] : memref<32x32xbf16, #tpu.memory_space<vmem>>, vector<32x32xbf16>
    %47 = arith.truncf %45 : vector<32x128xf32> to vector<32x128xbf16>
    %cst_41 = arith.constant dense<0.000000e+00> : vector<32x128xf32>
    %48 = tpu.matmul %46, %47, %cst_41 {dimension_numbers = #tpu.dot_dimension_numbers<[1], [0], [0], [1], [0, 0, 1, 1], [], []>} : vector<32x32xbf16>, vector<32x128xbf16>, vector<32x128xf32> -> vector<32x128xf32>
    %c0_42 = arith.constant 0 : index
    %c0_43 = arith.constant 0 : index
    %49 = vector.load %arg6[%c0_42, %c0_43] : memref<32x1xf32, #tpu.memory_space<vmem>>, vector<32x1xf32>
    %50 = vector.broadcast %49 : vector<32x1xf32> to vector<32x128xf32>
    %51 = arith.addf %48, %50 : vector<32x128xf32>
    %c0_44 = arith.constant 0 : index
    %c0_45 = arith.constant 0 : index
    %52 = vector.load %arg7[%c0_44, %c0_45] : memref<32x128xf32, #tpu.memory_space<vmem>>, vector<32x128xf32>
    tpu.vector_store %arg7[%c0_44, %c0_45], %51 {strides = array<i32>} : memref<32x128xf32, #tpu.memory_space<vmem>>, vector<32x128xf32>,
    return
  }
  func.func @transform_0(%arg0: i32) -> (i32, i32) {
    %c0_i32 = arith.constant 0 : i32
    %c0_i32_0 = arith.constant 0 : i32
    %c0_i32_1 = arith.constant 0 : i32
    return %c0_i32, %c0_i32_0 : i32, i32
  }
  func.func @transform_1(%arg0: i32) -> (i32, i32) {
    %c0_i32 = arith.constant 0 : i32
    %c0_i32_0 = arith.constant 0 : i32
    return %c0_i32, %arg0 : i32, i32
  }
  func.func @transform_2(%arg0: i32) -> (i32, i32, i32) {
    %c0_i32 = arith.constant 0 : i32
    %c0_i32_0 = arith.constant 0 : i32
    %c0_i32_1 = arith.constant 0 : i32
    return %arg0, %c0_i32, %c0_i32_0 : i32, i32, i32
  }
  func.func @transform_3(%arg0: i32) -> (i32, i32) {
    %c0_i32 = arith.constant 0 : i32
    %c0_i32_0 = arith.constant 0 : i32
    %c0_i32_1 = arith.constant 0 : i32
    return %c0_i32, %c0_i32_0 : i32, i32
  }
  func.func @transform_4(%arg0: i32) -> (i32, i32) {
    %c0_i32 = arith.constant 0 : i32
    %c0_i32_0 = arith.constant 0 : i32
    %c0_i32_1 = arith.constant 0 : i32
    return %c0_i32, %c0_i32_0 : i32, i32
  }
  func.func @transform_5(%arg0: i32) -> (i32, i32) {
    %c0_i32 = arith.constant 0 : i32
    %c0_i32_0 = arith.constant 0 : i32
    %c0_i32_1 = arith.constant 0 : i32
    return %c0_i32, %c0_i32_0 : i32, i32
  }
  func.func @transform_6(%arg0: i32) -> (i32, i32) {
    %c0_i32 = arith.constant 0 : i32
    %c0_i32_0 = arith.constant 0 : i32
    return %c0_i32, %arg0 : i32, i32
  }
}

module attributes {stable_mosaic.version = 11 : i64} {
  func.func @_conv_tap_kernel(%arg0: i32, %arg1: memref<32x288xbf16, #tpu.memory_space<vmem>>, %arg2: memref<32x128xbf16, #tpu.memory_space<vmem>>, %arg3: memref<1x32x128xbf16, #tpu.memory_space<vmem>>, %arg4: memref<32x1xf32, #tpu.memory_space<vmem>>, %arg5: memref<32x128xbf16, #tpu.memory_space<vmem>>, %arg6: memref<32x256xbf16, #tpu.memory_space<vmem>>) attributes {dimension_semantics = [#tpu.dimension_semantics<parallel>], iteration_bounds = array<i64: 1>, scalar_prefetch = 0 : i64, scratch_operands = 1 : i64, tpu.core_type = #tpu.core_type<tc>, window_params = [{pipeline_mode = #tpu.pipeline_mode<synchronous>, transform_indices = @transform_0, window_bounds = array<i64: 32, 288>}, {transform_indices = @transform_1, window_bounds = array<i64: 32, 128>}, {transform_indices = @transform_2, window_bounds = array<i64: 1, 32, 128>}, {pipeline_mode = #tpu.pipeline_mode<synchronous>, transform_indices = @transform_3, window_bounds = array<i64: 32, 1>}, {transform_indices = @transform_4, window_bounds = array<i64: 32, 128>}]} {
    %c0 = arith.constant 0 : index
    %c0_0 = arith.constant 0 : index
    %0 = vector.load %arg2[%c0, %c0_0] : memref<32x128xbf16, #tpu.memory_space<vmem>>, vector<32x128xbf16>
    %c0_1 = arith.constant 0 : index
    %c0_2 = arith.constant 0 : index
    %1 = vector.load %arg6[%c0_1, %c0_2] : memref<32x256xbf16, #tpu.memory_space<vmem>>, vector<32x128xbf16>
    tpu.vector_store %arg6[%c0_1, %c0_2], %0 {strides = array<i32>} : memref<32x256xbf16, #tpu.memory_space<vmem>>, vector<32x128xbf16>,
    %c0_3 = arith.constant 0 : index
    %c0_4 = arith.constant 0 : index
    %c0_5 = arith.constant 0 : index
    %2 = vector.load %arg3[%c0_3, %c0_4, %c0_5] : memref<1x32x128xbf16, #tpu.memory_space<vmem>>, vector<1x32x128xbf16>
    %3 = vector.shape_cast %2 : vector<1x32x128xbf16> to vector<32x128xbf16>
    %c0_6 = arith.constant 0 : index
    %c128 = arith.constant 128 : index
    %4 = vector.load %arg6[%c0_6, %c128] : memref<32x256xbf16, #tpu.memory_space<vmem>>, vector<32x128xbf16>
    tpu.vector_store %arg6[%c0_6, %c128], %3 {strides = array<i32>} : memref<32x256xbf16, #tpu.memory_space<vmem>>, vector<32x128xbf16>,
    %c0_7 = arith.constant 0 : index
    %c0_8 = arith.constant 0 : index
    %5 = vector.load %arg6[%c0_7, %c0_8] : memref<32x256xbf16, #tpu.memory_space<vmem>>, vector<32x128xbf16>
    %c0_9 = arith.constant 0 : index
    %c0_10 = arith.constant 0 : index
    %6 = vector.load %arg1[%c0_9, %c0_10] : memref<32x288xbf16, #tpu.memory_space<vmem>>, vector<32x32xbf16>
    %cst = arith.constant dense<0.000000e+00> : vector<32x128xf32>
    %7 = tpu.matmul %6, %5, %cst {dimension_numbers = #tpu.dot_dimension_numbers<[1], [0], [0], [1], [0, 0, 1, 1], [], []>} : vector<32x32xbf16>, vector<32x128xbf16>, vector<32x128xf32> -> vector<32x128xf32>
    %c0_11 = arith.constant 0 : index
    %c1 = arith.constant 1 : index
    %8 = vector.load %arg6[%c0_11, %c1] : memref<32x256xbf16, #tpu.memory_space<vmem>>, vector<32x128xbf16>
    %c0_12 = arith.constant 0 : index
    %c32 = arith.constant 32 : index
    %9 = vector.load %arg1[%c0_12, %c32] : memref<32x288xbf16, #tpu.memory_space<vmem>>, vector<32x32xbf16>
    %cst_13 = arith.constant dense<0.000000e+00> : vector<32x128xf32>
    %10 = tpu.matmul %9, %8, %cst_13 {dimension_numbers = #tpu.dot_dimension_numbers<[1], [0], [0], [1], [0, 0, 1, 1], [], []>} : vector<32x32xbf16>, vector<32x128xbf16>, vector<32x128xf32> -> vector<32x128xf32>
    %11 = arith.addf %7, %10 : vector<32x128xf32>
    %c0_14 = arith.constant 0 : index
    %c2 = arith.constant 2 : index
    %12 = vector.load %arg6[%c0_14, %c2] : memref<32x256xbf16, #tpu.memory_space<vmem>>, vector<32x128xbf16>
    %c0_15 = arith.constant 0 : index
    %c64 = arith.constant 64 : index
    %13 = vector.load %arg1[%c0_15, %c64] : memref<32x288xbf16, #tpu.memory_space<vmem>>, vector<32x32xbf16>
    %cst_16 = arith.constant dense<0.000000e+00> : vector<32x128xf32>
    %14 = tpu.matmul %13, %12, %cst_16 {dimension_numbers = #tpu.dot_dimension_numbers<[1], [0], [0], [1], [0, 0, 1, 1], [], []>} : vector<32x32xbf16>, vector<32x128xbf16>, vector<32x128xf32> -> vector<32x128xf32>
    %15 = arith.addf %11, %14 : vector<32x128xf32>
    %c0_17 = arith.constant 0 : index
    %c6 = arith.constant 6 : index
    %16 = vector.load %arg6[%c0_17, %c6] : memref<32x256xbf16, #tpu.memory_space<vmem>>, vector<32x128xbf16>
    %c0_18 = arith.constant 0 : index
    %c96 = arith.constant 96 : index
    %17 = vector.load %arg1[%c0_18, %c96] : memref<32x288xbf16, #tpu.memory_space<vmem>>, vector<32x32xbf16>
    %cst_19 = arith.constant dense<0.000000e+00> : vector<32x128xf32>
    %18 = tpu.matmul %17, %16, %cst_19 {dimension_numbers = #tpu.dot_dimension_numbers<[1], [0], [0], [1], [0, 0, 1, 1], [], []>} : vector<32x32xbf16>, vector<32x128xbf16>, vector<32x128xf32> -> vector<32x128xf32>
    %19 = arith.addf %15, %18 : vector<32x128xf32>
    %c0_20 = arith.constant 0 : index
    %c7 = arith.constant 7 : index
    %20 = vector.load %arg6[%c0_20, %c7] : memref<32x256xbf16, #tpu.memory_space<vmem>>, vector<32x128xbf16>
    %c0_21 = arith.constant 0 : index
    %c128_22 = arith.constant 128 : index
    %21 = vector.load %arg1[%c0_21, %c128_22] : memref<32x288xbf16, #tpu.memory_space<vmem>>, vector<32x32xbf16>
    %cst_23 = arith.constant dense<0.000000e+00> : vector<32x128xf32>
    %22 = tpu.matmul %21, %20, %cst_23 {dimension_numbers = #tpu.dot_dimension_numbers<[1], [0], [0], [1], [0, 0, 1, 1], [], []>} : vector<32x32xbf16>, vector<32x128xbf16>, vector<32x128xf32> -> vector<32x128xf32>
    %23 = arith.addf %19, %22 : vector<32x128xf32>
    %c0_24 = arith.constant 0 : index
    %c8 = arith.constant 8 : index
    %24 = vector.load %arg6[%c0_24, %c8] : memref<32x256xbf16, #tpu.memory_space<vmem>>, vector<32x128xbf16>
    %c0_25 = arith.constant 0 : index
    %c160 = arith.constant 160 : index
    %25 = vector.load %arg1[%c0_25, %c160] : memref<32x288xbf16, #tpu.memory_space<vmem>>, vector<32x32xbf16>
    %cst_26 = arith.constant dense<0.000000e+00> : vector<32x128xf32>
    %26 = tpu.matmul %25, %24, %cst_26 {dimension_numbers = #tpu.dot_dimension_numbers<[1], [0], [0], [1], [0, 0, 1, 1], [], []>} : vector<32x32xbf16>, vector<32x128xbf16>, vector<32x128xf32> -> vector<32x128xf32>
    %27 = arith.addf %23, %26 : vector<32x128xf32>
    %c0_27 = arith.constant 0 : index
    %c12 = arith.constant 12 : index
    %28 = vector.load %arg6[%c0_27, %c12] : memref<32x256xbf16, #tpu.memory_space<vmem>>, vector<32x128xbf16>
    %c0_28 = arith.constant 0 : index
    %c192 = arith.constant 192 : index
    %29 = vector.load %arg1[%c0_28, %c192] : memref<32x288xbf16, #tpu.memory_space<vmem>>, vector<32x32xbf16>
    %cst_29 = arith.constant dense<0.000000e+00> : vector<32x128xf32>
    %30 = tpu.matmul %29, %28, %cst_29 {dimension_numbers = #tpu.dot_dimension_numbers<[1], [0], [0], [1], [0, 0, 1, 1], [], []>} : vector<32x32xbf16>, vector<32x128xbf16>, vector<32x128xf32> -> vector<32x128xf32>
    %31 = arith.addf %27, %30 : vector<32x128xf32>
    %c0_30 = arith.constant 0 : index
    %c13 = arith.constant 13 : index
    %32 = vector.load %arg6[%c0_30, %c13] : memref<32x256xbf16, #tpu.memory_space<vmem>>, vector<32x128xbf16>
    %c0_31 = arith.constant 0 : index
    %c224 = arith.constant 224 : index
    %33 = vector.load %arg1[%c0_31, %c224] : memref<32x288xbf16, #tpu.memory_space<vmem>>, vector<32x32xbf16>
    %cst_32 = arith.constant dense<0.000000e+00> : vector<32x128xf32>
    %34 = tpu.matmul %33, %32, %cst_32 {dimension_numbers = #tpu.dot_dimension_numbers<[1], [0], [0], [1], [0, 0, 1, 1], [], []>} : vector<32x32xbf16>, vector<32x128xbf16>, vector<32x128xf32> -> vector<32x128xf32>
    %35 = arith.addf %31, %34 : vector<32x128xf32>
    %c0_33 = arith.constant 0 : index
    %c14 = arith.constant 14 : index
    %36 = vector.load %arg6[%c0_33, %c14] : memref<32x256xbf16, #tpu.memory_space<vmem>>, vector<32x128xbf16>
    %c0_34 = arith.constant 0 : index
    %c256 = arith.constant 256 : index
    %37 = vector.load %arg1[%c0_34, %c256] : memref<32x288xbf16, #tpu.memory_space<vmem>>, vector<32x32xbf16>
    %cst_35 = arith.constant dense<0.000000e+00> : vector<32x128xf32>
    %38 = tpu.matmul %37, %36, %cst_35 {dimension_numbers = #tpu.dot_dimension_numbers<[1], [0], [0], [1], [0, 0, 1, 1], [], []>} : vector<32x32xbf16>, vector<32x128xbf16>, vector<32x128xf32> -> vector<32x128xf32>
    %39 = arith.addf %35, %38 : vector<32x128xf32>
    %c0_36 = arith.constant 0 : index
    %c0_37 = arith.constant 0 : index
    %40 = vector.load %arg4[%c0_36, %c0_37] : memref<32x1xf32, #tpu.memory_space<vmem>>, vector<32x1xf32>
    %41 = vector.broadcast %40 : vector<32x1xf32> to vector<32x128xf32>
    %42 = arith.addf %39, %41 : vector<32x128xf32>
    %cst_38 = arith.constant 0.00999999977 : f32
    %43 = vector.broadcast %cst_38 : f32 to vector<32x128xf32>
    %44 = arith.mulf %43, %42 : vector<32x128xf32>
    %45 = arith.maximumf %42, %44 : vector<32x128xf32>
    %46 = arith.truncf %45 : vector<32x128xf32> to vector<32x128xbf16>
    %c0_39 = arith.constant 0 : index
    %c0_40 = arith.constant 0 : index
    %47 = vector.load %arg5[%c0_39, %c0_40] : memref<32x128xbf16, #tpu.memory_space<vmem>>, vector<32x128xbf16>
    tpu.vector_store %arg5[%c0_39, %c0_40], %46 {strides = array<i32>} : memref<32x128xbf16, #tpu.memory_space<vmem>>, vector<32x128xbf16>,
    return
  }
  func.func @transform_0(%arg0: i32) -> (i32, i32) {
    %c0_i32 = arith.constant 0 : i32
    %c0_i32_0 = arith.constant 0 : i32
    %c0_i32_1 = arith.constant 0 : i32
    return %c0_i32, %c0_i32_0 : i32, i32
  }
  func.func @transform_1(%arg0: i32) -> (i32, i32) {
    %c0_i32 = arith.constant 0 : i32
    %c0_i32_0 = arith.constant 0 : i32
    return %c0_i32, %arg0 : i32, i32
  }
  func.func @transform_2(%arg0: i32) -> (i32, i32, i32) {
    %c0_i32 = arith.constant 0 : i32
    %c0_i32_0 = arith.constant 0 : i32
    %c0_i32_1 = arith.constant 0 : i32
    return %arg0, %c0_i32, %c0_i32_0 : i32, i32, i32
  }
  func.func @transform_3(%arg0: i32) -> (i32, i32) {
    %c0_i32 = arith.constant 0 : i32
    %c0_i32_0 = arith.constant 0 : i32
    %c0_i32_1 = arith.constant 0 : i32
    return %c0_i32, %c0_i32_0 : i32, i32
  }
  func.func @transform_4(%arg0: i32) -> (i32, i32) {
    %c0_i32 = arith.constant 0 : i32
    %c0_i32_0 = arith.constant 0 : i32
    return %c0_i32, %arg0 : i32, i32
  }
}

module attributes {stable_mosaic.version = 11 : i64} {
  func.func @_conv_tap_kernel(%arg0: i32, %arg1: memref<32x16xbf16, #tpu.memory_space<vmem>>, %arg2: memref<16x128xbf16, #tpu.memory_space<vmem>>, %arg3: memref<32x1xf32, #tpu.memory_space<vmem>>, %arg4: memref<32x128xbf16, #tpu.memory_space<vmem>>, %arg5: memref<32x128xbf16, #tpu.memory_space<vmem>>) attributes {dimension_semantics = [#tpu.dimension_semantics<parallel>], iteration_bounds = array<i64: 1>, scalar_prefetch = 0 : i64, scratch_operands = 0 : i64, tpu.core_type = #tpu.core_type<tc>, window_params = [{pipeline_mode = #tpu.pipeline_mode<synchronous>, transform_indices = @transform_0, window_bounds = array<i64: 32, 16>}, {transform_indices = @transform_1, window_bounds = array<i64: 16, 128>}, {pipeline_mode = #tpu.pipeline_mode<synchronous>, transform_indices = @transform_2, window_bounds = array<i64: 32, 1>}, {transform_indices = @transform_3, window_bounds = array<i64: 32, 128>}, {transform_indices = @transform_4, window_bounds = array<i64: 32, 128>}]} {
    %c0 = arith.constant 0 : index
    %c0_0 = arith.constant 0 : index
    %0 = vector.load %arg2[%c0, %c0_0] : memref<16x128xbf16, #tpu.memory_space<vmem>>, vector<16x128xbf16>
    %c0_1 = arith.constant 0 : index
    %c0_2 = arith.constant 0 : index
    %1 = vector.load %arg1[%c0_1, %c0_2] : memref<32x16xbf16, #tpu.memory_space<vmem>>, vector<32x16xbf16>
    %cst = arith.constant dense<0.000000e+00> : vector<32x128xf32>
    %2 = tpu.matmul %1, %0, %cst {dimension_numbers = #tpu.dot_dimension_numbers<[1], [0], [0], [1], [0, 0, 1, 1], [], []>} : vector<32x16xbf16>, vector<16x128xbf16>, vector<32x128xf32> -> vector<32x128xf32>
    %c0_3 = arith.constant 0 : index
    %c0_4 = arith.constant 0 : index
    %3 = vector.load %arg3[%c0_3, %c0_4] : memref<32x1xf32, #tpu.memory_space<vmem>>, vector<32x1xf32>
    %4 = vector.broadcast %3 : vector<32x1xf32> to vector<32x128xf32>
    %5 = arith.addf %2, %4 : vector<32x128xf32>
    %c0_5 = arith.constant 0 : index
    %c0_6 = arith.constant 0 : index
    %6 = vector.load %arg4[%c0_5, %c0_6] : memref<32x128xbf16, #tpu.memory_space<vmem>>, vector<32x128xbf16>
    %7 = arith.extf %6 : vector<32x128xbf16> to vector<32x128xf32>
    %8 = arith.addf %5, %7 : vector<32x128xf32>
    %9 = arith.truncf %8 : vector<32x128xf32> to vector<32x128xbf16>
    %c0_7 = arith.constant 0 : index
    %c0_8 = arith.constant 0 : index
    %10 = vector.load %arg5[%c0_7, %c0_8] : memref<32x128xbf16, #tpu.memory_space<vmem>>, vector<32x128xbf16>
    tpu.vector_store %arg5[%c0_7, %c0_8], %9 {strides = array<i32>} : memref<32x128xbf16, #tpu.memory_space<vmem>>, vector<32x128xbf16>,
    return
  }
  func.func @transform_0(%arg0: i32) -> (i32, i32) {
    %c0_i32 = arith.constant 0 : i32
    %c0_i32_0 = arith.constant 0 : i32
    %c0_i32_1 = arith.constant 0 : i32
    return %c0_i32, %c0_i32_0 : i32, i32
  }
  func.func @transform_1(%arg0: i32) -> (i32, i32) {
    %c0_i32 = arith.constant 0 : i32
    %c0_i32_0 = arith.constant 0 : i32
    return %c0_i32, %arg0 : i32, i32
  }
  func.func @transform_2(%arg0: i32) -> (i32, i32) {
    %c0_i32 = arith.constant 0 : i32
    %c0_i32_0 = arith.constant 0 : i32
    %c0_i32_1 = arith.constant 0 : i32
    return %c0_i32, %c0_i32_0 : i32, i32
  }
  func.func @transform_3(%arg0: i32) -> (i32, i32) {
    %c0_i32 = arith.constant 0 : i32
    %c0_i32_0 = arith.constant 0 : i32
    return %c0_i32, %arg0 : i32, i32
  }
  func.func @transform_4(%arg0: i32) -> (i32, i32) {
    %c0_i32 = arith.constant 0 : i32
    %c0_i32_0 = arith.constant 0 : i32
    return %c0_i32, %arg0 : i32, i32
  }
}

module attributes {stable_mosaic.version = 11 : i64} {
  func.func @_conv_tap_kernel(%arg0: i32, %arg1: memref<32x8xbf16, #tpu.memory_space<vmem>>, %arg2: memref<8x128xbf16, #tpu.memory_space<vmem>>, %arg3: memref<32x1xf32, #tpu.memory_space<vmem>>, %arg4: memref<32x128xbf16, #tpu.memory_space<vmem>>, %arg5: memref<32x128xbf16, #tpu.memory_space<vmem>>) attributes {dimension_semantics = [#tpu.dimension_semantics<parallel>], iteration_bounds = array<i64: 4>, scalar_prefetch = 0 : i64, scratch_operands = 0 : i64, tpu.core_type = #tpu.core_type<tc>, window_params = [{pipeline_mode = #tpu.pipeline_mode<synchronous>, transform_indices = @transform_0, window_bounds = array<i64: 32, 8>}, {transform_indices = @transform_1, window_bounds = array<i64: 8, 128>}, {pipeline_mode = #tpu.pipeline_mode<synchronous>, transform_indices = @transform_2, window_bounds = array<i64: 32, 1>}, {transform_indices = @transform_3, window_bounds = array<i64: 32, 128>}, {transform_indices = @transform_4, window_bounds = array<i64: 32, 128>}]} {
    %c0 = arith.constant 0 : index
    %c0_0 = arith.constant 0 : index
    %0 = vector.load %arg2[%c0, %c0_0] : memref<8x128xbf16, #tpu.memory_space<vmem>>, vector<8x128xbf16>
    %c0_1 = arith.constant 0 : index
    %c0_2 = arith.constant 0 : index
    %1 = vector.load %arg1[%c0_1, %c0_2] : memref<32x8xbf16, #tpu.memory_space<vmem>>, vector<32x8xbf16>
    %cst = arith.constant dense<0.000000e+00> : vector<32x128xf32>
    %2 = tpu.matmul %1, %0, %cst {dimension_numbers = #tpu.dot_dimension_numbers<[1], [0], [0], [1], [0, 0, 1, 1], [], []>} : vector<32x8xbf16>, vector<8x128xbf16>, vector<32x128xf32> -> vector<32x128xf32>
    %c0_3 = arith.constant 0 : index
    %c0_4 = arith.constant 0 : index
    %3 = vector.load %arg3[%c0_3, %c0_4] : memref<32x1xf32, #tpu.memory_space<vmem>>, vector<32x1xf32>
    %4 = vector.broadcast %3 : vector<32x1xf32> to vector<32x128xf32>
    %5 = arith.addf %2, %4 : vector<32x128xf32>
    %c0_5 = arith.constant 0 : index
    %c0_6 = arith.constant 0 : index
    %6 = vector.load %arg4[%c0_5, %c0_6] : memref<32x128xbf16, #tpu.memory_space<vmem>>, vector<32x128xbf16>
    %7 = arith.extf %6 : vector<32x128xbf16> to vector<32x128xf32>
    %8 = arith.addf %5, %7 : vector<32x128xf32>
    %9 = arith.truncf %8 : vector<32x128xf32> to vector<32x128xbf16>
    %c0_7 = arith.constant 0 : index
    %c0_8 = arith.constant 0 : index
    %10 = vector.load %arg5[%c0_7, %c0_8] : memref<32x128xbf16, #tpu.memory_space<vmem>>, vector<32x128xbf16>
    tpu.vector_store %arg5[%c0_7, %c0_8], %9 {strides = array<i32>} : memref<32x128xbf16, #tpu.memory_space<vmem>>, vector<32x128xbf16>,
    return
  }
  func.func @transform_0(%arg0: i32) -> (i32, i32) {
    %c0_i32 = arith.constant 0 : i32
    %c0_i32_0 = arith.constant 0 : i32
    %c0_i32_1 = arith.constant 0 : i32
    return %c0_i32, %c0_i32_0 : i32, i32
  }
  func.func @transform_1(%arg0: i32) -> (i32, i32) {
    %c0_i32 = arith.constant 0 : i32
    %c0_i32_0 = arith.constant 0 : i32
    return %c0_i32, %arg0 : i32, i32
  }
  func.func @transform_2(%arg0: i32) -> (i32, i32) {
    %c0_i32 = arith.constant 0 : i32
    %c0_i32_0 = arith.constant 0 : i32
    %c0_i32_1 = arith.constant 0 : i32
    return %c0_i32, %c0_i32_0 : i32, i32
  }
  func.func @transform_3(%arg0: i32) -> (i32, i32) {
    %c0_i32 = arith.constant 0 : i32
    %c0_i32_0 = arith.constant 0 : i32
    return %c0_i32, %arg0 : i32, i32
  }
  func.func @transform_4(%arg0: i32) -> (i32, i32) {
    %c0_i32 = arith.constant 0 : i32
    %c0_i32_0 = arith.constant 0 : i32
    return %c0_i32, %arg0 : i32, i32
  }
}

module attributes {stable_mosaic.version = 11 : i64} {
  func.func @_conv_tap_kernel(%arg0: i32, %arg1: memref<8x288xbf16, #tpu.memory_space<vmem>>, %arg2: memref<32x256xbf16, #tpu.memory_space<vmem>>, %arg3: memref<1x32x128xbf16, #tpu.memory_space<vmem>>, %arg4: memref<8x1xf32, #tpu.memory_space<vmem>>, %arg5: memref<8x256xf32, #tpu.memory_space<vmem>>, %arg6: memref<32x384xbf16, #tpu.memory_space<vmem>>) attributes {dimension_semantics = [#tpu.dimension_semantics<parallel>], iteration_bounds = array<i64: 3>, scalar_prefetch = 0 : i64, scratch_operands = 1 : i64, tpu.core_type = #tpu.core_type<tc>, window_params = [{pipeline_mode = #tpu.pipeline_mode<synchronous>, transform_indices = @transform_0, window_bounds = array<i64: 8, 288>}, {transform_indices = @transform_1, window_bounds = array<i64: 32, 256>}, {transform_indices = @transform_2, window_bounds = array<i64: 1, 32, 128>}, {pipeline_mode = #tpu.pipeline_mode<synchronous>, transform_indices = @transform_3, window_bounds = array<i64: 8, 1>}, {transform_indices = @transform_4, window_bounds = array<i64: 8, 256>}]} {
    %c0 = arith.constant 0 : index
    %c0_0 = arith.constant 0 : index
    %0 = vector.load %arg2[%c0, %c0_0] : memref<32x256xbf16, #tpu.memory_space<vmem>>, vector<32x256xbf16>
    %c0_1 = arith.constant 0 : index
    %c0_2 = arith.constant 0 : index
    %1 = vector.load %arg6[%c0_1, %c0_2] : memref<32x384xbf16, #tpu.memory_space<vmem>>, vector<32x256xbf16>
    tpu.vector_store %arg6[%c0_1, %c0_2], %0 {strides = array<i32>} : memref<32x384xbf16, #tpu.memory_space<vmem>>, vector<32x256xbf16>,
    %c0_3 = arith.constant 0 : index
    %c0_4 = arith.constant 0 : index
    %c0_5 = arith.constant 0 : index
    %2 = vector.load %arg3[%c0_3, %c0_4, %c0_5] : memref<1x32x128xbf16, #tpu.memory_space<vmem>>, vector<1x32x128xbf16>
    %3 = vector.shape_cast %2 : vector<1x32x128xbf16> to vector<32x128xbf16>
    %c0_6 = arith.constant 0 : index
    %c256 = arith.constant 256 : index
    %4 = vector.load %arg6[%c0_6, %c256] : memref<32x384xbf16, #tpu.memory_space<vmem>>, vector<32x128xbf16>
    tpu.vector_store %arg6[%c0_6, %c256], %3 {strides = array<i32>} : memref<32x384xbf16, #tpu.memory_space<vmem>>, vector<32x128xbf16>,
    %c0_7 = arith.constant 0 : index
    %c0_8 = arith.constant 0 : index
    %5 = vector.load %arg6[%c0_7, %c0_8] : memref<32x384xbf16, #tpu.memory_space<vmem>>, vector<32x256xbf16>
    %c0_9 = arith.constant 0 : index
    %c0_10 = arith.constant 0 : index
    %6 = vector.load %arg1[%c0_9, %c0_10] : memref<8x288xbf16, #tpu.memory_space<vmem>>, vector<8x32xbf16>
    %cst = arith.constant dense<0.000000e+00> : vector<8x256xf32>
    %7 = tpu.matmul %6, %5, %cst {dimension_numbers = #tpu.dot_dimension_numbers<[1], [0], [0], [1], [0, 0, 1, 1], [], []>} : vector<8x32xbf16>, vector<32x256xbf16>, vector<8x256xf32> -> vector<8x256xf32>
    %c0_11 = arith.constant 0 : index
    %c1 = arith.constant 1 : index
    %8 = vector.load %arg6[%c0_11, %c1] : memref<32x384xbf16, #tpu.memory_space<vmem>>, vector<32x256xbf16>
    %c0_12 = arith.constant 0 : index
    %c32 = arith.constant 32 : index
    %9 = vector.load %arg1[%c0_12, %c32] : memref<8x288xbf16, #tpu.memory_space<vmem>>, vector<8x32xbf16>
    %cst_13 = arith.constant dense<0.000000e+00> : vector<8x256xf32>
    %10 = tpu.matmul %9, %8, %cst_13 {dimension_numbers = #tpu.dot_dimension_numbers<[1], [0], [0], [1], [0, 0, 1, 1], [], []>} : vector<8x32xbf16>, vector<32x256xbf16>, vector<8x256xf32> -> vector<8x256xf32>
    %11 = arith.addf %7, %10 : vector<8x256xf32>
    %c0_14 = arith.constant 0 : index
    %c2 = arith.constant 2 : index
    %12 = vector.load %arg6[%c0_14, %c2] : memref<32x384xbf16, #tpu.memory_space<vmem>>, vector<32x256xbf16>
    %c0_15 = arith.constant 0 : index
    %c64 = arith.constant 64 : index
    %13 = vector.load %arg1[%c0_15, %c64] : memref<8x288xbf16, #tpu.memory_space<vmem>>, vector<8x32xbf16>
    %cst_16 = arith.constant dense<0.000000e+00> : vector<8x256xf32>
    %14 = tpu.matmul %13, %12, %cst_16 {dimension_numbers = #tpu.dot_dimension_numbers<[1], [0], [0], [1], [0, 0, 1, 1], [], []>} : vector<8x32xbf16>, vector<32x256xbf16>, vector<8x256xf32> -> vector<8x256xf32>
    %15 = arith.addf %11, %14 : vector<8x256xf32>
    %c0_17 = arith.constant 0 : index
    %c18 = arith.constant 18 : index
    %16 = vector.load %arg6[%c0_17, %c18] : memref<32x384xbf16, #tpu.memory_space<vmem>>, vector<32x256xbf16>
    %c0_18 = arith.constant 0 : index
    %c96 = arith.constant 96 : index
    %17 = vector.load %arg1[%c0_18, %c96] : memref<8x288xbf16, #tpu.memory_space<vmem>>, vector<8x32xbf16>
    %cst_19 = arith.constant dense<0.000000e+00> : vector<8x256xf32>
    %18 = tpu.matmul %17, %16, %cst_19 {dimension_numbers = #tpu.dot_dimension_numbers<[1], [0], [0], [1], [0, 0, 1, 1], [], []>} : vector<8x32xbf16>, vector<32x256xbf16>, vector<8x256xf32> -> vector<8x256xf32>
    %19 = arith.addf %15, %18 : vector<8x256xf32>
    %c0_20 = arith.constant 0 : index
    %c19 = arith.constant 19 : index
    %20 = vector.load %arg6[%c0_20, %c19] : memref<32x384xbf16, #tpu.memory_space<vmem>>, vector<32x256xbf16>
    %c0_21 = arith.constant 0 : index
    %c128 = arith.constant 128 : index
    %21 = vector.load %arg1[%c0_21, %c128] : memref<8x288xbf16, #tpu.memory_space<vmem>>, vector<8x32xbf16>
    %cst_22 = arith.constant dense<0.000000e+00> : vector<8x256xf32>
    %22 = tpu.matmul %21, %20, %cst_22 {dimension_numbers = #tpu.dot_dimension_numbers<[1], [0], [0], [1], [0, 0, 1, 1], [], []>} : vector<8x32xbf16>, vector<32x256xbf16>, vector<8x256xf32> -> vector<8x256xf32>
    %23 = arith.addf %19, %22 : vector<8x256xf32>
    %c0_23 = arith.constant 0 : index
    %c20 = arith.constant 20 : index
    %24 = vector.load %arg6[%c0_23, %c20] : memref<32x384xbf16, #tpu.memory_space<vmem>>, vector<32x256xbf16>
    %c0_24 = arith.constant 0 : index
    %c160 = arith.constant 160 : index
    %25 = vector.load %arg1[%c0_24, %c160] : memref<8x288xbf16, #tpu.memory_space<vmem>>, vector<8x32xbf16>
    %cst_25 = arith.constant dense<0.000000e+00> : vector<8x256xf32>
    %26 = tpu.matmul %25, %24, %cst_25 {dimension_numbers = #tpu.dot_dimension_numbers<[1], [0], [0], [1], [0, 0, 1, 1], [], []>} : vector<8x32xbf16>, vector<32x256xbf16>, vector<8x256xf32> -> vector<8x256xf32>
    %27 = arith.addf %23, %26 : vector<8x256xf32>
    %c0_26 = arith.constant 0 : index
    %c36 = arith.constant 36 : index
    %28 = vector.load %arg6[%c0_26, %c36] : memref<32x384xbf16, #tpu.memory_space<vmem>>, vector<32x256xbf16>
    %c0_27 = arith.constant 0 : index
    %c192 = arith.constant 192 : index
    %29 = vector.load %arg1[%c0_27, %c192] : memref<8x288xbf16, #tpu.memory_space<vmem>>, vector<8x32xbf16>
    %cst_28 = arith.constant dense<0.000000e+00> : vector<8x256xf32>
    %30 = tpu.matmul %29, %28, %cst_28 {dimension_numbers = #tpu.dot_dimension_numbers<[1], [0], [0], [1], [0, 0, 1, 1], [], []>} : vector<8x32xbf16>, vector<32x256xbf16>, vector<8x256xf32> -> vector<8x256xf32>
    %31 = arith.addf %27, %30 : vector<8x256xf32>
    %c0_29 = arith.constant 0 : index
    %c37 = arith.constant 37 : index
    %32 = vector.load %arg6[%c0_29, %c37] : memref<32x384xbf16, #tpu.memory_space<vmem>>, vector<32x256xbf16>
    %c0_30 = arith.constant 0 : index
    %c224 = arith.constant 224 : index
    %33 = vector.load %arg1[%c0_30, %c224] : memref<8x288xbf16, #tpu.memory_space<vmem>>, vector<8x32xbf16>
    %cst_31 = arith.constant dense<0.000000e+00> : vector<8x256xf32>
    %34 = tpu.matmul %33, %32, %cst_31 {dimension_numbers = #tpu.dot_dimension_numbers<[1], [0], [0], [1], [0, 0, 1, 1], [], []>} : vector<8x32xbf16>, vector<32x256xbf16>, vector<8x256xf32> -> vector<8x256xf32>
    %35 = arith.addf %31, %34 : vector<8x256xf32>
    %c0_32 = arith.constant 0 : index
    %c38 = arith.constant 38 : index
    %36 = vector.load %arg6[%c0_32, %c38] : memref<32x384xbf16, #tpu.memory_space<vmem>>, vector<32x256xbf16>
    %c0_33 = arith.constant 0 : index
    %c256_34 = arith.constant 256 : index
    %37 = vector.load %arg1[%c0_33, %c256_34] : memref<8x288xbf16, #tpu.memory_space<vmem>>, vector<8x32xbf16>
    %cst_35 = arith.constant dense<0.000000e+00> : vector<8x256xf32>
    %38 = tpu.matmul %37, %36, %cst_35 {dimension_numbers = #tpu.dot_dimension_numbers<[1], [0], [0], [1], [0, 0, 1, 1], [], []>} : vector<8x32xbf16>, vector<32x256xbf16>, vector<8x256xf32> -> vector<8x256xf32>
    %39 = arith.addf %35, %38 : vector<8x256xf32>
    %c0_36 = arith.constant 0 : index
    %c0_37 = arith.constant 0 : index
    %40 = vector.load %arg4[%c0_36, %c0_37] : memref<8x1xf32, #tpu.memory_space<vmem>>, vector<8x1xf32>
    %41 = vector.broadcast %40 : vector<8x1xf32> to vector<8x256xf32>
    %42 = arith.addf %39, %41 : vector<8x256xf32>
    %c0_38 = arith.constant 0 : index
    %c0_39 = arith.constant 0 : index
    %43 = vector.load %arg5[%c0_38, %c0_39] : memref<8x256xf32, #tpu.memory_space<vmem>>, vector<8x256xf32>
    tpu.vector_store %arg5[%c0_38, %c0_39], %42 {strides = array<i32>} : memref<8x256xf32, #tpu.memory_space<vmem>>, vector<8x256xf32>,
    return
  }
  func.func @transform_0(%arg0: i32) -> (i32, i32) {
    %c0_i32 = arith.constant 0 : i32
    %c0_i32_0 = arith.constant 0 : i32
    %c0_i32_1 = arith.constant 0 : i32
    return %c0_i32, %c0_i32_0 : i32, i32
  }
  func.func @transform_1(%arg0: i32) -> (i32, i32) {
    %c0_i32 = arith.constant 0 : i32
    %c0_i32_0 = arith.constant 0 : i32
    return %c0_i32, %arg0 : i32, i32
  }
  func.func @transform_2(%arg0: i32) -> (i32, i32, i32) {
    %c0_i32 = arith.constant 0 : i32
    %c0_i32_0 = arith.constant 0 : i32
    %c0_i32_1 = arith.constant 0 : i32
    return %arg0, %c0_i32, %c0_i32_0 : i32, i32, i32
  }
  func.func @transform_3(%arg0: i32) -> (i32, i32) {
    %c0_i32 = arith.constant 0 : i32
    %c0_i32_0 = arith.constant 0 : i32
    %c0_i32_1 = arith.constant 0 : i32
    return %c0_i32, %c0_i32_0 : i32, i32
  }
  func.func @transform_4(%arg0: i32) -> (i32, i32) {
    %c0_i32 = arith.constant 0 : i32
    %c0_i32_0 = arith.constant 0 : i32
    return %c0_i32, %arg0 : i32, i32
  }
}

module attributes {stable_mosaic.version = 11 : i64} {
  func.func @_conv_tap_kernel(%arg0: i32, %arg1: memref<16x288xbf16, #tpu.memory_space<vmem>>, %arg2: memref<32x128xbf16, #tpu.memory_space<vmem>>, %arg3: memref<1x32x128xbf16, #tpu.memory_space<vmem>>, %arg4: memref<16x1xf32, #tpu.memory_space<vmem>>, %arg5: memref<16x128xf32, #tpu.memory_space<vmem>>, %arg6: memref<32x256xbf16, #tpu.memory_space<vmem>>) attributes {dimension_semantics = [#tpu.dimension_semantics<parallel>], iteration_bounds = array<i64: 2>, scalar_prefetch = 0 : i64, scratch_operands = 1 : i64, tpu.core_type = #tpu.core_type<tc>, window_params = [{pipeline_mode = #tpu.pipeline_mode<synchronous>, transform_indices = @transform_0, window_bounds = array<i64: 16, 288>}, {transform_indices = @transform_1, window_bounds = array<i64: 32, 128>}, {transform_indices = @transform_2, window_bounds = array<i64: 1, 32, 128>}, {pipeline_mode = #tpu.pipeline_mode<synchronous>, transform_indices = @transform_3, window_bounds = array<i64: 16, 1>}, {transform_indices = @transform_4, window_bounds = array<i64: 16, 128>}]} {
    %c0 = arith.constant 0 : index
    %c0_0 = arith.constant 0 : index
    %0 = vector.load %arg2[%c0, %c0_0] : memref<32x128xbf16, #tpu.memory_space<vmem>>, vector<32x128xbf16>
    %c0_1 = arith.constant 0 : index
    %c0_2 = arith.constant 0 : index
    %1 = vector.load %arg6[%c0_1, %c0_2] : memref<32x256xbf16, #tpu.memory_space<vmem>>, vector<32x128xbf16>
    tpu.vector_store %arg6[%c0_1, %c0_2], %0 {strides = array<i32>} : memref<32x256xbf16, #tpu.memory_space<vmem>>, vector<32x128xbf16>,
    %c0_3 = arith.constant 0 : index
    %c0_4 = arith.constant 0 : index
    %c0_5 = arith.constant 0 : index
    %2 = vector.load %arg3[%c0_3, %c0_4, %c0_5] : memref<1x32x128xbf16, #tpu.memory_space<vmem>>, vector<1x32x128xbf16>
    %3 = vector.shape_cast %2 : vector<1x32x128xbf16> to vector<32x128xbf16>
    %c0_6 = arith.constant 0 : index
    %c128 = arith.constant 128 : index
    %4 = vector.load %arg6[%c0_6, %c128] : memref<32x256xbf16, #tpu.memory_space<vmem>>, vector<32x128xbf16>
    tpu.vector_store %arg6[%c0_6, %c128], %3 {strides = array<i32>} : memref<32x256xbf16, #tpu.memory_space<vmem>>, vector<32x128xbf16>,
    %c0_7 = arith.constant 0 : index
    %c0_8 = arith.constant 0 : index
    %5 = vector.load %arg6[%c0_7, %c0_8] : memref<32x256xbf16, #tpu.memory_space<vmem>>, vector<32x128xbf16>
    %c0_9 = arith.constant 0 : index
    %c0_10 = arith.constant 0 : index
    %6 = vector.load %arg1[%c0_9, %c0_10] : memref<16x288xbf16, #tpu.memory_space<vmem>>, vector<16x32xbf16>
    %cst = arith.constant dense<0.000000e+00> : vector<16x128xf32>
    %7 = tpu.matmul %6, %5, %cst {dimension_numbers = #tpu.dot_dimension_numbers<[1], [0], [0], [1], [0, 0, 1, 1], [], []>} : vector<16x32xbf16>, vector<32x128xbf16>, vector<16x128xf32> -> vector<16x128xf32>
    %c0_11 = arith.constant 0 : index
    %c1 = arith.constant 1 : index
    %8 = vector.load %arg6[%c0_11, %c1] : memref<32x256xbf16, #tpu.memory_space<vmem>>, vector<32x128xbf16>
    %c0_12 = arith.constant 0 : index
    %c32 = arith.constant 32 : index
    %9 = vector.load %arg1[%c0_12, %c32] : memref<16x288xbf16, #tpu.memory_space<vmem>>, vector<16x32xbf16>
    %cst_13 = arith.constant dense<0.000000e+00> : vector<16x128xf32>
    %10 = tpu.matmul %9, %8, %cst_13 {dimension_numbers = #tpu.dot_dimension_numbers<[1], [0], [0], [1], [0, 0, 1, 1], [], []>} : vector<16x32xbf16>, vector<32x128xbf16>, vector<16x128xf32> -> vector<16x128xf32>
    %11 = arith.addf %7, %10 : vector<16x128xf32>
    %c0_14 = arith.constant 0 : index
    %c2 = arith.constant 2 : index
    %12 = vector.load %arg6[%c0_14, %c2] : memref<32x256xbf16, #tpu.memory_space<vmem>>, vector<32x128xbf16>
    %c0_15 = arith.constant 0 : index
    %c64 = arith.constant 64 : index
    %13 = vector.load %arg1[%c0_15, %c64] : memref<16x288xbf16, #tpu.memory_space<vmem>>, vector<16x32xbf16>
    %cst_16 = arith.constant dense<0.000000e+00> : vector<16x128xf32>
    %14 = tpu.matmul %13, %12, %cst_16 {dimension_numbers = #tpu.dot_dimension_numbers<[1], [0], [0], [1], [0, 0, 1, 1], [], []>} : vector<16x32xbf16>, vector<32x128xbf16>, vector<16x128xf32> -> vector<16x128xf32>
    %15 = arith.addf %11, %14 : vector<16x128xf32>
    %c0_17 = arith.constant 0 : index
    %c10 = arith.constant 10 : index
    %16 = vector.load %arg6[%c0_17, %c10] : memref<32x256xbf16, #tpu.memory_space<vmem>>, vector<32x128xbf16>
    %c0_18 = arith.constant 0 : index
    %c96 = arith.constant 96 : index
    %17 = vector.load %arg1[%c0_18, %c96] : memref<16x288xbf16, #tpu.memory_space<vmem>>, vector<16x32xbf16>
    %cst_19 = arith.constant dense<0.000000e+00> : vector<16x128xf32>
    %18 = tpu.matmul %17, %16, %cst_19 {dimension_numbers = #tpu.dot_dimension_numbers<[1], [0], [0], [1], [0, 0, 1, 1], [], []>} : vector<16x32xbf16>, vector<32x128xbf16>, vector<16x128xf32> -> vector<16x128xf32>
    %19 = arith.addf %15, %18 : vector<16x128xf32>
    %c0_20 = arith.constant 0 : index
    %c11 = arith.constant 11 : index
    %20 = vector.load %arg6[%c0_20, %c11] : memref<32x256xbf16, #tpu.memory_space<vmem>>, vector<32x128xbf16>
    %c0_21 = arith.constant 0 : index
    %c128_22 = arith.constant 128 : index
    %21 = vector.load %arg1[%c0_21, %c128_22] : memref<16x288xbf16, #tpu.memory_space<vmem>>, vector<16x32xbf16>
    %cst_23 = arith.constant dense<0.000000e+00> : vector<16x128xf32>
    %22 = tpu.matmul %21, %20, %cst_23 {dimension_numbers = #tpu.dot_dimension_numbers<[1], [0], [0], [1], [0, 0, 1, 1], [], []>} : vector<16x32xbf16>, vector<32x128xbf16>, vector<16x128xf32> -> vector<16x128xf32>
    %23 = arith.addf %19, %22 : vector<16x128xf32>
    %c0_24 = arith.constant 0 : index
    %c12 = arith.constant 12 : index
    %24 = vector.load %arg6[%c0_24, %c12] : memref<32x256xbf16, #tpu.memory_space<vmem>>, vector<32x128xbf16>
    %c0_25 = arith.constant 0 : index
    %c160 = arith.constant 160 : index
    %25 = vector.load %arg1[%c0_25, %c160] : memref<16x288xbf16, #tpu.memory_space<vmem>>, vector<16x32xbf16>
    %cst_26 = arith.constant dense<0.000000e+00> : vector<16x128xf32>
    %26 = tpu.matmul %25, %24, %cst_26 {dimension_numbers = #tpu.dot_dimension_numbers<[1], [0], [0], [1], [0, 0, 1, 1], [], []>} : vector<16x32xbf16>, vector<32x128xbf16>, vector<16x128xf32> -> vector<16x128xf32>
    %27 = arith.addf %23, %26 : vector<16x128xf32>
    %c0_27 = arith.constant 0 : index
    %c20 = arith.constant 20 : index
    %28 = vector.load %arg6[%c0_27, %c20] : memref<32x256xbf16, #tpu.memory_space<vmem>>, vector<32x128xbf16>
    %c0_28 = arith.constant 0 : index
    %c192 = arith.constant 192 : index
    %29 = vector.load %arg1[%c0_28, %c192] : memref<16x288xbf16, #tpu.memory_space<vmem>>, vector<16x32xbf16>
    %cst_29 = arith.constant dense<0.000000e+00> : vector<16x128xf32>
    %30 = tpu.matmul %29, %28, %cst_29 {dimension_numbers = #tpu.dot_dimension_numbers<[1], [0], [0], [1], [0, 0, 1, 1], [], []>} : vector<16x32xbf16>, vector<32x128xbf16>, vector<16x128xf32> -> vector<16x128xf32>
    %31 = arith.addf %27, %30 : vector<16x128xf32>
    %c0_30 = arith.constant 0 : index
    %c21 = arith.constant 21 : index
    %32 = vector.load %arg6[%c0_30, %c21] : memref<32x256xbf16, #tpu.memory_space<vmem>>, vector<32x128xbf16>
    %c0_31 = arith.constant 0 : index
    %c224 = arith.constant 224 : index
    %33 = vector.load %arg1[%c0_31, %c224] : memref<16x288xbf16, #tpu.memory_space<vmem>>, vector<16x32xbf16>
    %cst_32 = arith.constant dense<0.000000e+00> : vector<16x128xf32>
    %34 = tpu.matmul %33, %32, %cst_32 {dimension_numbers = #tpu.dot_dimension_numbers<[1], [0], [0], [1], [0, 0, 1, 1], [], []>} : vector<16x32xbf16>, vector<32x128xbf16>, vector<16x128xf32> -> vector<16x128xf32>
    %35 = arith.addf %31, %34 : vector<16x128xf32>
    %c0_33 = arith.constant 0 : index
    %c22 = arith.constant 22 : index
    %36 = vector.load %arg6[%c0_33, %c22] : memref<32x256xbf16, #tpu.memory_space<vmem>>, vector<32x128xbf16>
    %c0_34 = arith.constant 0 : index
    %c256 = arith.constant 256 : index
    %37 = vector.load %arg1[%c0_34, %c256] : memref<16x288xbf16, #tpu.memory_space<vmem>>, vector<16x32xbf16>
    %cst_35 = arith.constant dense<0.000000e+00> : vector<16x128xf32>
    %38 = tpu.matmul %37, %36, %cst_35 {dimension_numbers = #tpu.dot_dimension_numbers<[1], [0], [0], [1], [0, 0, 1, 1], [], []>} : vector<16x32xbf16>, vector<32x128xbf16>, vector<16x128xf32> -> vector<16x128xf32>
    %39 = arith.addf %35, %38 : vector<16x128xf32>
    %c0_36 = arith.constant 0 : index
    %c0_37 = arith.constant 0 : index
    %40 = vector.load %arg4[%c0_36, %c0_37] : memref<16x1xf32, #tpu.memory_space<vmem>>, vector<16x1xf32>
    %41 = vector.broadcast %40 : vector<16x1xf32> to vector<16x128xf32>
    %42 = arith.addf %39, %41 : vector<16x128xf32>
    %c0_38 = arith.constant 0 : index
    %c0_39 = arith.constant 0 : index
    %43 = vector.load %arg5[%c0_38, %c0_39] : memref<16x128xf32, #tpu.memory_space<vmem>>, vector<16x128xf32>
    tpu.vector_store %arg5[%c0_38, %c0_39], %42 {strides = array<i32>} : memref<16x128xf32, #tpu.memory_space<vmem>>, vector<16x128xf32>,
    return
  }
  func.func @transform_0(%arg0: i32) -> (i32, i32) {
    %c0_i32 = arith.constant 0 : i32
    %c0_i32_0 = arith.constant 0 : i32
    %c0_i32_1 = arith.constant 0 : i32
    return %c0_i32, %c0_i32_0 : i32, i32
  }
  func.func @transform_1(%arg0: i32) -> (i32, i32) {
    %c0_i32 = arith.constant 0 : i32
    %c0_i32_0 = arith.constant 0 : i32
    return %c0_i32, %arg0 : i32, i32
  }
  func.func @transform_2(%arg0: i32) -> (i32, i32, i32) {
    %c0_i32 = arith.constant 0 : i32
    %c0_i32_0 = arith.constant 0 : i32
    %c0_i32_1 = arith.constant 0 : i32
    return %arg0, %c0_i32, %c0_i32_0 : i32, i32, i32
  }
  func.func @transform_3(%arg0: i32) -> (i32, i32) {
    %c0_i32 = arith.constant 0 : i32
    %c0_i32_0 = arith.constant 0 : i32
    %c0_i32_1 = arith.constant 0 : i32
    return %c0_i32, %c0_i32_0 : i32, i32
  }
  func.func @transform_4(%arg0: i32) -> (i32, i32) {
    %c0_i32 = arith.constant 0 : i32
    %c0_i32_0 = arith.constant 0 : i32
    return %c0_i32, %arg0 : i32, i32
  }
}

</mosaic_0001>

<bundles_post_ra>
// kernel: feature_net.12
= control target key start
LH: loop header
LB: loop body
LE: loop exit
PB: predicated region body
PF: predicated region fallthrough
CT: control target
= control target key end

     0   :  { %s1004_s15 = smov 0   ;;  %s1083_s0 = inlined_call_operand.vmem [shape: bf16[8,72], index: 0, kind: input, shape index: {}]   ;;  %s1084_s1 = inlined_call_operand.vmem [shape: bf16[8,1024], index: 1, kind: input, shape index: {}]   ;;  %s1085_s2 = inlined_call_operand.vmem [shape: bf16[3,8,128], index: 2, kind: input, shape index: {}]   ;;  %s1086_s3 = inlined_call_operand.vmem [shape: f32[8,1], index: 3, kind: input, shape index: {}]   ;;  %s1087_s4 = inlined_call_operand.vmem [shape: bf16[8,768], index: 4, kind: output, shape index: {}]  }
   0x1 LB: > { %s886_s16 = sadd.s32 4294967295, %s960_s15   ;;  %p890_p0 = scmp.ge.s32.totalorder %s960_s15, 1  ;;  %s960_s15 = sphi %s1004_s15, %s14_s15  }
   0x2   : > { %p172_p1 = scmp.lt.s32.totalorder %s960_s15, 4 }
   0x4   : > { %p173_p2 = pnand %p890_p0, %p172_p1 }
   0x5   : > { %v224_v0 = vld [vmem:[%s1083_s0] sm:$0xf] (!%p173_p2)  ;;  %p208_p3 = scmp.lt.s32.totalorder (!%p173_p2), %s886_s16, 2  ;;  %s1017_s19 = sshll.u32 (!%p173_p2), %s886_s16, 1  ;;  %vm253_vm0 = vcmask (!%p173_p2), 1043456   ;;  %v964_v8 = vmov (!%p173_p2), 0  }
   0x6   : > { %176 = sbr.rel (%p173_p2) target bundleno = 426 (0x1aa), region = 36  ;;  %v1015_v1 = vcombine.low (!%p173_p2), %v224_v0, %v224_v0  ;;  %s962_s20 = smov (!%p173_p2), 120   ;;  %292 = vmatprep.mubr.bf16.mxu0 (!%p173_p2), %v964_v8  ;;  %347 = vmatprep.mubr.bf16.mxu1 (!%p173_p2), %v964_v8  ;;  %vm249_vm1 = vcmask (!%p173_p2), 64512   ;;  %v797_v9 = vld [vmem:[%s1086_s3] sm:$0xff] (!%p173_p2)  ;;  %vm246_vm2 = vcmask (!%p173_p2), 1039360   ;;  %vm364_vm3 = vcmask (!%p173_p2), 1031168  }
   0x7   : > { %p203_p4 = scmp.lt.s32.totalorder (!%p173_p2), %s1017_s19, 7  ;;  %s963_s25 = smov (!%p173_p2), 112   ;;  %949 = vset.pattern.permute.xlu0 (!%p173_p2), %v964_v8  ;;  %vm427_vm4 = vcmask (!%p173_p2), 900096   ;;  %vm490_vm5 = vcmask (!%p173_p2), 891904   ;;  %vm553_vm6 = vcmask (!%p173_p2), 883712   ;;  %vm616_vm7 = vcmask (!%p173_p2), 752640  }
   0x8   : > { %230 = vrot.lane.b32.xlu1 (!%p173_p2), %v1015_v1, %s962_s20  ;;  %s965_s5 = smov (!%p173_p2), 126   ;;  %s966_s6 = smov (!%p173_p2), 127   ;;  %vm679_vm8 = vcmask (!%p173_p2), 744448   ;;  %vm742_vm9 = vcmask (!%p173_p2), 736256  }
   0x9   : > { %s967_s7 = smov (!%p173_p2), 110   ;;  %s968_s8 = smov (!%p173_p2), 109  }
   0xa   : > { %s969_s9 = smov (!%p173_p2), 96   ;;  %s970_s10 = smov (!%p173_p2), 108  }
   0xb   : > { %s971_s11 = smov (!%p173_p2), 104   ;;  %s972_s12 = smov (!%p173_p2), 92  }
   0xc   : > { %356 = vrot.lane.b32.xlu1 (!%p173_p2), %v1015_v1, %s963_s25  ;;  %s973_s13 = smov (!%p173_p2), 80   ;;  %s974_s14 = smov (!%p173_p2), 91  }
   0xd   : > { %s1089_s16 = smov (!%p208_p3, %s886_s16), 2  ;;  %s976_s17 = smov 90  }
   0xe   : > { %s893_s21 = sshll.u32 %s1089_s16, 2  ;;  %s975_s16 = smov 88  }
   0xf   : > { %s211_s24 = scalar_lea.vmem %s1085_s2, %s893_s21  ;;  %s977_s18 = smov 64  }
  0x10   : > { %v221_v2 = vld [vmem:[%s211_s24] sm:$0xf]  ;;  %s204_s26 = scalar_select %p203_p4, %s1017_s19, 7 }
  0x11   : > { %222 = vst [vmem:[#allocation2 + $0x8] sm:$0xf] %v221_v2  ;;  %s978_s20 = smov 72   ;;  %p213_p5 = scmp.lt.s32.totalorder %s1017_s19, 5 }
  0x12   : > { %s892_s27 = sshll.u32 %s204_s26, 2 }
  0x13   : > { %s206_s30 = scalar_lea.vmem %s1084_s1, %s892_s27  ;;  %s1091_s19 = smov (!%p213_p5, %s1017_s19), 5 }
  0x14   : > { %v219_v3 = vld [vmem:[%s206_s30] sm:$0xff]  ;;  %s895_s23 = sshll.u32 %s1091_s19, 2 }
  0x15   : > { %v898_v4 = vcombine.high %v219_v3, %v219_v3  ;;  %v897_v5 = vcombine.low %v219_v3, %v219_v3  ;;  %s216_s26 = scalar_lea.vmem %s1087_s4, %s895_s23 }
  0x17   : > { %904 = vmatprep.subr.msk.bf16.mxu1 %vm253_vm0, %v898_v4  ;;  %v310_v6 = vsel %vm253_vm0, %v897_v5, 0 }
  0x18   : > { %v951_v7 = vld [vmem:[#allocation2 + $0x8] ss:$0 sps:$4 sm:$0xff]   ;;  %316 = vmatpush1.bf16.msra.mxu1 %v310_v6 }
  0x19   : > { %362 = vrot.lane.b32.xlu0 %v951_v7, %s965_s5  ;;  %244 = vrot.lane.b32.xlu1 %v951_v7, %s966_s6 }
  0x1b   : > { %905 = vmatmul.mubr.msk.bf16.vlgmr.msra.gmra.mrb[0].mxu1 %vm249_vm1, %v224_v0 }
  0x1c   : > { %471 = vmatprep.mubr.bf16.mxu1 %v964_v8 }
  0x1d   : > { %360 = vrot.lane.b32.xlu1 %v898_v4, %s965_s5  ;;  %240 = vrot.lane.b32.xlu0 %v897_v5, %s966_s6 }
  0x21   : > { %242 = vrot.lane.b32.xlu0 %v898_v4, %s966_s6  ;;  %423 = vrot.lane.b32.xlu1 %v898_v4, %s967_s7 }
  0x25   : > { %358 = vrot.lane.b32.xlu0 %v897_v5, %s965_s5  ;;  %484 = vrot.lane.b32.xlu1 %v897_v5, %s968_s8 }
  0x29   : > { %421 = vrot.lane.b32.xlu0 %v897_v5, %s967_s7  ;;  %488 = vrot.lane.b32.xlu1 %v951_v7, %s968_s8 }
  0x2d   : > { %425 = vrot.lane.b32.xlu0 %v951_v7, %s967_s7  ;;  %482 = vrot.lane.b32.xlu1 %v1015_v1, %s969_s9 }
  0x31   : > { %486 = vrot.lane.b32.xlu0 %v898_v4, %s968_s8  ;;  %549 = vrot.lane.b32.xlu1 %v898_v4, %s970_s10 }
  0x35   : > { %419 = vrot.lane.b32.xlu0 %v1015_v1, %s971_s11  ;;  %610 = vrot.lane.b32.xlu1 %v897_v5, %s972_s12 }
  0x39   : > { %547 = vrot.lane.b32.xlu0 %v897_v5, %s970_s10  ;;  %614 = vrot.lane.b32.xlu1 %v951_v7, %s972_s12 }
  0x3d   : > { %551 = vrot.lane.b32.xlu0 %v951_v7, %s970_s10  ;;  %608 = vrot.lane.b32.xlu1 %v1015_v1, %s973_s13 }
  0x41   : > { %612 = vrot.lane.b32.xlu0 %v898_v4, %s972_s12  ;;  %675 = vrot.lane.b32.xlu1 %v898_v4, %s974_s14 }
  0x45   : > { %545 = vrot.lane.b32.xlu0 %v1015_v1, %s975_s16  ;;  %736 = vrot.lane.b32.xlu1 %v897_v5, %s976_s17 }
  0x49   : > { %673 = vrot.lane.b32.xlu0 %v897_v5, %s974_s14  ;;  %740 = vrot.lane.b32.xlu1 %v951_v7, %s976_s17 }
  0x4d   : > { %677 = vrot.lane.b32.xlu0 %v951_v7, %s974_s14  ;;  %734 = vrot.lane.b32.xlu1 %v1015_v1, %s977_s18 }
  0x51   : > { %738 = vrot.lane.b32.xlu0 %v898_v4, %s976_s17 }
  0x55   : > { %671 = vrot.lane.b32.xlu0 %v1015_v1, %s978_s20 }
  0x59   : > { %800 = vperm.xlu0 %949, %v797_v9  }
  0x7a   : > { %v231_v10 = vpop.permute.xlu1 %230 }
  0x7e   : > { %v357_v11 = vpop.permute.xlu1 %356 }
  0x8b   : > { %v363_v12 = vpop.permute.xlu0 %362  ;;  %v245_v13 = vpop.permute.xlu1 %244 }
  0x8f   : > { %v361_v14 = vpop.permute.xlu1 %360  ;;  %v241_v15 = vpop.permute.xlu0 %240 }
  0x90   : > { %v366_v21 = vsel %vm364_vm3, %v361_v14, %v363_v12 }
  0x93   : > { %v243_v16 = vpop.permute.xlu0 %242  ;;  %v424_v17 = vpop.permute.xlu1 %423 }
  0x94   : > { %v248_v18 = vsel %vm246_vm2, %v243_v16, %v245_v13  ;;  %v247_v19 = vsel %vm246_vm2, %v241_v15, %v243_v16 }
  0x95   : > { %900 = vmatprep.subr.msk.bf16.mxu0 %vm253_vm0, %v248_v18  ;;  %v255_v20 = vsel %vm253_vm0, %v247_v19, 0 }
  0x96   : > { %261 = vmatpush1.bf16.msra.mxu0 %v255_v20 }
  0x97   : > { %906 = vmatprep.subr.msk.bf16.mxu0 %vm253_vm0, %v366_v21  ;;  %v359_v22 = vpop.permute.xlu0 %358  ;;  %v485_v23 = vpop.permute.xlu1 %484 }
  0x98   : > { %v365_v24 = vsel %vm364_vm3, %v359_v22, %v361_v14 }
  0x99   : > { %v371_v25 = vsel %vm253_vm0, %v365_v24, 0  ;;  %901 = vmatmul.mubr.msk.bf16.vlgmr.msra.gmra.mrb[0].mxu0 %vm249_vm1, %v231_v10 }
  0x9a   : > { %377 = vmatpush1.bf16.msra.mxu0 %v371_v25  ;;  %408 = vmatprep.mubr.bf16.mxu0 %v964_v8 }
  0x9b   : > { %v422_v26 = vpop.permute.xlu0 %421  ;;  %v489_v27 = vpop.permute.xlu1 %488 }
  0x9c   : > { %v428_v28 = vsel %vm427_vm4, %v422_v26, %v424_v17 }
  0x9d   : > { %v434_v32 = vsel %vm253_vm0, %v428_v28, 0 }
  0x9f   : > { %v426_v29 = vpop.permute.xlu0 %425  ;;  %v483_v30 = vpop.permute.xlu1 %482 }
  0xa0   : > { %v429_v31 = vsel %vm427_vm4, %v424_v17, %v426_v29 }
  0xa1   : > { %907 = vmatmul.mubr.msk.bf16.vlgmr.msra.gmra.mrb[4].mxu0 %vm249_vm1, %v357_v11  ;;  %908 = vmatprep.subr.msk.bf16.mxu1 %vm253_vm0, %v429_v31 }
  0xa2   : > { %440 = vmatpush1.bf16.msra.mxu1 %v434_v32  ;;  %534 = vmatprep.mubr.bf16.mxu0 %v964_v8 }
  0xa3   : > { %v487_v33 = vpop.permute.xlu0 %486  ;;  %v550_v34 = vpop.permute.xlu1 %549 }
  0xa4   : > { %v491_v35 = vsel %vm490_vm5, %v485_v23, %v487_v33  ;;  %v492_v36 = vsel %vm490_vm5, %v487_v33, %v489_v27 }
  0xa5   : > { %v497_v37 = vsel %vm253_vm0, %v491_v35, 0  ;;  %910 = vmatprep.subr.msk.bf16.mxu0 %vm253_vm0, %v492_v36 }
  0xa6   : > { %503 = vmatpush1.bf16.msra.mxu0 %v497_v37 }
  0xa7   : > { %v420_v38 = vpop.permute.xlu0 %419  ;;  %v611_v39 = vpop.permute.xlu1 %610 }
  0xa8   : > { %909 = vmatmul.mubr.msk.bf16.vlgmr.msra.gmra.mrb[4].mxu1 %vm249_vm1, %v420_v38 }
  0xa9   : > { %911 = vmatmul.mubr.msk.bf16.vlgmr.msra.gmra.mrb[8].mxu0 %vm249_vm1, %v483_v30  ;;  %597 = vmatprep.mubr.bf16.mxu1 %v964_v8 }
  0xaa   : > { %660 = vmatprep.mubr.bf16.mxu0 %v964_v8 }
  0xab   : > { %v548_v40 = vpop.permute.xlu0 %547  ;;  %v615_v41 = vpop.permute.xlu1 %614 }
  0xac   : > { %v554_v42 = vsel %vm553_vm6, %v548_v40, %v550_v34 }
  0xad   : > { %v560_v46 = vsel %vm253_vm0, %v554_v42, 0 }
  0xaf   : > { %v552_v43 = vpop.permute.xlu0 %551  ;;  %v609_v44 = vpop.permute.xlu1 %608 }
  0xb0   : > { %v555_v45 = vsel %vm553_vm6, %v550_v34, %v552_v43 }
  0xb1   : > { %912 = vmatprep.subr.msk.bf16.mxu1 %vm253_vm0, %v555_v45 }
  0xb2   : > { %566 = vmatpush1.bf16.msra.mxu1 %v560_v46 }
  0xb3   : > { %v613_v47 = vpop.permute.xlu0 %612  ;;  %v676_v50 = vpop.permute.xlu1 %675 }
  0xb4   : > { %v617_v48 = vsel %vm616_vm7, %v611_v39, %v613_v47  ;;  %v618_v49 = vsel %vm616_vm7, %v613_v47, %v615_v41 }
  0xb5   : > { %v623_v51 = vsel %vm253_vm0, %v617_v48, 0  ;;  %914 = vmatprep.subr.msk.bf16.mxu0 %vm253_vm0, %v618_v49 }
  0xb6   : > { %629 = vmatpush1.bf16.msra.mxu0 %v623_v51 }
  0xb7   : > { %v546_v52 = vpop.permute.xlu0 %545  ;;  %v737_v53 = vpop.permute.xlu1 %736 }
  0xb8   : > { %913 = vmatmul.mubr.msk.bf16.vlgmr.msra.gmra.mrb[8].mxu1 %vm249_vm1, %v546_v52 }
  0xb9   : > { %915 = vmatmul.mubr.msk.bf16.vlgmr.msra.gmra.mrb[12].mxu0 %vm249_vm1, %v609_v44  ;;  %723 = vmatprep.mubr.bf16.mxu1 %v964_v8 }
  0xba   : > { %786 = vmatprep.mubr.bf16.mxu0 %v964_v8 }
  0xbb   : > { %v674_v54 = vpop.permute.xlu0 %673  ;;  %v741_v58 = vpop.permute.xlu1 %740 }
  0xbc   : > { %v680_v55 = vsel %vm679_vm8, %v674_v54, %v676_v50 }
  0xbd   : > { %v686_v59 = vsel %vm253_vm0, %v680_v55, 0 }
  0xbf   : > { %v678_v56 = vpop.permute.xlu0 %677  ;;  %v735_v0 = vpop.permute.xlu1 %734 }
  0xc0   : > { %v681_v57 = vsel %vm679_vm8, %v676_v50, %v678_v56 }
  0xc1   : > { %916 = vmatprep.subr.msk.bf16.mxu1 %vm253_vm0, %v681_v57 }
  0xc2   : > { %692 = vmatpush1.bf16.msra.mxu1 %v686_v59 }
  0xc3   : > { %v739_v60 = vpop.permute.xlu0 %738 }
  0xc4   : > { %v743_v61 = vsel %vm742_vm9, %v737_v53, %v739_v60  ;;  %v744_v62 = vsel %vm742_vm9, %v739_v60, %v741_v58 }
  0xc5   : > { %v749_v63 = vsel %vm253_vm0, %v743_v61, 0  ;;  %918 = vmatprep.subr.msk.bf16.mxu0 %vm253_vm0, %v744_v62 }
  0xc6   : > { %755 = vmatpush1.bf16.msra.mxu0 %v749_v63 }
  0xc7   : > { %v672_v1 = vpop.permute.xlu0 %671 }
  0xc8   : > { %917 = vmatmul.mubr.msk.bf16.vlgmr.msra.gmra.mrb[12].mxu1 %vm249_vm1, %v672_v1 }
  0xc9   : > { %919 = vmatmul.mubr.msk.bf16.vlgmr.msra.gmra.mrb[16].mxu0 %vm249_vm1, %v735_v0 }
  0xd8   : > { %v801_v43 = vpop.permute.xlu0 %800 }
  0xee   : > { %v349_v2 = vpop.f32.mrb[0].mxu1 }
  0xef   : > { %v351_v3 = vpop.f32.mrb[1].mxu1 }
  0xf0   : > { %v353_v4 = vpop.f32.mrb[2].mxu1 }
  0xf1   : > { %v354_v5 = vpop.f32.mrb[3].mxu1 }
 0x16c   : > { %v294_v6 = vpop.f32.mrb[0].mxu0 }
 0x16d   : > { %v350_v7 = vadd.f32 %v349_v2, %v294_v6  ;;  %v296_v8 = vpop.f32.mrb[1].mxu0 }
 0x16e   : > { %v352_v9 = vadd.f32 %v351_v3, %v296_v8  ;;  %v298_v10 = vpop.f32.mrb[2].mxu0 }
 0x16f   : > { %v299_v11 = vpop.f32.mrb[3].mxu0 }
 0x174   : > { %v410_v12 = vpop.f32.mrb[4].mxu0 }
 0x175   : > { %v417_v13 = vadd.f32 %v410_v12, %v350_v7  ;;  %v412_v14 = vpop.f32.mrb[5].mxu0 }
 0x176   : > { %v418_v15 = vadd.f32 %v412_v14, %v352_v9  ;;  %v414_v16 = vpop.f32.mrb[6].mxu0 }
 0x177   : > { %v415_v17 = vpop.f32.mrb[7].mxu0 }
 0x17b   : > { %v473_v18 = vpop.f32.mrb[4].mxu1 }
 0x17c   : > { %v480_v19 = vadd.f32 %v473_v18, %v417_v13  ;;  %v475_v20 = vpop.f32.mrb[5].mxu1  ;;  %v536_v21 = vpop.f32.mrb[8].mxu0 }
 0x17d   : > { %v481_v22 = vadd.f32 %v475_v20, %v418_v15  ;;  %v477_v23 = vpop.f32.mrb[6].mxu1  ;;  %v538_v24 = vpop.f32.mrb[9].mxu0 }
 0x17e   : > { %v543_v25 = vadd.f32 %v536_v21, %v480_v19  ;;  %v478_v26 = vpop.f32.mrb[7].mxu1  ;;  %v540_v27 = vpop.f32.mrb[10].mxu0 }
 0x17f   : > { %v544_v28 = vadd.f32 %v538_v24, %v481_v22  ;;  %v541_v29 = vpop.f32.mrb[11].mxu0 }
 0x18b   : > { %v599_v30 = vpop.f32.mrb[8].mxu1 }
 0x18c   : > { %v606_v31 = vadd.f32 %v599_v30, %v543_v25  ;;  %v601_v32 = vpop.f32.mrb[9].mxu1  ;;  %v662_v33 = vpop.f32.mrb[12].mxu0 }
 0x18d   : > { %v607_v34 = vadd.f32 %v601_v32, %v544_v28  ;;  %v603_v35 = vpop.f32.mrb[10].mxu1  ;;  %v664_v36 = vpop.f32.mrb[13].mxu0 }
 0x18e   : > { %v669_v37 = vadd.f32 %v662_v33, %v606_v31  ;;  %v604_v38 = vpop.f32.mrb[11].mxu1  ;;  %v666_v39 = vpop.f32.mrb[14].mxu0 }
 0x18f   : > { %v670_v40 = vadd.f32 %v664_v36, %v607_v34  ;;  %v667_v41 = vpop.f32.mrb[15].mxu0 }
 0x19b   : > { %v725_v42 = vpop.f32.mrb[12].mxu1 }
 0x19c   : > { %v732_v44 = vadd.f32 %v725_v42, %v669_v37  ;;  %v727_v45 = vpop.f32.mrb[13].mxu1  ;;  %v788_v46 = vpop.f32.mrb[16].mxu0 }
 0x19d   : > { %v733_v47 = vadd.f32 %v727_v45, %v670_v40  ;;  %v729_v48 = vpop.f32.mrb[14].mxu1  ;;  %v790_v49 = vpop.f32.mrb[17].mxu0 }
 0x19e   : > { %v795_v50 = vadd.f32 %v788_v46, %v732_v44  ;;  %v730_v51 = vpop.f32.mrb[15].mxu1  ;;  %v792_v52 = vpop.f32.mrb[18].mxu0 }
 0x19f   : > { %v796_v53 = vadd.f32 %v790_v49, %v733_v47  ;;  %v793_v54 = vpop.f32.mrb[19].mxu0 }
 0x1a0   : > { %v803_v55 = vadd.f32 %v801_v43, %v795_v50 }
 0x1a1   : > { %v804_v56 = vadd.f32 %v801_v43, %v796_v53 }
 0x1a2   : > { %v805_v57 = vmul.f32 0.01, %v803_v55 }
 0x1a3   : > { %v806_v58 = vmul.f32 0.01, %v804_v56 }
 0x1a4   : > { %v807_v59 = vmax.f32 %v803_v55, %v805_v57 }
 0x1a5   : > { %v808_v60 = vmax.f32 %v804_v56, %v806_v58 }
 0x1a7   : > { %v923_v61 = vpack.c.bf16 %v808_v60, %v807_v59 }
 0x1a9   : > { %817 = vst [vmem:[%s216_s26] sm:$0xff] %v923_v61 }
 0x1aa PF: > { %s14_s15 = sadd.s32 1, %s960_s15  }
 0x1ab   : > { %p11_p6 = scmp.ge.s32.totalorder %s14_s15, 5  }
 0x1ad   :  { %13 = sbr.rel (!%p11_p6) target bundleno = 1 (0x1), region = 69 }

// kernel: feature_net.14
= control target key start
LH: loop header
LB: loop body
LE: loop exit
PB: predicated region body
PF: predicated region fallthrough
CT: control target
= control target key end

     0   :  { %s1258_s15 = smov 0   ;;  %s1260_s16 = smov 0   ;;  %s1412_s0 = inlined_call_operand.vmem [shape: bf16[16,288], index: 0, kind: input, shape index: {}]   ;;  %s1413_s1 = inlined_call_operand.vmem [shape: bf16[32,384], index: 1, kind: input, shape index: {}]   ;;  %s1414_s2 = inlined_call_operand.vmem [shape: bf16[2,32,128], index: 2, kind: input, shape index: {}]   ;;  %s1415_s3 = inlined_call_operand.vmem [shape: f32[16,1], index: 3, kind: input, shape index: {}]   ;;  %s1416_s4 = inlined_call_operand.vmem [shape: bf16[16,256], index: 4, kind: output, shape index: {}]  }
   0x1   :  { %s1262_s17 = smov 0  }
   0x2 LB: > { %s1274_s18 = sadd.s32 4294967295, %s1217_s17   ;;  %s1277_s19 = sadd.s32 1, %s1217_s17   ;;  %s1217_s17 = sphi %s1262_s17, %s1420_s17   ;;  %s1213_s16 = sphi %s1260_s16, %s1419_s16   ;;  %s1209_s15 = sphi %s1258_s15, %s1418_s15  }
   0x3   : > { %s39_s20 = ssub.s32 %s1217_s17, %s1277_s19  ;;  %s42_s21 = sadd.s32 1, %s1213_s16 }
   0x4   : > { %p40_p0 = scmp.eq.s32.totalorder %s39_s20, 0  ;;  %p49_p1 = scmp.ne.s32.totalorder %s1213_s16, %s1209_s15 }
   0x5   : > { %p50_p2 = scmp.eq.s32.totalorder %s1217_s17, 0  ;;  %p126_p3 = scmp.eq.s32.totalorder %s1274_s18, 1 }
   0x6   : > { %s1287_s22 = scalar_select %p40_p0, %s1213_s16, %s42_s21  }
   0x7   : > { %p51_p4 = por %p50_p2, %p49_p1  ;;  %p1289_p5 = por %p126_p3, %p49_p1 }
   0x8   : > { %p1011_p6 = scmp.ge.s32.totalorder %s1217_s17, 2 }
   0xa   : > { %154 = sbr.rel (%p1011_p6) target bundleno = 24 (0x18), region = 24 }
  0x11   : > { %157 = sbr.rel (!%p51_p4) target bundleno = 24 (0x18), region = 28  ;;  %s159_s24 = sand.u32 (%p51_p4), 1, %s1213_s16  }
  0x12   : > { %s1013_s25 = sshll.u32 (%p51_p4), %s1217_s17, 2  ;;  %s1012_s26 = sshll.u32 (%p51_p4), %s159_s24, 4 }
  0x13   : > { %s163_s29 = scalar_lea.vmem (%p51_p4), %s1413_s1, %s1013_s25  ;;  %s161_s30 = scalar_lea.vmem (%p51_p4), [#allocation3], %s1012_s26 }
  0x14   : > { %v179_v0 = vld [vmem:[%s163_s29] sm:$0xf] (%p51_p4)  ;;  %v181_v1 = vld [vmem:[%s163_s29 + $0xc] sm:$0xf] (%p51_p4)  ;;  %v183_v2 = vld [vmem:[%s163_s29 + $0x18] sm:$0xf] (%p51_p4) }
  0x15   : > { %180 = vst [vmem:[%s161_s30] sm:$0xf] (%p51_p4), %v179_v0  ;;  %182 = vst [vmem:[%s161_s30 + $0x4] sm:$0xf] (%p51_p4), %v181_v1  ;;  %v185_v3 = vld [vmem:[%s163_s29 + $0x24] sm:$0xf] (%p51_p4) }
  0x16   : > { %184 = vst [vmem:[%s161_s30 + $0x8] sm:$0xf] (%p51_p4), %v183_v2  ;;  %186 = vst [vmem:[%s161_s30 + $0xc] sm:$0xf] (%p51_p4), %v185_v3 }
  0x18 PF: > { %p1014_p7 = scmp.ge.s32.totalorder %s1217_s17, 1  ;;  %p224_p8 = scmp.lt.s32.totalorder %s1217_s17, 3 }
  0x1a   : > { %p225_p9 = pnand %p1014_p7, %p224_p8 }
  0x1b   : > { %v1188_v4 = vld [vmem:[%s1412_s0] ss:$12 sps:$4 sm:$0xff] (!%p225_p9)   ;;  %s231_s7 = sand.u32 (!%p225_p9), 1, %s1209_s15   ;;  %s1219_s8 = smov (!%p225_p9), 96   ;;  %v1220_v5 = vmov (!%p225_p9), 0.0   ;;  %vm1222_vm0 = vmmov (!%p225_p9), 0  }
  0x1c   : > { %228 = sbr.rel (%p225_p9) target bundleno = 456 (0x1c8), region = 73  ;;  %315 = vrot.lane.b32.xlu0 (!%p225_p9), %v1188_v4, %s1219_s8  ;;  %s1015_s9 = sshll.u32 (!%p225_p9), %s231_s7, 4  ;;  %1076 = vmatprep.subr.bf16.mxu0 (!%p225_p9), %v1220_v5  ;;  %vm334_vm1 = vcmask (!%p225_p9), 261120   ;;  %v1336_v10 = vld [vmem:[%s1412_s0 + $0x4] ss:$12 sps:$4 sm:$0xff] (!%p225_p9)   ;;  %v1232_v11 = vmov (!%p225_p9), 0  }
  0x1d   : > { %1084 = vmatprep.subr.bf16.mxu1 (!%p225_p9), %v1220_v5  ;;  %s233_s10 = scalar_lea.vmem (!%p225_p9), [#allocation3], %s1015_s9  ;;  %p260_p10 = scmp.lt.s32.totalorder (!%p225_p9), %s1274_s18, 1  ;;  %1080 = vmatprep.mubr.msk.bf16.mxu0 (!%p225_p9), %vm1222_vm0, %v1220_v5  ;;  %v860_v12 = vld [vmem:[%s1415_s3] sm:$0xff] (!%p225_p9)  ;;  %v861_v13 = vld [vmem:[%s1415_s3 + $0x8] sm:$0xff] (!%p225_p9)  ;;  %vm329_vm2 = vcmask (!%p225_p9), 1039360   ;;  %vm433_vm3 = vcmask (!%p225_p9), 1031168  }
  0x1e   : > { %v1310_v6 = vld [vmem:[%s233_s10 + $0x8] sm:$0xff] (!%p225_p9)   ;;  %v1190_v7 = vld [vmem:[%s233_s10] sm:$0xff] (!%p225_p9)   ;;  %s1221_s11 = smov (!%p225_p9), 127   ;;  %1088 = vmatprep.mubr.msk.bf16.mxu1 (!%p225_p9), %vm1222_vm0, %v1220_v5  ;;  %s1223_s21 = smov (!%p225_p9), 126   ;;  %1187 = vset.pattern.permute.xlu1 (!%p225_p9), %v1232_v11  ;;  %vm494_vm4 = vcmask (!%p225_p9), 965632   ;;  %vm560_vm5 = vcmask (!%p225_p9), 957440  }
  0x1f   : > { %325 = vrot.lane.b32.xlu1 (!%p225_p9), %v1310_v6, %s1221_s11  ;;  %1085 = vmatpush3.bf16.msra.mxu1 (!%p225_p9), %v1190_v7  ;;  %s1224_s24 = smov (!%p225_p9), 118   ;;  %s1225_s25 = smov (!%p225_p9), 64   ;;  %vm621_vm6 = vcmask (!%p225_p9), 949248   ;;  %vm682_vm7 = vcmask (!%p225_p9), 883712   ;;  %vm743_vm8 = vcmask (!%p225_p9), 875520   ;;  %vm809_vm9 = vcmask (!%p225_p9), 867328  }
  0x20   : > { %321 = vrot.lane.b32.xlu0 (!%p225_p9), %v1190_v7, %s1221_s11  ;;  %1086 = vmatprep.subr.bf16.mxu1 (!%p225_p9), %v1220_v5  ;;  %s1226_s26 = smov (!%p225_p9), 117   ;;  %s1227_s27 = smov (!%p225_p9), 32   ;;  %v1194_v3 = vld [vmem:[%s1412_s0 + $0x8] ss:$12 sps:$4 sm:$0xff] (!%p225_p9)  }
  0x21   : > { %s1228_s28 = smov (!%p225_p9), 116   ;;  %s1229_s29 = smov (!%p225_p9), 108   ;;  %1186 = vset.pattern.permute.xlu0 (!%p225_p9), %v1232_v11 }
  0x22   : > { %s1230_s6 = smov (!%p225_p9), 107   ;;  %s1231_s9 = smov (!%p225_p9), 106  }
  0x23   : > { %s261_s12 = scalar_select %p260_p10, %s1274_s18, 1  ;;  %425 = vrot.lane.b32.xlu1 %v1190_v7, %s1223_s21  ;;  %1087 = vmatpush3.bf16.msra.mxu1 %v1310_v6 }
  0x24   : > { %1100 = vmatprep.subr.bf16.mxu1 %v1220_v5  ;;  %s1016_s17 = sshll.u32 %s231_s7, 3 }
  0x25   : > { %s1041_s13 = sshll.u32 %s261_s12, 4 }
  0x26   : > { %s264_s20 = scalar_lea.vmem %s1414_s2, %s1041_s13  ;;  %1089 = vmatmul.mubr.msk.bf16.vlgmr.msra.gmra.mrb[0].mxu1 %vm334_vm1, %v1188_v4 }
  0x27   : > { %v1191_v8 = vld [vmem:[%s264_s20] sm:$0xff]   ;;  %v1192_v9 = vld [vmem:[%s264_s20 + $0x8] sm:$0xff]   ;;  %1104 = vmatprep.mubr.msk.bf16.mxu1 %vm1222_vm0, %v1220_v5  ;;  %s259_s20 = scalar_lea.vmem [#allocation4], %s1016_s17 }
  0x28   : > { %323 = vrot.lane.b32.xlu0 %v1191_v8, %s1221_s11  ;;  %327 = vrot.lane.b32.xlu1 %v1192_v9, %s1221_s11 }
  0x2c   : > { %427 = vrot.lane.b32.xlu0 %v1191_v8, %s1223_s21  ;;  %429 = vrot.lane.b32.xlu1 %v1310_v6, %s1223_s21 }
  0x30   : > { %431 = vrot.lane.b32.xlu0 %v1192_v9, %s1223_s21  ;;  %486 = vrot.lane.b32.xlu1 %v1190_v7, %s1224_s24  ;;  %s1038_s21 = sshll.u32 (%p1289_p5), %s1274_s18, 2 }
  0x34   : > { %488 = vrot.lane.b32.xlu0 %v1191_v8, %s1224_s24  ;;  %423 = vrot.lane.b32.xlu1 %v1188_v4, %s1225_s25 }
  0x38   : > { %552 = vrot.lane.b32.xlu0 %v1190_v7, %s1226_s26  ;;  %554 = vrot.lane.b32.xlu1 %v1191_v8, %s1226_s26 }
  0x3c   : > { %490 = vrot.lane.b32.xlu0 %v1310_v6, %s1224_s24  ;;  %492 = vrot.lane.b32.xlu1 %v1192_v9, %s1224_s24 }
  0x40   : > { %556 = vrot.lane.b32.xlu0 %v1310_v6, %s1226_s26  ;;  %558 = vrot.lane.b32.xlu1 %v1192_v9, %s1226_s26  ;;  %s896_s26 = scalar_lea.vmem (%p1289_p5), %s1416_s4, %s1038_s21 }
  0x44   : > { %484 = vrot.lane.b32.xlu0 %v1188_v4, %s1227_s27  ;;  %613 = vrot.lane.b32.xlu1 %v1190_v7, %s1228_s28 }
  0x48   : > { %615 = vrot.lane.b32.xlu0 %v1191_v8, %s1228_s28  ;;  %674 = vrot.lane.b32.xlu1 %v1190_v7, %s1229_s29 }
  0x4c   : > { %676 = vrot.lane.b32.xlu0 %v1191_v8, %s1229_s29  ;;  %617 = vrot.lane.b32.xlu1 %v1310_v6, %s1228_s28 }
  0x50   : > { %619 = vrot.lane.b32.xlu0 %v1192_v9, %s1228_s28  ;;  %678 = vrot.lane.b32.xlu1 %v1310_v6, %s1229_s29 }
  0x54   : > { %680 = vrot.lane.b32.xlu0 %v1192_v9, %s1229_s29  ;;  %611 = vrot.lane.b32.xlu1 %v1336_v10, %s1219_s8 }
  0x58   : > { %735 = vrot.lane.b32.xlu0 %v1190_v7, %s1230_s6  ;;  %737 = vrot.lane.b32.xlu1 %v1191_v8, %s1230_s6 }
  0x5c   : > { %672 = vrot.lane.b32.xlu0 %v1336_v10, %s1225_s25  ;;  %801 = vrot.lane.b32.xlu1 %v1190_v7, %s1231_s9 }
  0x60   : > { %803 = vrot.lane.b32.xlu0 %v1191_v8, %s1231_s9  ;;  %739 = vrot.lane.b32.xlu1 %v1310_v6, %s1230_s6 }
  0x64   : > { %741 = vrot.lane.b32.xlu0 %v1192_v9, %s1230_s6  ;;  %805 = vrot.lane.b32.xlu1 %v1310_v6, %s1231_s9 }
  0x68   : > { %807 = vrot.lane.b32.xlu0 %v1192_v9, %s1231_s9  ;;  %733 = vrot.lane.b32.xlu1 %v1336_v10, %s1227_s27 }
  0x6c   : > { %864 = vperm.xlu0 %1186, %v860_v12   ;;  %869 = vperm.xlu1 %1187, %v861_v13  }
  0x8e   : > { %v316_v14 = vpop.permute.xlu0 %315 }
  0x91   : > { %v326_v15 = vpop.permute.xlu1 %325 }
  0x92   : > { %v322_v16 = vpop.permute.xlu0 %321 }
  0x95   : > { %v426_v17 = vpop.permute.xlu1 %425 }
  0x9a   : > { %v324_v18 = vpop.permute.xlu0 %323  ;;  %v328_v20 = vpop.permute.xlu1 %327 }
  0x9b   : > { %v330_v19 = vsel %vm329_vm2, %v322_v16, %v324_v18  ;;  %v331_v21 = vsel %vm329_vm2, %v326_v15, %v328_v20 }
  0x9c   : > { %1077 = vmatpush3.bf16.msra.mxu0 %v330_v19 }
  0x9d   : > { %1078 = vmatprep.subr.bf16.mxu0 %v1220_v5 }
  0x9e   : > { %v428_v22 = vpop.permute.xlu0 %427  ;;  %v430_v23 = vpop.permute.xlu1 %429 }
  0x9f   : > { %v434_v25 = vsel %vm433_vm3, %v426_v17, %v428_v22 }
  0xa0   : > { %1079 = vmatpush3.bf16.msra.mxu0 %v331_v21 }
  0xa1   : > { %1092 = vmatprep.subr.bf16.mxu0 %v1220_v5 }
  0xa2   : > { %v432_v24 = vpop.permute.xlu0 %431  ;;  %v487_v26 = vpop.permute.xlu1 %486 }
  0xa3   : > { %1081 = vmatmul.mubr.msk.bf16.vlgmr.msra.gmra.mrb[0].mxu0 %vm334_vm1, %v316_v14  ;;  %v435_v28 = vsel %vm433_vm3, %v430_v23, %v432_v24 }
  0xa4   : > { %1093 = vmatpush3.bf16.msra.mxu0 %v434_v25  ;;  %1096 = vmatprep.mubr.msk.bf16.mxu0 %vm1222_vm0, %v1220_v5 }
  0xa5   : > { %1094 = vmatprep.subr.bf16.mxu0 %v1220_v5 }
  0xa6   : > { %v489_v27 = vpop.permute.xlu0 %488  ;;  %v424_v30 = vpop.permute.xlu1 %423 }
  0xa7   : > { %v495_v29 = vsel %vm494_vm4, %v487_v26, %v489_v27 }
  0xa8   : > { %1095 = vmatpush3.bf16.msra.mxu0 %v435_v28  ;;  %1101 = vmatpush3.bf16.msra.mxu1 %v495_v29 }
  0xa9   : > { %1108 = vmatprep.subr.bf16.mxu0 %v1220_v5  ;;  %1102 = vmatprep.subr.bf16.mxu1 %v1220_v5 }
  0xaa   : > { %v553_v31 = vpop.permute.xlu0 %552  ;;  %v555_v32 = vpop.permute.xlu1 %554 }
  0xab   : > { %1097 = vmatmul.mubr.msk.bf16.vlgmr.msra.gmra.mrb[4].mxu0 %vm334_vm1, %v424_v30  ;;  %v561_v33 = vsel %vm560_vm5, %v553_v31, %v555_v32 }
  0xac   : > { %1112 = vmatprep.mubr.msk.bf16.mxu0 %vm1222_vm0, %v1220_v5  ;;  %1109 = vmatpush3.bf16.msra.mxu0 %v561_v33 }
  0xad   : > { %1110 = vmatprep.subr.bf16.mxu0 %v1220_v5 }
  0xae   : > { %v491_v34 = vpop.permute.xlu0 %490  ;;  %v493_v35 = vpop.permute.xlu1 %492 }
  0xaf   : > { %v496_v36 = vsel %vm494_vm4, %v491_v34, %v493_v35 }
  0xb0   : > { %1103 = vmatpush3.bf16.msra.mxu1 %v496_v36 }
  0xb1   : > { %1116 = vmatprep.subr.bf16.mxu1 %v1220_v5 }
  0xb2   : > { %v557_v37 = vpop.permute.xlu0 %556  ;;  %v559_v38 = vpop.permute.xlu1 %558 }
  0xb3   : > { %v562_v39 = vsel %vm560_vm5, %v557_v37, %v559_v38 }
  0xb4   : > { %1111 = vmatpush3.bf16.msra.mxu0 %v562_v39 }
  0xb5   : > { %1124 = vmatprep.subr.bf16.mxu0 %v1220_v5 }
  0xb6   : > { %v485_v40 = vpop.permute.xlu0 %484  ;;  %v614_v41 = vpop.permute.xlu1 %613 }
  0xb7   : > { %1105 = vmatmul.mubr.msk.bf16.vlgmr.msra.gmra.mrb[4].mxu1 %vm334_vm1, %v485_v40  ;;  %1113 = vmatmul.mubr.msk.bf16.vlgmr.msra.gmra.mrb[8].mxu0 %vm334_vm1, %v1336_v10 }
  0xb8   : > { %1120 = vmatprep.mubr.msk.bf16.mxu1 %vm1222_vm0, %v1220_v5  ;;  %1128 = vmatprep.mubr.msk.bf16.mxu0 %vm1222_vm0, %v1220_v5 }
  0xba   : > { %v616_v42 = vpop.permute.xlu0 %615  ;;  %v675_v44 = vpop.permute.xlu1 %674 }
  0xbb   : > { %v622_v43 = vsel %vm621_vm6, %v614_v41, %v616_v42 }
  0xbc   : > { %1117 = vmatpush3.bf16.msra.mxu1 %v622_v43 }
  0xbd   : > { %1118 = vmatprep.subr.bf16.mxu1 %v1220_v5 }
  0xbe   : > { %v677_v45 = vpop.permute.xlu0 %676  ;;  %v618_v47 = vpop.permute.xlu1 %617 }
  0xbf   : > { %v683_v46 = vsel %vm682_vm7, %v675_v44, %v677_v45 }
  0xc0   : > { %1125 = vmatpush3.bf16.msra.mxu0 %v683_v46 }
  0xc1   : > { %1126 = vmatprep.subr.bf16.mxu0 %v1220_v5 }
  0xc2   : > { %v620_v48 = vpop.permute.xlu0 %619  ;;  %v679_v50 = vpop.permute.xlu1 %678 }
  0xc3   : > { %v623_v49 = vsel %vm621_vm6, %v618_v47, %v620_v48 }
  0xc4   : > { %1119 = vmatpush3.bf16.msra.mxu1 %v623_v49 }
  0xc5   : > { %1132 = vmatprep.subr.bf16.mxu1 %v1220_v5 }
  0xc6   : > { %v681_v51 = vpop.permute.xlu0 %680  ;;  %v612_v53 = vpop.permute.xlu1 %611 }
  0xc7   : > { %v684_v52 = vsel %vm682_vm7, %v679_v50, %v681_v51  ;;  %1121 = vmatmul.mubr.msk.bf16.vlgmr.msra.gmra.mrb[8].mxu1 %vm334_vm1, %v612_v53 }
  0xc8   : > { %1127 = vmatpush3.bf16.msra.mxu0 %v684_v52  ;;  %1136 = vmatprep.mubr.msk.bf16.mxu1 %vm1222_vm0, %v1220_v5 }
  0xc9   : > { %1140 = vmatprep.subr.bf16.mxu0 %v1220_v5 }
  0xca   : > { %v736_v54 = vpop.permute.xlu0 %735  ;;  %v738_v55 = vpop.permute.xlu1 %737 }
  0xcb   : > { %v744_v56 = vsel %vm743_vm8, %v736_v54, %v738_v55 }
  0xcc   : > { %1133 = vmatpush3.bf16.msra.mxu1 %v744_v56 }
  0xcd   : > { %1134 = vmatprep.subr.bf16.mxu1 %v1220_v5 }
  0xce   : > { %v673_v57 = vpop.permute.xlu0 %672  ;;  %v802_v58 = vpop.permute.xlu1 %801 }
  0xcf   : > { %1129 = vmatmul.mubr.msk.bf16.vlgmr.msra.gmra.mrb[12].mxu0 %vm334_vm1, %v673_v57 }
  0xd0   : > { %1144 = vmatprep.mubr.msk.bf16.mxu0 %vm1222_vm0, %v1220_v5 }
  0xd2   : > { %v804_v59 = vpop.permute.xlu0 %803  ;;  %v740_v61 = vpop.permute.xlu1 %739 }
  0xd3   : > { %v810_v60 = vsel %vm809_vm9, %v802_v58, %v804_v59 }
  0xd4   : > { %1141 = vmatpush3.bf16.msra.mxu0 %v810_v60 }
  0xd5   : > { %1142 = vmatprep.subr.bf16.mxu0 %v1220_v5 }
  0xd6   : > { %v742_v62 = vpop.permute.xlu0 %741  ;;  %v806_v0 = vpop.permute.xlu1 %805 }
  0xd7   : > { %v745_v63 = vsel %vm743_vm8, %v740_v61, %v742_v62 }
  0xd8   : > { %1135 = vmatpush3.bf16.msra.mxu1 %v745_v63 }
  0xda   : > { %v808_v1 = vpop.permute.xlu0 %807  ;;  %v734_v4 = vpop.permute.xlu1 %733 }
  0xdb   : > { %v811_v2 = vsel %vm809_vm9, %v806_v0, %v808_v1  ;;  %1137 = vmatmul.mubr.msk.bf16.vlgmr.msra.gmra.mrb[12].mxu1 %vm334_vm1, %v734_v4 }
  0xdc   : > { %1143 = vmatpush3.bf16.msra.mxu0 %v811_v2 }
  0xdf   : > { %1145 = vmatmul.mubr.msk.bf16.vlgmr.msra.gmra.mrb[16].mxu0 %vm334_vm1, %v1194_v3 }
  0xeb   : > { %v865_v48 = vpop.permute.xlu0 %864  ;;  %v870_v56 = vpop.permute.xlu1 %869 }
  0xf9   : > { %v416_v6 = vpop.f32.mrb[0].mxu1 }
  0xfa   : > { %v1090_v7 = vpop.f32.mrb[1].mxu1 }
  0xfb   : > { %v419_v5 = vpop.f32.mrb[2].mxu1 }
  0xfc   : > { %v1091_v8 = vpop.f32.mrb[3].mxu1 }
 0x176   : > { %v372_v9 = vpop.f32.mrb[0].mxu0 }
 0x177   : > { %v417_v10 = vadd.f32 %v416_v6, %v372_v9  ;;  %v1082_v11 = vpop.f32.mrb[1].mxu0 }
 0x178   : > { %v375_v12 = vpop.f32.mrb[2].mxu0 }
 0x179   : > { %v420_v13 = vadd.f32 %v419_v5, %v375_v12  ;;  %v1083_v14 = vpop.f32.mrb[3].mxu0 }
 0x17e   : > { %v475_v15 = vpop.f32.mrb[4].mxu0 }
 0x17f   : > { %v482_v16 = vadd.f32 %v475_v15, %v417_v10  ;;  %v1098_v17 = vpop.f32.mrb[5].mxu0 }
 0x180   : > { %v478_v18 = vpop.f32.mrb[6].mxu0 }
 0x181   : > { %v483_v19 = vadd.f32 %v478_v18, %v420_v13  ;;  %v1099_v20 = vpop.f32.mrb[7].mxu0 }
 0x18a   : > { %v536_v21 = vpop.f32.mrb[4].mxu1  ;;  %v602_v25 = vpop.f32.mrb[8].mxu0 }
 0x18b   : > { %v543_v22 = vadd.f32 %v536_v21, %v482_v16  ;;  %v1106_v23 = vpop.f32.mrb[5].mxu1  ;;  %v1114_v29 = vpop.f32.mrb[9].mxu0 }
 0x18c   : > { %v539_v24 = vpop.f32.mrb[6].mxu1  ;;  %v605_v30 = vpop.f32.mrb[10].mxu0 }
 0x18d   : > { %v544_v26 = vadd.f32 %v539_v24, %v483_v19  ;;  %v1107_v27 = vpop.f32.mrb[7].mxu1  ;;  %v609_v28 = vadd.f32 %v602_v25, %v543_v22  ;;  %v1115_v32 = vpop.f32.mrb[11].mxu0 }
 0x18f   : > { %v610_v31 = vadd.f32 %v605_v30, %v544_v26 }
 0x19a   : > { %v663_v33 = vpop.f32.mrb[8].mxu1 }
 0x19b   : > { %v670_v34 = vadd.f32 %v663_v33, %v609_v28  ;;  %v1122_v35 = vpop.f32.mrb[9].mxu1 }
 0x19c   : > { %v666_v36 = vpop.f32.mrb[10].mxu1 }
 0x19d   : > { %v671_v37 = vadd.f32 %v666_v36, %v610_v31  ;;  %v1123_v38 = vpop.f32.mrb[11].mxu1 }
 0x1a2   : > { %v724_v39 = vpop.f32.mrb[12].mxu0 }
 0x1a3   : > { %v731_v40 = vadd.f32 %v724_v39, %v670_v34  ;;  %v1130_v41 = vpop.f32.mrb[13].mxu0 }
 0x1a4   : > { %v727_v42 = vpop.f32.mrb[14].mxu0 }
 0x1a5   : > { %v732_v43 = vadd.f32 %v727_v42, %v671_v37  ;;  %v1131_v44 = vpop.f32.mrb[15].mxu0 }
 0x1ae   : > { %v785_v45 = vpop.f32.mrb[12].mxu1 }
 0x1af   : > { %v792_v46 = vadd.f32 %v785_v45, %v731_v40  ;;  %v1138_v47 = vpop.f32.mrb[13].mxu1 }
 0x1b0   : > { %v788_v50 = vpop.f32.mrb[14].mxu1 }
 0x1b1   : > { %v793_v52 = vadd.f32 %v788_v50, %v732_v43  ;;  %v1139_v54 = vpop.f32.mrb[15].mxu1 }
 0x1b2   : > { %v851_v49 = vpop.f32.mrb[16].mxu0 }
 0x1b3   : > { %v858_v51 = vadd.f32 %v851_v49, %v792_v46  ;;  %v1146_v53 = vpop.f32.mrb[17].mxu0 }
 0x1b4   : > { %v854_v55 = vpop.f32.mrb[18].mxu0 }
 0x1b5   : > { %v859_v57 = vadd.f32 %v854_v55, %v793_v52  ;;  %v1147_v58 = vpop.f32.mrb[19].mxu0  ;;  %v872_v59 = vadd.f32 %v865_v48, %v858_v51 }
 0x1b7   : > { %v874_v60 = vmul.f32 0.01, %v872_v59  ;;  %v873_v61 = vadd.f32 %v870_v56, %v859_v57 }
 0x1b9   : > { %v875_v62 = vmul.f32 0.01, %v873_v61  ;;  %v876_v63 = vmax.f32 %v872_v59, %v874_v60  ;;  %894 = sbr.rel (!%p1289_p5) target bundleno = 456 (0x1c8), region = 81 }
 0x1bb   : > { %v877_v0 = vmax.f32 %v873_v61, %v875_v62 }
 0x1bd   : > { %v1047_v1 = vpack.c.bf16 %v877_v0, %v876_v63 }
 0x1bf   : > { %1048 = vst [vmem:[%s259_s20] sm:$0xff] %v1047_v1  }
 0x1c6   : > { %v912_v2 = vld [vmem:[%s259_s20] sm:$0xf]  ;;  %v914_v3 = vld [vmem:[%s259_s20 + $0x4] sm:$0xf] }
 0x1c7   : > { %913 = vst [vmem:[%s896_s26] sm:$0xf] %v912_v2  ;;  %915 = vst [vmem:[%s896_s26 + $0x8] sm:$0xf] %v914_v3 }
 0x1c8 PF: > { %p11_p11 = scmp.ge.s32.totalorder %s1277_s19, 4   ;;  %s1418_s15 = smov %s1213_s16 }
 0x1c9   : > { %s1419_s16 = smov %s1287_s22  ;;  %s1420_s17 = smov %s1277_s19 }
 0x1ca   :  { %13 = sbr.rel (!%p11_p11) target bundleno = 2 (0x2), region = 156 }

// kernel: feature_net.15
= control target key start
LH: loop header
LB: loop body
LE: loop exit
PB: predicated region body
PF: predicated region fallthrough
CT: control target
= control target key end

     0   :  { %s1149_s15 = smov 0   ;;  %s1151_s16 = smov 0   ;;  %s1256_s0 = inlined_call_operand.vmem [shape: bf16[16,144], index: 0, kind: input, shape index: {}]   ;;  %s1257_s1 = inlined_call_operand.vmem [shape: bf16[16,384], index: 1, kind: input, shape index: {}]   ;;  %s1258_s2 = inlined_call_operand.vmem [shape: bf16[2,16,128], index: 2, kind: input, shape index: {}]   ;;  %s1259_s3 = inlined_call_operand.vmem [shape: f32[16,1], index: 3, kind: input, shape index: {}]   ;;  %s1260_s4 = inlined_call_operand.vmem [shape: bf16[16,256], index: 4, kind: output, shape index: {}]  }
   0x1   :  { %s1153_s17 = smov 0  }
   0x2 LB: > { %s1162_s18 = sadd.s32 4294967295, %s1104_s17   ;;  %s1164_s19 = sadd.s32 1, %s1104_s17   ;;  %s1104_s17 = sphi %s1153_s17, %s1264_s17   ;;  %s1100_s16 = sphi %s1151_s16, %s1263_s16   ;;  %s1096_s15 = sphi %s1149_s15, %s1262_s15  }
   0x3   : > { %s39_s20 = ssub.s32 %s1104_s17, %s1164_s19  ;;  %s42_s21 = sadd.s32 1, %s1100_s16 }
   0x4   : > { %p40_p0 = scmp.eq.s32.totalorder %s39_s20, 0  ;;  %p49_p1 = scmp.ne.s32.totalorder %s1100_s16, %s1096_s15 }
   0x5   : > { %p50_p2 = scmp.eq.s32.totalorder %s1104_s17, 0  ;;  %p126_p3 = scmp.eq.s32.totalorder %s1162_s18, 1 }
   0x6   : > { %s1172_s22 = scalar_select %p40_p0, %s1100_s16, %s42_s21  }
   0x7   : > { %p51_p4 = por %p50_p2, %p49_p1  ;;  %p1174_p5 = por %p126_p3, %p49_p1 }
   0x8   : > { %p927_p6 = scmp.ge.s32.totalorder %s1104_s17, 2 }
   0xa   : > { %154 = sbr.rel (%p927_p6) target bundleno = 24 (0x18), region = 24 }
  0x11   : > { %157 = sbr.rel (!%p51_p4) target bundleno = 24 (0x18), region = 28  ;;  %s159_s24 = sand.u32 (%p51_p4), 1, %s1100_s16  }
  0x12   : > { %s929_s25 = sshll.u32 (%p51_p4), %s1104_s17, 2  ;;  %s928_s26 = sshll.u32 (%p51_p4), %s159_s24, 3 }
  0x13   : > { %s163_s29 = scalar_lea.vmem (%p51_p4), %s1257_s1, %s929_s25  ;;  %s161_s30 = scalar_lea.vmem (%p51_p4), [#allocation3], %s928_s26 }
  0x14   : > { %v179_v0 = vld [vmem:[%s163_s29] sm:$0xf] (%p51_p4)  ;;  %v181_v1 = vld [vmem:[%s163_s29 + $0xc] sm:$0xf] (%p51_p4) }
  0x15   : > { %180 = vst [vmem:[%s161_s30] sm:$0xf] (%p51_p4), %v179_v0  ;;  %182 = vst [vmem:[%s161_s30 + $0x4] sm:$0xf] (%p51_p4), %v181_v1 }
  0x18 PF: > { %p930_p7 = scmp.ge.s32.totalorder %s1104_s17, 1  ;;  %p216_p8 = scmp.lt.s32.totalorder %s1104_s17, 3 }
  0x1a   : > { %p217_p9 = pnand %p930_p7, %p216_p8 }
  0x1b   : > { %v1078_v2 = vld [vmem:[%s1256_s0] ss:$8 sps:$4 sm:$0xff] (!%p217_p9)   ;;  %s223_s7 = sand.u32 (!%p217_p9), 1, %s1096_s15   ;;  %s1106_s8 = smov (!%p217_p9), 112   ;;  %v1107_v3 = vmov (!%p217_p9), 0.0   ;;  %vm1108_vm0 = vmmov (!%p217_p9), 0  }
  0x1c   : > { %220 = sbr.rel (%p217_p9) target bundleno = 430 (0x1ae), region = 73  ;;  %286 = vrot.lane.b32.xlu1 (!%p217_p9), %v1078_v2, %s1106_s8  ;;  %s1186_s9 = sshll.u32 (!%p217_p9), %s223_s7, 3  ;;  %980 = vmatprep.subr.bf16.mxu0 (!%p217_p9), %v1107_v3  ;;  %vm297_vm1 = vcmask (!%p217_p9), 130048   ;;  %v1121_v6 = vmov (!%p217_p9), 0   ;;  %v776_v7 = vld [vmem:[%s1259_s3] sm:$0xff] (!%p217_p9)  ;;  %v777_v8 = vld [vmem:[%s1259_s3 + $0x8] sm:$0xff] (!%p217_p9) }
  0x1d   : > { %986 = vmatprep.subr.bf16.mxu1 (!%p217_p9), %v1107_v3  ;;  %982 = vmatprep.mubr.msk.bf16.mxu0 (!%p217_p9), %vm1108_vm0, %v1107_v3  ;;  %s225_s10 = scalar_lea.vmem (!%p217_p9), [#allocation3], %s1186_s9  ;;  %p252_p10 = scmp.lt.s32.totalorder (!%p217_p9), %s1162_s18, 1  ;;  %vm294_vm2 = vcmask (!%p217_p9), 1039360   ;;  %vm392_vm3 = vcmask (!%p217_p9), 1031168   ;;  %vm447_vm4 = vcmask (!%p217_p9), 965632   ;;  %vm502_vm5 = vcmask (!%p217_p9), 957440  }
  0x1e   : > { %v1079_v4 = vld [vmem:[%s225_s10] sm:$0xff] (!%p217_p9)   ;;  %988 = vmatprep.mubr.msk.bf16.mxu1 (!%p217_p9), %vm1108_vm0, %v1107_v3  ;;  %s1109_s11 = smov (!%p217_p9), 127   ;;  %s1110_s12 = smov (!%p217_p9), 126   ;;  %1076 = vset.pattern.permute.xlu1 (!%p217_p9), %v1121_v6  ;;  %vm557_vm6 = vcmask (!%p217_p9), 949248   ;;  %vm612_vm7 = vcmask (!%p217_p9), 883712   ;;  %vm667_vm8 = vcmask (!%p217_p9), 875520  }
  0x1f   : > { %290 = vrot.lane.b32.xlu0 (!%p217_p9), %v1079_v4, %s1109_s11  ;;  %987 = vmatpush3.bf16.msra.mxu1 (!%p217_p9), %v1079_v4  ;;  %s1111_s21 = smov (!%p217_p9), 96   ;;  %s1112_s24 = smov (!%p217_p9), 118   ;;  %vm727_vm9 = vcmask (!%p217_p9), 867328   ;;  %v1081_v39 = vld [vmem:[%s1256_s0 + $0x4] ss:$8 sps:$4 sm:$0xff] (!%p217_p9)  }
  0x20   : > { %388 = vrot.lane.b32.xlu1 (!%p217_p9), %v1079_v4, %s1110_s12  ;;  %998 = vmatprep.subr.bf16.mxu1 (!%p217_p9), %v1107_v3  ;;  %s1113_s25 = smov (!%p217_p9), 117   ;;  %s1114_s26 = smov (!%p217_p9), 64  }
  0x21   : > { %s1115_s27 = smov (!%p217_p9), 116   ;;  %s1116_s28 = smov (!%p217_p9), 80   ;;  %1077 = vset.pattern.permute.xlu0 (!%p217_p9), %v1121_v6 }
  0x22   : > { %989 = vmatmul.mubr.msk.bf16.vlgmr.msra.gmra.mrb[0].mxu1 (!%p217_p9), %vm297_vm1, %v1078_v2  ;;  %s1117_s29 = smov (!%p217_p9), 108   ;;  %s1118_s30 = smov (!%p217_p9), 32  }
  0x23   : > { %s253_s13 = scalar_select %p252_p10, %s1162_s18, 1  ;;  %1000 = vmatprep.mubr.msk.bf16.mxu1 %vm1108_vm0, %v1107_v3 }
  0x24   : > { %386 = vrot.lane.b32.xlu1 %v1078_v2, %s1111_s21  ;;  %s1119_s5 = smov 107   ;;  %s1120_s6 = smov 48  }
  0x25   : > { %s954_s14 = sshll.u32 %s253_s13, 3  ;;  %s1122_s7 = smov 106  }
  0x26   : > { %s256_s20 = scalar_lea.vmem %s1258_s2, %s954_s14  ;;  %s251_s17 = scalar_lea.vmem [#allocation4], %s1186_s9 }
  0x27   : > { %v1080_v5 = vld [vmem:[%s256_s20] sm:$0xff]   ;;  %s951_s20 = sshll.u32 (%p1174_p5), %s1162_s18, 2 }
  0x28   : > { %292 = vrot.lane.b32.xlu0 %v1080_v5, %s1109_s11  ;;  %445 = vrot.lane.b32.xlu1 %v1080_v5, %s1112_s24  ;;  %s1123_s11 = smov 16  }
  0x2c   : > { %390 = vrot.lane.b32.xlu0 %v1080_v5, %s1110_s12  ;;  %500 = vrot.lane.b32.xlu1 %v1080_v5, %s1113_s25 }
  0x30   : > { %443 = vrot.lane.b32.xlu0 %v1079_v4, %s1112_s24  ;;  %496 = vrot.lane.b32.xlu1 %v1078_v2, %s1114_s26 }
  0x34   : > { %498 = vrot.lane.b32.xlu0 %v1079_v4, %s1113_s25  ;;  %555 = vrot.lane.b32.xlu1 %v1080_v5, %s1115_s27  ;;  %s812_s25 = scalar_lea.vmem (%p1174_p5), %s1260_s4, %s951_s20 }
  0x38   : > { %441 = vrot.lane.b32.xlu0 %v1078_v2, %s1116_s28  ;;  %610 = vrot.lane.b32.xlu1 %v1080_v5, %s1117_s29 }
  0x3c   : > { %553 = vrot.lane.b32.xlu0 %v1079_v4, %s1115_s27  ;;  %606 = vrot.lane.b32.xlu1 %v1078_v2, %s1118_s30 }
  0x40   : > { %608 = vrot.lane.b32.xlu0 %v1079_v4, %s1117_s29  ;;  %665 = vrot.lane.b32.xlu1 %v1080_v5, %s1119_s5 }
  0x44   : > { %551 = vrot.lane.b32.xlu0 %v1078_v2, %s1120_s6  ;;  %725 = vrot.lane.b32.xlu1 %v1080_v5, %s1122_s7 }
  0x48   : > { %663 = vrot.lane.b32.xlu0 %v1079_v4, %s1119_s5  ;;  %780 = vperm.xlu1 %1076, %v776_v7  }
  0x4c   : > { %723 = vrot.lane.b32.xlu0 %v1079_v4, %s1122_s7 }
  0x50   : > { %661 = vrot.lane.b32.xlu0 %v1078_v2, %s1123_s11 }
  0x54   : > { %785 = vperm.xlu0 %1077, %v777_v8  }
  0x8e   : > { %v287_v9 = vpop.permute.xlu1 %286 }
  0x91   : > { %v291_v10 = vpop.permute.xlu0 %290 }
  0x92   : > { %v389_v11 = vpop.permute.xlu1 %388 }
  0x96   : > { %v387_v12 = vpop.permute.xlu1 %386 }
  0x9a   : > { %v293_v13 = vpop.permute.xlu0 %292  ;;  %v446_v15 = vpop.permute.xlu1 %445 }
  0x9b   : > { %v295_v14 = vsel %vm294_vm2, %v291_v10, %v293_v13 }
  0x9c   : > { %981 = vmatpush3.bf16.msra.mxu0 %v295_v14 }
  0x9d   : > { %992 = vmatprep.subr.bf16.mxu0 %v1107_v3 }
  0x9e   : > { %v391_v16 = vpop.permute.xlu0 %390  ;;  %v501_v18 = vpop.permute.xlu1 %500 }
  0x9f   : > { %v393_v17 = vsel %vm392_vm3, %v389_v11, %v391_v16  ;;  %983 = vmatmul.mubr.msk.bf16.vlgmr.msra.gmra.mrb[0].mxu0 %vm297_vm1, %v287_v9 }
  0xa0   : > { %993 = vmatpush3.bf16.msra.mxu0 %v393_v17  ;;  %994 = vmatprep.mubr.msk.bf16.mxu0 %vm1108_vm0, %v1107_v3 }
  0xa1   : > { %1004 = vmatprep.subr.bf16.mxu0 %v1107_v3 }
  0xa2   : > { %v444_v19 = vpop.permute.xlu0 %443  ;;  %v497_v21 = vpop.permute.xlu1 %496 }
  0xa3   : > { %v448_v20 = vsel %vm447_vm4, %v444_v19, %v446_v15 }
  0xa4   : > { %999 = vmatpush3.bf16.msra.mxu1 %v448_v20 }
  0xa5   : > { %1010 = vmatprep.subr.bf16.mxu1 %v1107_v3 }
  0xa6   : > { %v499_v22 = vpop.permute.xlu0 %498  ;;  %v556_v24 = vpop.permute.xlu1 %555 }
  0xa7   : > { %v503_v23 = vsel %vm502_vm5, %v499_v22, %v501_v18  ;;  %995 = vmatmul.mubr.msk.bf16.vlgmr.msra.gmra.mrb[4].mxu0 %vm297_vm1, %v387_v12 }
  0xa8   : > { %1005 = vmatpush3.bf16.msra.mxu0 %v503_v23  ;;  %1006 = vmatprep.mubr.msk.bf16.mxu0 %vm1108_vm0, %v1107_v3 }
  0xa9   : > { %1016 = vmatprep.subr.bf16.mxu0 %v1107_v3 }
  0xaa   : > { %v442_v25 = vpop.permute.xlu0 %441  ;;  %v611_v26 = vpop.permute.xlu1 %610 }
  0xab   : > { %1001 = vmatmul.mubr.msk.bf16.vlgmr.msra.gmra.mrb[4].mxu1 %vm297_vm1, %v442_v25 }
  0xac   : > { %1012 = vmatprep.mubr.msk.bf16.mxu1 %vm1108_vm0, %v1107_v3 }
  0xae   : > { %v554_v27 = vpop.permute.xlu0 %553  ;;  %v607_v29 = vpop.permute.xlu1 %606 }
  0xaf   : > { %v558_v28 = vsel %vm557_vm6, %v554_v27, %v556_v24  ;;  %1007 = vmatmul.mubr.msk.bf16.vlgmr.msra.gmra.mrb[8].mxu0 %vm297_vm1, %v497_v21 }
  0xb0   : > { %1011 = vmatpush3.bf16.msra.mxu1 %v558_v28  ;;  %1018 = vmatprep.mubr.msk.bf16.mxu0 %vm1108_vm0, %v1107_v3 }
  0xb1   : > { %1022 = vmatprep.subr.bf16.mxu1 %v1107_v3 }
  0xb2   : > { %v609_v30 = vpop.permute.xlu0 %608  ;;  %v666_v33 = vpop.permute.xlu1 %665 }
  0xb3   : > { %v613_v31 = vsel %vm612_vm7, %v609_v30, %v611_v26 }
  0xb4   : > { %1017 = vmatpush3.bf16.msra.mxu0 %v613_v31 }
  0xb5   : > { %1028 = vmatprep.subr.bf16.mxu0 %v1107_v3 }
  0xb6   : > { %v552_v32 = vpop.permute.xlu0 %551  ;;  %v726_v36 = vpop.permute.xlu1 %725 }
  0xb7   : > { %1013 = vmatmul.mubr.msk.bf16.vlgmr.msra.gmra.mrb[8].mxu1 %vm297_vm1, %v552_v32  ;;  %1019 = vmatmul.mubr.msk.bf16.vlgmr.msra.gmra.mrb[12].mxu0 %vm297_vm1, %v607_v29 }
  0xb8   : > { %1024 = vmatprep.mubr.msk.bf16.mxu1 %vm1108_vm0, %v1107_v3  ;;  %1030 = vmatprep.mubr.msk.bf16.mxu0 %vm1108_vm0, %v1107_v3 }
  0xba   : > { %v664_v34 = vpop.permute.xlu0 %663 }
  0xbb   : > { %v668_v35 = vsel %vm667_vm8, %v664_v34, %v666_v33 }
  0xbc   : > { %1023 = vmatpush3.bf16.msra.mxu1 %v668_v35 }
  0xbe   : > { %v724_v37 = vpop.permute.xlu0 %723 }
  0xbf   : > { %v728_v38 = vsel %vm727_vm9, %v724_v37, %v726_v36 }
  0xc0   : > { %1029 = vmatpush3.bf16.msra.mxu0 %v728_v38 }
  0xc2   : > { %v662_v40 = vpop.permute.xlu0 %661 }
  0xc3   : > { %1025 = vmatmul.mubr.msk.bf16.vlgmr.msra.gmra.mrb[12].mxu1 %vm297_vm1, %v662_v40  ;;  %1031 = vmatmul.mubr.msk.bf16.vlgmr.msra.gmra.mrb[16].mxu0 %vm297_vm1, %v1081_v39 }
  0xc7   : > { %v781_v17 = vpop.permute.xlu1 %780 }
  0xd3   : > { %v786_v29 = vpop.permute.xlu0 %785 }
  0xf5   : > { %v379_v41 = vpop.f32.mrb[0].mxu1 }
  0xf6   : > { %v990_v42 = vpop.f32.mrb[1].mxu1 }
  0xf7   : > { %v382_v43 = vpop.f32.mrb[2].mxu1 }
  0xf8   : > { %v991_v44 = vpop.f32.mrb[3].mxu1 }
 0x172   : > { %v335_v45 = vpop.f32.mrb[0].mxu0 }
 0x173   : > { %v380_v46 = vadd.f32 %v379_v41, %v335_v45  ;;  %v984_v47 = vpop.f32.mrb[1].mxu0 }
 0x174   : > { %v338_v48 = vpop.f32.mrb[2].mxu0 }
 0x175   : > { %v383_v49 = vadd.f32 %v382_v43, %v338_v48  ;;  %v985_v50 = vpop.f32.mrb[3].mxu0 }
 0x17a   : > { %v432_v51 = vpop.f32.mrb[4].mxu0 }
 0x17b   : > { %v439_v52 = vadd.f32 %v432_v51, %v380_v46  ;;  %v996_v53 = vpop.f32.mrb[5].mxu0 }
 0x17c   : > { %v435_v54 = vpop.f32.mrb[6].mxu0 }
 0x17d   : > { %v440_v55 = vadd.f32 %v435_v54, %v383_v49  ;;  %v997_v56 = vpop.f32.mrb[7].mxu0 }
 0x17e   : > { %v487_v57 = vpop.f32.mrb[4].mxu1 }
 0x17f   : > { %v494_v58 = vadd.f32 %v487_v57, %v439_v52  ;;  %v1002_v59 = vpop.f32.mrb[5].mxu1 }
 0x180   : > { %v490_v60 = vpop.f32.mrb[6].mxu1 }
 0x181   : > { %v495_v61 = vadd.f32 %v490_v60, %v440_v55  ;;  %v1003_v62 = vpop.f32.mrb[7].mxu1 }
 0x182   : > { %v542_v63 = vpop.f32.mrb[8].mxu0 }
 0x183   : > { %v549_v0 = vadd.f32 %v542_v63, %v494_v58  ;;  %v1008_v1 = vpop.f32.mrb[9].mxu0 }
 0x184   : > { %v545_v2 = vpop.f32.mrb[10].mxu0 }
 0x185   : > { %v550_v3 = vadd.f32 %v545_v2, %v495_v61  ;;  %v1009_v4 = vpop.f32.mrb[11].mxu0 }
 0x18a   : > { %v597_v5 = vpop.f32.mrb[8].mxu1  ;;  %v652_v6 = vpop.f32.mrb[12].mxu0 }
 0x18b   : > { %v604_v7 = vadd.f32 %v597_v5, %v549_v0  ;;  %v1014_v8 = vpop.f32.mrb[9].mxu1  ;;  %v1020_v9 = vpop.f32.mrb[13].mxu0 }
 0x18c   : > { %v600_v10 = vpop.f32.mrb[10].mxu1  ;;  %v655_v11 = vpop.f32.mrb[14].mxu0 }
 0x18d   : > { %v659_v12 = vadd.f32 %v652_v6, %v604_v7  ;;  %v605_v13 = vadd.f32 %v600_v10, %v550_v3  ;;  %v1015_v14 = vpop.f32.mrb[11].mxu1  ;;  %v1021_v15 = vpop.f32.mrb[15].mxu0 }
 0x18f   : > { %v660_v16 = vadd.f32 %v655_v11, %v605_v13 }
 0x196   : > { %v707_v18 = vpop.f32.mrb[12].mxu1  ;;  %v767_v19 = vpop.f32.mrb[16].mxu0 }
 0x197   : > { %v714_v20 = vadd.f32 %v707_v18, %v659_v12  ;;  %v1026_v21 = vpop.f32.mrb[13].mxu1  ;;  %v1032_v22 = vpop.f32.mrb[17].mxu0 }
 0x198   : > { %v710_v23 = vpop.f32.mrb[14].mxu1  ;;  %v770_v24 = vpop.f32.mrb[18].mxu0 }
 0x199   : > { %v715_v25 = vadd.f32 %v710_v23, %v660_v16  ;;  %v774_v26 = vadd.f32 %v767_v19, %v714_v20  ;;  %v1027_v27 = vpop.f32.mrb[15].mxu1  ;;  %v1033_v28 = vpop.f32.mrb[19].mxu0 }
 0x19b   : > { %v788_v30 = vadd.f32 %v781_v17, %v774_v26  ;;  %v775_v31 = vadd.f32 %v770_v24, %v715_v25 }
 0x19d   : > { %v790_v32 = vmul.f32 0.01, %v788_v30  ;;  %v789_v33 = vadd.f32 %v786_v29, %v775_v31 }
 0x19f   : > { %v791_v34 = vmul.f32 0.01, %v789_v33  ;;  %v792_v35 = vmax.f32 %v788_v30, %v790_v32  ;;  %810 = sbr.rel (!%p1174_p5) target bundleno = 430 (0x1ae), region = 81 }
 0x1a1   : > { %v793_v36 = vmax.f32 %v789_v33, %v791_v34 }
 0x1a3   : > { %v960_v37 = vpack.c.bf16 %v793_v36, %v792_v35 }
 0x1a5   : > { %961 = vst [vmem:[%s251_s17] sm:$0xff] %v960_v37  }
 0x1ac   : > { %v828_v38 = vld [vmem:[%s251_s17] sm:$0xf]  ;;  %v830_v39 = vld [vmem:[%s251_s17 + $0x4] sm:$0xf] }
 0x1ad   : > { %829 = vst [vmem:[%s812_s25] sm:$0xf] %v828_v38  ;;  %831 = vst [vmem:[%s812_s25 + $0x8] sm:$0xf] %v830_v39 }
 0x1ae PF: > { %p11_p11 = scmp.ge.s32.totalorder %s1164_s19, 4   ;;  %s1262_s15 = smov %s1100_s16 }
 0x1af   : > { %s1263_s16 = smov %s1172_s22  ;;  %s1264_s17 = smov %s1164_s19 }
 0x1b0   :  { %13 = sbr.rel (!%p11_p11) target bundleno = 2 (0x2), region = 156 }

// kernel: feature_net.17
= control target key start
LH: loop header
LB: loop body
LE: loop exit
PB: predicated region body
PF: predicated region fallthrough
CT: control target
= control target key end

     0   :  { %s1332_s19 = smov 121   ;;  %vm222_vm0 = vcmask 523264   ;;  %s1334_s15 = smov 120   ;;  %vm549_vm1 = vcmask 990208   ;;  %vm213_vm2 = vcmask 1039360   ;;  %v1341_v36 = vmov 0   ;;  %s1649_s0 = inlined_call_operand.vmem [shape: bf16[32,576], index: 0, kind: input, shape index: {}]   ;;  %s1650_s1 = inlined_call_operand.vmem [shape: bf16[64,256], index: 1, kind: input, shape index: {}]   ;;  %s1651_s2 = inlined_call_operand.vmem [shape: bf16[1,64,128], index: 2, kind: input, shape index: {}]   ;;  %s1652_s3 = inlined_call_operand.vmem [shape: f32[32,1], index: 3, kind: input, shape index: {}]   ;;  %s1653_s4 = inlined_call_operand.vmem [shape: bf16[32,128], index: 4, kind: output, shape index: {}]  }
   0x1   :  { %v1370_v0 = vld [vmem:[%s1651_s2 + $0x8] sm:$0xff]   ;;  %v1375_v1 = vld [vmem:[%s1651_s2 + $0x10] sm:$0xff]   ;;  %v1382_v2 = vld [vmem:[%s1651_s2] sm:$0xff]   ;;  %s1335_s16 = smov 116   ;;  %s1336_s17 = smov 64   ;;  %1313 = vset.pattern.permute.xlu1 %v1341_v36  ;;  %1312 = vset.pattern.permute.xlu0 %v1341_v36  ;;  %vm637_vm3 = vcmask 982016  }
   0x2   :  { %539 = vrot.lane.b32.xlu1 %v1370_v0, %s1332_s19  ;;  %v32_v3 = vld [vmem:[%s1650_s1 + $0x10] sm:$0xf]  ;;  %v34_v4 = vld [vmem:[%s1650_s1 + $0x18] sm:$0xf]  ;;  %v28_v5 = vld [vmem:[%s1650_s1] sm:$0xf] }
   0x3   :  { %535 = vrot.lane.b32.xlu0 %v1382_v2, %s1332_s19  ;;  %33 = vst [vmem:[#allocation3 + $0x8] sm:$0xf] %v32_v3  ;;  %35 = vst [vmem:[#allocation3 + $0xc] sm:$0xf] %v34_v4  ;;  %v30_v6 = vld [vmem:[%s1650_s1 + $0x8] sm:$0xf] }
   0x4   :  { %29 = vst [vmem:[#allocation3] sm:$0xf] %v28_v5  ;;  %31 = vst [vmem:[#allocation3 + $0x4] sm:$0xf] %v30_v6  ;;  %v36_v7 = vld [vmem:[%s1650_s1 + $0x20] sm:$0xf] }
   0x5   :  { %v38_v8 = vld [vmem:[%s1650_s1 + $0x28] sm:$0xf]  ;;  %37 = vst [vmem:[#allocation3 + $0x10] sm:$0xf] %v36_v7  ;;  %v40_v9 = vld [vmem:[%s1650_s1 + $0x30] sm:$0xf] }
   0x6   :  { %543 = vrot.lane.b32.xlu1 %v1375_v1, %s1332_s19  ;;  %39 = vst [vmem:[#allocation3 + $0x14] sm:$0xf] %v38_v8  ;;  %v42_v10 = vld [vmem:[%s1650_s1 + $0x38] sm:$0xf]  ;;  %41 = vst [vmem:[#allocation3 + $0x18] sm:$0xf] %v40_v9 }
   0x7   :  { %43 = vst [vmem:[#allocation3 + $0x1c] sm:$0xf] %v42_v10  ;;  %v1421_v13 = vld [vmem:[%s1651_s2 + $0x18] sm:$0xff]   ;;  %s1333_s2 = smov 127   ;;  %v1460_v17 = vld [vmem:[%s1649_s0 + $0x30] ss:$20 sps:$4 sm:$0xff]  }
   0x8   :  { %v1322_v15 = vld [vmem:[%s1649_s0 + $0x8] ss:$20 sps:$4 sm:$0xff]   ;;  %v1466_v18 = vld [vmem:[%s1649_s0] ss:$20 sps:$4 sm:$0xff]   ;;  %s1337_s24 = smov 126   ;;  %s1338_s25 = smov 115  }
   0x9   :  { %1218 = vmatprep.mubr.msk.bf16.mxu0 %vm222_vm0, %v1322_v15  ;;  %v1475_v19 = vld [vmem:[%s1649_s0 + $0x28] ss:$20 sps:$4 sm:$0xff]   ;;  %s1339_s26 = smov 122   ;;  %s1340_s27 = smov 114   ;;  %v1519_v22 = vld [vmem:[%s1649_s0 + $0xc] ss:$20 sps:$4 sm:$0xff]  }
   0xa   :  { %v1412_v11 = vld [vmem:[#allocation3 + $0x8] sm:$0xff]   ;;  %v1563_v43 = vld [vmem:[%s1649_s0 + $0x4] ss:$20 sps:$4 sm:$0xff]   ;;  %v991_v48 = vld [vmem:[%s1652_s3 + $0x10] sm:$0xff]  ;;  %vm735_vm4 = vcmask 949248   ;;  %vm363_vm5 = vcmask 1031168  }
   0xb   :  { %v1414_v12 = vld [vmem:[#allocation3] sm:$0xff]   ;;  %537 = vrot.lane.b32.xlu1 %v1412_v11, %s1332_s19  ;;  %v1508_v20 = vld [vmem:[%s1649_s0 + $0x34] ss:$20 sps:$4 sm:$0xff]   ;;  %v992_v54 = vld [vmem:[%s1652_s3 + $0x18] sm:$0xff]  ;;  %vm823_vm6 = vcmask 941056   ;;  %vm451_vm7 = vcmask 998400  }
   0xc   :  { %533 = vrot.lane.b32.xlu0 %v1414_v12, %s1332_s19  ;;  %v1551_v39 = vld [vmem:[%s1649_s0 + $0x2c] ss:$20 sps:$4 sm:$0xff]   ;;  %vm921_vm8 = vcmask 932864  }
   0xd   :  { %v1425_v14 = vld [vmem:[#allocation3 + $0x10] sm:$0xff]   ;;  %v990_v44 = vld [vmem:[%s1652_s3 + $0x8] sm:$0xff]  ;;  %v989_v50 = vld [vmem:[%s1652_s3] sm:$0xff] }
   0xe   :  { %v1432_v16 = vld [vmem:[#allocation3 + $0x18] sm:$0xff]  }
   0xf   :  { %547 = vrot.lane.b32.xlu1 %v1421_v13, %s1332_s19 }
  0x10   :  { %541 = vrot.lane.b32.xlu0 %v1425_v14, %s1332_s19 }
  0x13   :  { %199 = vrot.lane.b32.xlu1 %v1382_v2, %s1333_s2 }
  0x14   :  { %545 = vrot.lane.b32.xlu0 %v1432_v16, %s1332_s19 }
  0x17   :  { %623 = vrot.lane.b32.xlu1 %v1382_v2, %s1334_s15 }
  0x18   :  { %197 = vrot.lane.b32.xlu0 %v1414_v12, %s1333_s2 }
  0x1b   :  { %203 = vrot.lane.b32.xlu1 %v1370_v0, %s1333_s2 }
  0x1c   :  { %621 = vrot.lane.b32.xlu0 %v1414_v12, %s1334_s15 }
  0x1f   :  { %627 = vrot.lane.b32.xlu1 %v1370_v0, %s1334_s15 }
  0x20   :  { %201 = vrot.lane.b32.xlu0 %v1412_v11, %s1333_s2 }
  0x23   :  { %207 = vrot.lane.b32.xlu1 %v1375_v1, %s1333_s2 }
  0x24   :  { %625 = vrot.lane.b32.xlu0 %v1412_v11, %s1334_s15 }
  0x27   :  { %631 = vrot.lane.b32.xlu1 %v1375_v1, %s1334_s15 }
  0x28   :  { %205 = vrot.lane.b32.xlu0 %v1425_v14, %s1333_s2 }
  0x2b   :  { %211 = vrot.lane.b32.xlu1 %v1421_v13, %s1333_s2 }
  0x2c   :  { %629 = vrot.lane.b32.xlu0 %v1425_v14, %s1334_s15 }
  0x2f   :  { %635 = vrot.lane.b32.xlu1 %v1421_v13, %s1334_s15 }
  0x30   :  { %209 = vrot.lane.b32.xlu0 %v1432_v16, %s1333_s2 }
  0x33   :  { %721 = vrot.lane.b32.xlu1 %v1382_v2, %s1335_s16 }
  0x34   :  { %633 = vrot.lane.b32.xlu0 %v1432_v16, %s1334_s15 }
  0x37   :  { %617 = vrot.lane.b32.xlu1 %v1322_v15, %s1336_s17 }
  0x38   :  { %719 = vrot.lane.b32.xlu0 %v1414_v12, %s1335_s16 }
  0x3b   :  { %619 = vrot.lane.b32.xlu1 %v1460_v17, %s1336_s17 }
  0x3c   :  { %185 = vrot.lane.b32.xlu0 %v1466_v18, %s1336_s17 }
  0x3f   :  { %725 = vrot.lane.b32.xlu1 %v1370_v0, %s1335_s16 }
  0x40   :  { %187 = vrot.lane.b32.xlu0 %v1475_v19, %s1336_s17 }
  0x43   :  { %729 = vrot.lane.b32.xlu1 %v1375_v1, %s1335_s16 }
  0x44   :  { %723 = vrot.lane.b32.xlu0 %v1412_v11, %s1335_s16 }
  0x47   :  { %733 = vrot.lane.b32.xlu1 %v1421_v13, %s1335_s16 }
  0x48   :  { %727 = vrot.lane.b32.xlu0 %v1425_v14, %s1335_s16 }
  0x4b   :  { %349 = vrot.lane.b32.xlu1 %v1382_v2, %s1337_s24 }
  0x4c   :  { %731 = vrot.lane.b32.xlu0 %v1432_v16, %s1335_s16 }
  0x4f   :  { %809 = vrot.lane.b32.xlu1 %v1382_v2, %s1338_s25 }
  0x50   :  { %347 = vrot.lane.b32.xlu0 %v1414_v12, %s1337_s24 }
  0x53   :  { %353 = vrot.lane.b32.xlu1 %v1370_v0, %s1337_s24 }
  0x54   :  { %807 = vrot.lane.b32.xlu0 %v1414_v12, %s1338_s25 }
  0x57   :  { %813 = vrot.lane.b32.xlu1 %v1370_v0, %s1338_s25 }
  0x58   :  { %351 = vrot.lane.b32.xlu0 %v1412_v11, %s1337_s24 }
  0x5b   :  { %357 = vrot.lane.b32.xlu1 %v1375_v1, %s1337_s24 }
  0x5c   :  { %811 = vrot.lane.b32.xlu0 %v1412_v11, %s1338_s25 }
  0x5f   :  { %817 = vrot.lane.b32.xlu1 %v1375_v1, %s1338_s25 }
  0x60   :  { %355 = vrot.lane.b32.xlu0 %v1425_v14, %s1337_s24 }
  0x63   :  { %361 = vrot.lane.b32.xlu1 %v1421_v13, %s1337_s24 }
  0x64   :  { %815 = vrot.lane.b32.xlu0 %v1425_v14, %s1338_s25 }
  0x67   :  { %821 = vrot.lane.b32.xlu1 %v1421_v13, %s1338_s25 }
  0x68   :  { %359 = vrot.lane.b32.xlu0 %v1432_v16, %s1337_s24 }
  0x6b   :  { %437 = vrot.lane.b32.xlu1 %v1382_v2, %s1339_s26 }
  0x6c   :  { %819 = vrot.lane.b32.xlu0 %v1432_v16, %s1338_s25 }
  0x6f   :  { %907 = vrot.lane.b32.xlu1 %v1382_v2, %s1340_s27 }
  0x70   :  { %435 = vrot.lane.b32.xlu0 %v1414_v12, %s1339_s26 }
  0x73   :  { %805 = vrot.lane.b32.xlu1 %v1508_v20, %s1336_s17 }
  0x74   :  { %v540_v21 = vpop.permute.xlu1 %539  ;;  %905 = vrot.lane.b32.xlu0 %v1414_v12, %s1340_s27 }
  0x75   :  { %v536_v24 = vpop.permute.xlu0 %535 }
  0x77   :  { %441 = vrot.lane.b32.xlu1 %v1370_v0, %s1339_s26 }
  0x78   :  { %v544_v23 = vpop.permute.xlu1 %543  ;;  %803 = vrot.lane.b32.xlu0 %v1519_v22, %s1336_s17 }
  0x7b   :  { %911 = vrot.lane.b32.xlu1 %v1370_v0, %s1340_s27 }
  0x7c   :  { %439 = vrot.lane.b32.xlu0 %v1412_v11, %s1339_s26 }
  0x7d   :  { %v538_v25 = vpop.permute.xlu1 %537 }
  0x7e   :  { %v534_v26 = vpop.permute.xlu0 %533  ;;  %v551_v29 = vsel %vm549_vm1, %v538_v25, %v540_v21 }
  0x7f   :  { %v550_v27 = vsel %vm549_vm1, %v534_v26, %v536_v24  ;;  %445 = vrot.lane.b32.xlu1 %v1375_v1, %s1339_s26 }
  0x80   :  { %909 = vrot.lane.b32.xlu0 %v1412_v11, %s1340_s27  ;;  %1210 = vmatprep.subr.bf16.mxu0 %v550_v27 }
  0x81   :  { %1211 = vmatpush3.bf16.msra.mxu0 %v550_v27  ;;  %v548_v28 = vpop.permute.xlu1 %547 }
  0x82   :  { %1212 = vmatprep.subr.bf16.mxu0 %v551_v29  ;;  %v542_v30 = vpop.permute.xlu0 %541 }
  0x83   :  { %915 = vrot.lane.b32.xlu1 %v1375_v1, %s1340_s27  ;;  %v552_v32 = vsel %vm549_vm1, %v542_v30, %v544_v23 }
  0x84   :  { %443 = vrot.lane.b32.xlu0 %v1425_v14, %s1339_s26 }
  0x85   :  { %1213 = vmatpush3.bf16.msra.mxu0 %v551_v29  ;;  %v200_v31 = vpop.permute.xlu1 %199 }
  0x86   :  { %1214 = vmatprep.subr.bf16.mxu0 %v552_v32  ;;  %v546_v33 = vpop.permute.xlu0 %545 }
  0x87   :  { %449 = vrot.lane.b32.xlu1 %v1421_v13, %s1339_s26  ;;  %v553_v35 = vsel %vm549_vm1, %v546_v33, %v548_v28 }
  0x88   :  { %913 = vrot.lane.b32.xlu0 %v1425_v14, %s1340_s27 }
  0x89   :  { %1215 = vmatpush3.bf16.msra.mxu0 %v552_v32  ;;  %v624_v34 = vpop.permute.xlu1 %623 }
  0x8a   :  { %1216 = vmatprep.subr.bf16.mxu0 %v553_v35  ;;  %v198_v37 = vpop.permute.xlu0 %197 }
  0x8b   :  { %v214_v38 = vsel %vm213_vm2, %v198_v37, %v200_v31  ;;  %919 = vrot.lane.b32.xlu1 %v1421_v13, %s1340_s27 }
  0x8c   :  { %447 = vrot.lane.b32.xlu0 %v1432_v16, %s1339_s26  ;;  %1162 = vmatprep.subr.bf16.mxu1 %v214_v38 }
  0x8d   :  { %1163 = vmatpush3.bf16.msra.mxu1 %v214_v38  ;;  %1217 = vmatpush3.bf16.msra.mxu0 %v553_v35  ;;  %v204_v40 = vpop.permute.xlu1 %203 }
  0x8e   :  { %v622_v41 = vpop.permute.xlu0 %621 }
  0x8f   :  { %v638_v42 = vsel %vm637_vm3, %v622_v41, %v624_v34  ;;  %433 = vrot.lane.b32.xlu1 %v1551_v39, %s1336_s17 }
  0x90   :  { %917 = vrot.lane.b32.xlu0 %v1432_v16, %s1340_s27  ;;  %1222 = vmatprep.subr.bf16.mxu0 %v638_v42 }
  0x91   :  { %1219 = vmatmul.mubr.msk.bf16.vlgmr.msra.gmra.mrb[0].mxu0 %vm222_vm0, %v1460_v17  ;;  %v628_v45 = vpop.permute.xlu1 %627 }
  0x92   :  { %1223 = vmatpush3.bf16.msra.mxu0 %v638_v42  ;;  %v202_v46 = vpop.permute.xlu0 %201 }
  0x93   :  { %v215_v47 = vsel %vm213_vm2, %v202_v46, %v204_v40  ;;  %1000 = vperm.xlu1 %1313, %v990_v44  }
  0x94   :  { %431 = vrot.lane.b32.xlu0 %v1563_v43, %s1336_s17  ;;  %1164 = vmatprep.subr.bf16.mxu1 %v215_v47 }
  0x95   :  { %1165 = vmatpush3.bf16.msra.mxu1 %v215_v47  ;;  %v208_v49 = vpop.permute.xlu1 %207 }
  0x96   :  { %v626_v51 = vpop.permute.xlu0 %625 }
  0x97   :  { %v639_v52 = vsel %vm637_vm3, %v626_v51, %v628_v45  ;;  %1005 = vperm.xlu1 %1313, %v991_v48  }
  0x98   :  { %1224 = vmatprep.subr.bf16.mxu0 %v639_v52  ;;  %995 = vperm.xlu0 %1312, %v989_v50   ;;  %v1330_v50 = vld [vmem:[%s1649_s0 + $0x10] ss:$20 sps:$4 sm:$0xff]  }
  0x99   :  { %1225 = vmatpush3.bf16.msra.mxu0 %v639_v52  ;;  %v632_v53 = vpop.permute.xlu1 %631 }
  0x9a   :  { %v206_v55 = vpop.permute.xlu0 %205 }
  0x9b   :  { %v216_v56 = vsel %vm213_vm2, %v206_v55, %v208_v49 }
  0x9c   :  { %1166 = vmatprep.subr.bf16.mxu1 %v216_v56  ;;  %1010 = vperm.xlu0 %1312, %v992_v54  }
  0x9d   :  { %1167 = vmatpush3.bf16.msra.mxu1 %v216_v56  ;;  %v212_v57 = vpop.permute.xlu1 %211 }
  0x9e   :  { %v630_v58 = vpop.permute.xlu0 %629 }
  0x9f   :  { %v640_v59 = vsel %vm637_vm3, %v630_v58, %v632_v53 }
  0xa0   :  { %1226 = vmatprep.subr.bf16.mxu0 %v640_v59 }
  0xa1   :  { %1227 = vmatpush3.bf16.msra.mxu0 %v640_v59  ;;  %v636_v60 = vpop.permute.xlu1 %635 }
  0xa2   :  { %v210_v61 = vpop.permute.xlu0 %209 }
  0xa3   :  { %v217_v62 = vsel %vm213_vm2, %v210_v61, %v212_v57 }
  0xa4   :  { %1168 = vmatprep.subr.bf16.mxu1 %v217_v62 }
  0xa5   :  { %1169 = vmatpush3.bf16.msra.mxu1 %v217_v62  ;;  %v722_v63 = vpop.permute.xlu1 %721 }
  0xa6   :  { %v634_v0 = vpop.permute.xlu0 %633  ;;  %1174 = vmatprep.subr.bf16.mxu1 %v1414_v12 }
  0xa7   :  { %v641_v1 = vsel %vm637_vm3, %v634_v0, %v636_v60 }
  0xa8   :  { %1228 = vmatprep.subr.bf16.mxu0 %v641_v1 }
  0xa9   :  { %1229 = vmatpush3.bf16.msra.mxu0 %v641_v1  ;;  %v618_v2 = vpop.permute.xlu1 %617 }
  0xaa   :  { %v720_v3 = vpop.permute.xlu0 %719  ;;  %1230 = vmatprep.mubr.msk.bf16.mxu0 %vm222_vm0, %v618_v2 }
  0xab   :  { %v736_v4 = vsel %vm735_vm4, %v720_v3, %v722_v63 }
  0xac   :  { %1234 = vmatprep.subr.bf16.mxu0 %v736_v4 }
  0xad   :  { %v620_v5 = vpop.permute.xlu1 %619 }
  0xae   :  { %v186_v6 = vpop.permute.xlu0 %185  ;;  %1231 = vmatmul.mubr.msk.bf16.vlgmr.msra.gmra.mrb[0].mxu0 %vm222_vm0, %v620_v5 }
  0xaf   :  { %1170 = vmatprep.mubr.msk.bf16.mxu1 %vm222_vm0, %v186_v6  ;;  %1235 = vmatpush3.bf16.msra.mxu0 %v736_v4  ;;  %v1331_v4 = vld [vmem:[%s1649_s0 + $0x38] ss:$20 sps:$4 sm:$0xff]  }
  0xb0   :  { %1242 = vmatprep.mubr.msk.bf16.mxu0 %vm222_vm0, %v1519_v22 }
  0xb1   :  { %v726_v7 = vpop.permute.xlu1 %725 }
  0xb2   :  { %v188_v8 = vpop.permute.xlu0 %187 }
  0xb3   :  { %1171 = vmatmul.mubr.msk.bf16.vlgmr.msra.gmra.mrb[0].mxu1 %vm222_vm0, %v188_v8 }
  0xb4   :  { %1175 = vmatpush3.bf16.msra.mxu1 %v1414_v12  ;;  %1182 = vmatprep.mubr.msk.bf16.mxu1 %vm222_vm0, %v1466_v18 }
  0xb5   :  { %1176 = vmatprep.subr.bf16.mxu1 %v1412_v11  ;;  %v730_v9 = vpop.permute.xlu1 %729 }
  0xb6   :  { %v724_v10 = vpop.permute.xlu0 %723 }
  0xb7   :  { %v737_v13 = vsel %vm735_vm4, %v724_v10, %v726_v7 }
  0xb8   :  { %1236 = vmatprep.subr.bf16.mxu0 %v737_v13  ;;  %1177 = vmatpush3.bf16.msra.mxu1 %v1412_v11 }
  0xb9   :  { %1237 = vmatpush3.bf16.msra.mxu0 %v737_v13  ;;  %1178 = vmatprep.subr.bf16.mxu1 %v1425_v14  ;;  %v734_v15 = vpop.permute.xlu1 %733 }
  0xba   :  { %v728_v17 = vpop.permute.xlu0 %727 }
  0xbb   :  { %v738_v21 = vsel %vm735_vm4, %v728_v17, %v730_v9 }
  0xbc   :  { %1238 = vmatprep.subr.bf16.mxu0 %v738_v21  ;;  %1179 = vmatpush3.bf16.msra.mxu1 %v1425_v14 }
  0xbd   :  { %1239 = vmatpush3.bf16.msra.mxu0 %v738_v21  ;;  %1180 = vmatprep.subr.bf16.mxu1 %v1432_v16  ;;  %v350_v12 = vpop.permute.xlu1 %349 }
  0xbe   :  { %v732_v18 = vpop.permute.xlu0 %731 }
  0xbf   :  { %v739_v22 = vsel %vm735_vm4, %v732_v18, %v734_v15 }
  0xc0   :  { %1240 = vmatprep.subr.bf16.mxu0 %v739_v22  ;;  %1181 = vmatpush3.bf16.msra.mxu1 %v1432_v16 }
  0xc1   :  { %1241 = vmatpush3.bf16.msra.mxu0 %v739_v22  ;;  %v810_v11 = vpop.permute.xlu1 %809 }
  0xc2   :  { %v348_v23 = vpop.permute.xlu0 %347 }
  0xc3   :  { %v364_v24 = vsel %vm363_vm5, %v348_v23, %v350_v12  ;;  %1183 = vmatmul.mubr.msk.bf16.vlgmr.msra.gmra.mrb[0].mxu1 %vm222_vm0, %v1475_v19 }
  0xc4   :  { %1186 = vmatprep.subr.bf16.mxu1 %v364_v24  ;;  %1243 = vmatmul.mubr.msk.bf16.vlgmr.msra.gmra.mrb[0].mxu0 %vm222_vm0, %v1508_v20 }
  0xc5   :  { %1187 = vmatpush3.bf16.msra.mxu1 %v364_v24  ;;  %v354_v14 = vpop.permute.xlu1 %353  ;;  %1194 = vmatprep.mubr.msk.bf16.mxu1 %vm222_vm0, %v1563_v43 }
  0xc6   :  { %v808_v16 = vpop.permute.xlu0 %807 }
  0xc7   :  { %v824_v25 = vsel %vm823_vm6, %v808_v16, %v810_v11 }
  0xc8   :  { %1246 = vmatprep.subr.bf16.mxu0 %v824_v25 }
  0xc9   :  { %1247 = vmatpush3.bf16.msra.mxu0 %v824_v25  ;;  %v814_v26 = vpop.permute.xlu1 %813 }
  0xca   :  { %v352_v27 = vpop.permute.xlu0 %351 }
  0xcb   :  { %v365_v28 = vsel %vm363_vm5, %v352_v27, %v354_v14 }
  0xcc   :  { %1188 = vmatprep.subr.bf16.mxu1 %v365_v28 }
  0xcd   :  { %1189 = vmatpush3.bf16.msra.mxu1 %v365_v28  ;;  %v358_v19 = vpop.permute.xlu1 %357 }
  0xce   :  { %v812_v29 = vpop.permute.xlu0 %811 }
  0xcf   :  { %v825_v20 = vsel %vm823_vm6, %v812_v29, %v814_v26 }
  0xd0   :  { %1248 = vmatprep.subr.bf16.mxu0 %v825_v20 }
  0xd1   :  { %1249 = vmatpush3.bf16.msra.mxu0 %v825_v20  ;;  %v818_v30 = vpop.permute.xlu1 %817 }
  0xd2   :  { %v356_v31 = vpop.permute.xlu0 %355 }
  0xd3   :  { %v366_v32 = vsel %vm363_vm5, %v356_v31, %v358_v19 }
  0xd4   :  { %1190 = vmatprep.subr.bf16.mxu1 %v366_v32 }
  0xd5   :  { %1191 = vmatpush3.bf16.msra.mxu1 %v366_v32  ;;  %v362_v33 = vpop.permute.xlu1 %361 }
  0xd6   :  { %v816_v34 = vpop.permute.xlu0 %815 }
  0xd7   :  { %v826_v35 = vsel %vm823_vm6, %v816_v34, %v818_v30 }
  0xd8   :  { %1250 = vmatprep.subr.bf16.mxu0 %v826_v35 }
  0xd9   :  { %1251 = vmatpush3.bf16.msra.mxu0 %v826_v35  ;;  %v822_v36 = vpop.permute.xlu1 %821 }
  0xda   :  { %v360_v37 = vpop.permute.xlu0 %359 }
  0xdb   :  { %v367_v38 = vsel %vm363_vm5, %v360_v37, %v362_v33 }
  0xdc   :  { %1192 = vmatprep.subr.bf16.mxu1 %v367_v38 }
  0xdd   :  { %1193 = vmatpush3.bf16.msra.mxu1 %v367_v38  ;;  %v438_v40 = vpop.permute.xlu1 %437 }
  0xde   :  { %v820_v41 = vpop.permute.xlu0 %819 }
  0xdf   :  { %v827_v42 = vsel %vm823_vm6, %v820_v41, %v822_v36 }
  0xe0   :  { %1252 = vmatprep.subr.bf16.mxu0 %v827_v42  ;;  %1195 = vmatmul.mubr.msk.bf16.vlgmr.msra.gmra.mrb[0].mxu1 %vm222_vm0, %v1551_v39 }
  0xe1   :  { %1253 = vmatpush3.bf16.msra.mxu0 %v827_v42  ;;  %v908_v43 = vpop.permute.xlu1 %907 }
  0xe2   :  { %v436_v44 = vpop.permute.xlu0 %435 }
  0xe3   :  { %v452_v45 = vsel %vm451_vm7, %v436_v44, %v438_v40 }
  0xe4   :  { %1198 = vmatprep.subr.bf16.mxu1 %v452_v45 }
  0xe5   :  { %1199 = vmatpush3.bf16.msra.mxu1 %v452_v45  ;;  %v806_v46 = vpop.permute.xlu1 %805 }
  0xe6   :  { %v906_v47 = vpop.permute.xlu0 %905 }
  0xe7   :  { %v922_v48 = vsel %vm921_vm8, %v906_v47, %v908_v43 }
  0xe8   :  { %1258 = vmatprep.subr.bf16.mxu0 %v922_v48 }
  0xe9   :  { %v442_v49 = vpop.permute.xlu1 %441 }
  0xea   :  { %v804_v51 = vpop.permute.xlu0 %803 }
  0xeb   :  { %1254 = vmatprep.mubr.msk.bf16.mxu0 %vm222_vm0, %v804_v51 }
  0xec   :  { %1255 = vmatmul.mubr.msk.bf16.vlgmr.msra.gmra.mrb[0].mxu0 %vm222_vm0, %v806_v46 }
  0xed   :  { %1259 = vmatpush3.bf16.msra.mxu0 %v922_v48  ;;  %v912_v39 = vpop.permute.xlu1 %911  ;;  %1266 = vmatprep.mubr.msk.bf16.mxu0 %vm222_vm0, %v1330_v50 }
  0xee   :  { %v440_v52 = vpop.permute.xlu0 %439 }
  0xef   :  { %v453_v53 = vsel %vm451_vm7, %v440_v52, %v442_v49 }
  0xf0   :  { %1200 = vmatprep.subr.bf16.mxu1 %v453_v53 }
  0xf1   :  { %1201 = vmatpush3.bf16.msra.mxu1 %v453_v53  ;;  %v446_v54 = vpop.permute.xlu1 %445 }
  0xf2   :  { %v910_v55 = vpop.permute.xlu0 %909 }
  0xf3   :  { %v923_v56 = vsel %vm921_vm8, %v910_v55, %v912_v39 }
  0xf4   :  { %1260 = vmatprep.subr.bf16.mxu0 %v923_v56 }
  0xf5   :  { %1261 = vmatpush3.bf16.msra.mxu0 %v923_v56  ;;  %v916_v57 = vpop.permute.xlu1 %915 }
  0xf6   :  { %v444_v58 = vpop.permute.xlu0 %443 }
  0xf7   :  { %v454_v59 = vsel %vm451_vm7, %v444_v58, %v446_v54 }
  0xf8   :  { %1202 = vmatprep.subr.bf16.mxu1 %v454_v59 }
  0xf9   :  { %1203 = vmatpush3.bf16.msra.mxu1 %v454_v59  ;;  %v450_v60 = vpop.permute.xlu1 %449 }
  0xfa   :  { %v914_v61 = vpop.permute.xlu0 %913 }
  0xfb   :  { %v924_v62 = vsel %vm921_vm8, %v914_v61, %v916_v57 }
  0xfc   :  { %1262 = vmatprep.subr.bf16.mxu0 %v924_v62 }
  0xfd   :  { %1263 = vmatpush3.bf16.msra.mxu0 %v924_v62  ;;  %v920_v1 = vpop.permute.xlu1 %919 }
  0xfe   :  { %v448_v63 = vpop.permute.xlu0 %447 }
  0xff   :  { %v455_v0 = vsel %vm451_vm7, %v448_v63, %v450_v60 }
 0x100   :  { %1204 = vmatprep.subr.bf16.mxu1 %v455_v0 }
 0x101   :  { %1205 = vmatpush3.bf16.msra.mxu1 %v455_v0  ;;  %v434_v5 = vpop.permute.xlu1 %433 }
 0x102   :  { %v918_v2 = vpop.permute.xlu0 %917 }
 0x103   :  { %v925_v3 = vsel %vm921_vm8, %v918_v2, %v920_v1 }
 0x104   :  { %1264 = vmatprep.subr.bf16.mxu0 %v925_v3 }
 0x105   :  { %1265 = vmatpush3.bf16.msra.mxu0 %v925_v3 }
 0x106   :  { %v432_v6 = vpop.permute.xlu0 %431 }
 0x107   :  { %1206 = vmatprep.mubr.msk.bf16.mxu1 %vm222_vm0, %v432_v6 }
 0x108   :  { %1207 = vmatmul.mubr.msk.bf16.vlgmr.msra.gmra.mrb[0].mxu1 %vm222_vm0, %v434_v5  ;;  %1267 = vmatmul.mubr.msk.bf16.vlgmr.msra.gmra.mrb[0].mxu0 %vm222_vm0, %v1331_v4 }
 0x112   :  { %v1001_v7 = vpop.permute.xlu1 %1000 }
 0x116   :  { %v1006_v9 = vpop.permute.xlu1 %1005 }
 0x117   :  { %v996_v8 = vpop.permute.xlu0 %995 }
 0x11b   :  { %v1011_v25 = vpop.permute.xlu0 %1010 }
 0x1db   :  { %v1208_v10 = vpop.f32.mrb[0].mxu1  ;;  %v1268_v13 = vpop.f32.mrb[0].mxu0 }
 0x1dc   :  { %v1270_v15 = vadd.f32 %v1268_v13, %v1208_v10  ;;  %v500_v17 = vpop.f32.mrb[1].mxu1  ;;  %v970_v21 = vpop.f32.mrb[1].mxu0 }
 0x1dd   :  { %v1271_v12 = vadd.f32 %v970_v21, %v500_v17  ;;  %v1209_v18 = vpop.f32.mrb[2].mxu1  ;;  %v1269_v22 = vpop.f32.mrb[2].mxu0 }
 0x1de   :  { %v1015_v11 = vadd.f32 %v1270_v15, %v1006_v9  ;;  %v1272_v23 = vadd.f32 %v1269_v22, %v1209_v18  ;;  %v503_v24 = vpop.f32.mrb[3].mxu1  ;;  %v973_v14 = vpop.f32.mrb[3].mxu0 }
 0x1df   :  { %v1013_v16 = vadd.f32 %v1271_v12, %v996_v8  ;;  %v1273_v26 = vadd.f32 %v973_v14, %v503_v24 }
 0x1e0   :  { %v1019_v27 = vmul.f32 0.01, %v1015_v11  ;;  %v1016_v28 = vadd.f32 %v1272_v23, %v1011_v25 }
 0x1e1   :  { %v1017_v19 = vmul.f32 0.01, %v1013_v16  ;;  %v1014_v29 = vadd.f32 %v1273_v26, %v1001_v7 }
 0x1e2   :  { %v1020_v20 = vmul.f32 0.01, %v1016_v28  ;;  %v1023_v31 = vmax.f32 %v1015_v11, %v1019_v27 }
 0x1e3   :  { %v1018_v30 = vmul.f32 0.01, %v1014_v29  ;;  %v1021_v33 = vmax.f32 %v1013_v16, %v1017_v19 }
 0x1e4   :  { %v1024_v32 = vmax.f32 %v1016_v28, %v1020_v20 }
 0x1e5   :  { %v1022_v34 = vmax.f32 %v1014_v29, %v1018_v30 }
 0x1e6   :  { %v1105_v35 = vpack.c.bf16 %v1024_v32, %v1023_v31 }
 0x1e7   :  { %v1100_v36 = vpack.c.bf16 %v1022_v34, %v1021_v33 }
 0x1e8   :  { %1107 = vst [vmem:[%s1653_s4 + $0x8] sm:$0xff] %v1105_v35  }
 0x1e9   :  { %1101 = vst [vmem:[%s1653_s4] sm:$0xff] %v1100_v36  }

// kernel: feature_net.19
= control target key start
LH: loop header
LB: loop body
LE: loop exit
PB: predicated region body
PF: predicated region fallthrough
CT: control target
= control target key end

     0   :  { %s1170_s25 = smov 121   ;;  %s1171_s9 = smov 127   ;;  %vm154_vm0 = vcmask 261120   ;;  %v1181_v12 = vmov 0   ;;  %vm439_vm1 = vcmask 990208   ;;  %vm149_vm2 = vcmask 1039360   ;;  %s1371_s0 = inlined_call_operand.vmem [shape: bf16[32,288], index: 0, kind: input, shape index: {}]   ;;  %s1372_s1 = inlined_call_operand.vmem [shape: bf16[32,256], index: 1, kind: input, shape index: {}]   ;;  %s1373_s2 = inlined_call_operand.vmem [shape: bf16[1,32,128], index: 2, kind: input, shape index: {}]   ;;  %s1374_s3 = inlined_call_operand.vmem [shape: f32[32,1], index: 3, kind: input, shape index: {}]   ;;  %s1375_s4 = inlined_call_operand.vmem [shape: bf16[32,32], index: 4, kind: input, shape index: {}]   ;;  %s1376_s5 = inlined_call_operand.vmem [shape: f32[32,1], index: 5, kind: input, shape index: {}]   ;;  %s1377_s6 = inlined_call_operand.vmem [shape: f32[32,128], index: 6, kind: output, shape index: {}]  }
   0x1   :  { %v1220_v0 = vld [vmem:[%s1373_s2 + $0x8] sm:$0xff]   ;;  %v1159_v1 = vld [vmem:[%s1373_s2] sm:$0xff]   ;;  %v34_v2 = vld [vmem:[%s1372_s1 + $0x10] sm:$0xf]  ;;  %s1172_s12 = smov 120   ;;  %s1174_s19 = smov 116   ;;  %1157 = vset.pattern.permute.xlu1 %v1181_v12  ;;  %1156 = vset.pattern.permute.xlu0 %v1181_v12 }
   0x2   :  { %437 = vrot.lane.b32.xlu1 %v1220_v0, %s1170_s25  ;;  %v36_v3 = vld [vmem:[%s1372_s1 + $0x18] sm:$0xf]  ;;  %v30_v4 = vld [vmem:[%s1372_s1] sm:$0xf]  ;;  %433 = vrot.lane.b32.xlu0 %v1159_v1, %s1170_s25  ;;  %35 = vst [vmem:[#allocation3 + $0x8] sm:$0xf] %v34_v2 }
   0x3   :  { %37 = vst [vmem:[#allocation3 + $0xc] sm:$0xf] %v36_v3  ;;  %31 = vst [vmem:[#allocation3] sm:$0xf] %v30_v4  ;;  %v32_v5 = vld [vmem:[%s1372_s1 + $0x8] sm:$0xf] }
   0x4   :  { %33 = vst [vmem:[#allocation3 + $0x4] sm:$0xf] %v32_v5  ;;  %v1162_v6 = vld [vmem:[%s1371_s0 + $0x4] ss:$12 sps:$4 sm:$0xff]   ;;  %s1173_s1 = smov 96   ;;  %s1175_s20 = smov 64  }
   0x5   :  { %1068 = vmatprep.mubr.msk.bf16.mxu0 %vm154_vm0, %v1162_v6  ;;  %v1256_v9 = vld [vmem:[%s1371_s0 + $0x1c] ss:$12 sps:$4 sm:$0xff]   ;;  %v1262_v10 = vld [vmem:[%s1371_s0] ss:$12 sps:$4 sm:$0xff]   ;;  %v1269_v11 = vld [vmem:[%s1371_s0 + $0x18] ss:$12 sps:$4 sm:$0xff]  }
   0x6   :  { %143 = vrot.lane.b32.xlu1 %v1159_v1, %s1171_s9  ;;  %s1176_s21 = smov 126   ;;  %s1177_s22 = smov 115   ;;  %v818_v13 = vld [vmem:[%s1374_s3 + $0x8] sm:$0xff]  ;;  %v819_v14 = vld [vmem:[%s1374_s3 + $0x10] sm:$0xff]  ;;  %v817_v15 = vld [vmem:[%s1374_s3] sm:$0xff]  ;;  %vm515_vm3 = vcmask 982016  }
   0x7   :  { %s1178_s23 = smov 32   ;;  %s1179_s24 = smov 122   ;;  %v859_v16 = vld [vmem:[%s1376_s5] sm:$0xff]  ;;  %v820_v17 = vld [vmem:[%s1374_s3 + $0x18] sm:$0xff]  ;;  %v861_v18 = vld [vmem:[%s1376_s5 + $0x10] sm:$0xff]  ;;  %vm591_vm4 = vcmask 949248  }
   0x8   :  { %v860_v19 = vld [vmem:[%s1376_s5 + $0x8] sm:$0xff]  ;;  %v862_v20 = vld [vmem:[%s1376_s5 + $0x18] sm:$0xff]  ;;  %vm277_vm5 = vcmask 1031168   ;;  %vm667_vm6 = vcmask 941056   ;;  %vm353_vm7 = vcmask 998400   ;;  %vm753_vm8 = vcmask 932864  }
   0xa   :  { %v1242_v7 = vld [vmem:[#allocation3 + $0x8] sm:$0xff]  }
   0xb   :  { %v1244_v8 = vld [vmem:[#allocation3] sm:$0xff]   ;;  %435 = vrot.lane.b32.xlu1 %v1242_v7, %s1170_s25 }
   0xc   :  { %431 = vrot.lane.b32.xlu0 %v1244_v8, %s1170_s25  ;;  %s1180_s25 = smov 114  }
   0xf   :  { %509 = vrot.lane.b32.xlu1 %v1159_v1, %s1172_s12 }
  0x10   :  { %141 = vrot.lane.b32.xlu0 %v1244_v8, %s1171_s9 }
  0x13   :  { %147 = vrot.lane.b32.xlu1 %v1220_v0, %s1171_s9 }
  0x14   :  { %507 = vrot.lane.b32.xlu0 %v1244_v8, %s1172_s12 }
  0x17   :  { %513 = vrot.lane.b32.xlu1 %v1220_v0, %s1172_s12 }
  0x18   :  { %145 = vrot.lane.b32.xlu0 %v1242_v7, %s1171_s9 }
  0x1b   :  { %503 = vrot.lane.b32.xlu1 %v1162_v6, %s1173_s1 }
  0x1c   :  { %511 = vrot.lane.b32.xlu0 %v1242_v7, %s1172_s12 }
  0x1f   :  { %505 = vrot.lane.b32.xlu1 %v1256_v9, %s1173_s1 }
  0x20   :  { %133 = vrot.lane.b32.xlu0 %v1262_v10, %s1173_s1 }
  0x23   :  { %585 = vrot.lane.b32.xlu1 %v1159_v1, %s1174_s19 }
  0x24   :  { %135 = vrot.lane.b32.xlu0 %v1269_v11, %s1173_s1 }
  0x27   :  { %589 = vrot.lane.b32.xlu1 %v1220_v0, %s1174_s19 }
  0x28   :  { %583 = vrot.lane.b32.xlu0 %v1244_v8, %s1174_s19 }
  0x2b   :  { %581 = vrot.lane.b32.xlu1 %v1256_v9, %s1175_s20 }
  0x2c   :  { %587 = vrot.lane.b32.xlu0 %v1242_v7, %s1174_s19 }
  0x2f   :  { %271 = vrot.lane.b32.xlu1 %v1159_v1, %s1176_s21 }
  0x30   :  { %579 = vrot.lane.b32.xlu0 %v1162_v6, %s1175_s20 }
  0x33   :  { %661 = vrot.lane.b32.xlu1 %v1159_v1, %s1177_s22 }
  0x34   :  { %269 = vrot.lane.b32.xlu0 %v1244_v8, %s1176_s21 }
  0x37   :  { %275 = vrot.lane.b32.xlu1 %v1220_v0, %s1176_s21 }
  0x38   :  { %659 = vrot.lane.b32.xlu0 %v1244_v8, %s1177_s22 }
  0x3b   :  { %665 = vrot.lane.b32.xlu1 %v1220_v0, %s1177_s22 }
  0x3c   :  { %273 = vrot.lane.b32.xlu0 %v1242_v7, %s1176_s21 }
  0x3f   :  { %655 = vrot.lane.b32.xlu1 %v1162_v6, %s1178_s23 }
  0x40   :  { %663 = vrot.lane.b32.xlu0 %v1242_v7, %s1177_s22 }
  0x43   :  { %657 = vrot.lane.b32.xlu1 %v1256_v9, %s1178_s23 }
  0x44   :  { %265 = vrot.lane.b32.xlu0 %v1262_v10, %s1175_s20 }
  0x47   :  { %347 = vrot.lane.b32.xlu1 %v1159_v1, %s1179_s24 }
  0x48   :  { %267 = vrot.lane.b32.xlu0 %v1269_v11, %s1175_s20 }
  0x4b   :  { %747 = vrot.lane.b32.xlu1 %v1159_v1, %s1180_s25  ;;  %v1166_v1 = vld [vmem:[%s1371_s0 + $0x8] ss:$12 sps:$4 sm:$0xff]  }
  0x4c   :  { %345 = vrot.lane.b32.xlu0 %v1244_v8, %s1179_s24 }
  0x4f   :  { %351 = vrot.lane.b32.xlu1 %v1220_v0, %s1179_s24 }
  0x50   :  { %745 = vrot.lane.b32.xlu0 %v1244_v8, %s1180_s25 }
  0x53   :  { %751 = vrot.lane.b32.xlu1 %v1220_v0, %s1180_s25 }
  0x54   :  { %349 = vrot.lane.b32.xlu0 %v1242_v7, %s1179_s24 }
  0x57   :  { %343 = vrot.lane.b32.xlu1 %v1269_v11, %s1178_s23 }
  0x58   :  { %749 = vrot.lane.b32.xlu0 %v1242_v7, %s1180_s25 }
  0x5b   :  { %828 = vperm.xlu1 %1157, %v818_v13  }
  0x5c   :  { %341 = vrot.lane.b32.xlu0 %v1262_v10, %s1178_s23 }
  0x5f   :  { %833 = vperm.xlu1 %1157, %v819_v14  }
  0x60   :  { %823 = vperm.xlu0 %1156, %v817_v15  }
  0x63   :  { %865 = vperm.xlu1 %1157, %v859_v16   ;;  %v1167_v16 = vld [vmem:[%s1371_s0 + $0x20] ss:$12 sps:$4 sm:$0xff]  }
  0x64   :  { %838 = vperm.xlu0 %1156, %v820_v17  }
  0x67   :  { %875 = vperm.xlu1 %1157, %v861_v18  }
  0x68   :  { %870 = vperm.xlu0 %1156, %v860_v19   ;;  %v1168_v19 = vld [vmem:[%s1375_s4] sm:$0xff]  }
  0x6c   :  { %880 = vperm.xlu0 %1156, %v862_v20  }
  0x74   :  { %v438_v21 = vpop.permute.xlu1 %437  ;;  %v434_v23 = vpop.permute.xlu0 %433 }
  0x78   :  { %v144_v22 = vpop.permute.xlu1 %143 }
  0x7d   :  { %v436_v24 = vpop.permute.xlu1 %435 }
  0x7e   :  { %v432_v25 = vpop.permute.xlu0 %431  ;;  %v441_v27 = vsel %vm439_vm1, %v436_v24, %v438_v21 }
  0x7f   :  { %v440_v26 = vsel %vm439_vm1, %v432_v25, %v434_v23 }
  0x80   :  { %1064 = vmatprep.subr.bf16.mxu0 %v440_v26 }
  0x81   :  { %1065 = vmatpush3.bf16.msra.mxu0 %v440_v26  ;;  %v510_v28 = vpop.permute.xlu1 %509 }
  0x82   :  { %1066 = vmatprep.subr.bf16.mxu0 %v441_v27  ;;  %v142_v29 = vpop.permute.xlu0 %141 }
  0x83   :  { %v150_v30 = vsel %vm149_vm2, %v142_v29, %v144_v22 }
  0x84   :  { %1032 = vmatprep.subr.bf16.mxu1 %v150_v30 }
  0x85   :  { %1033 = vmatpush3.bf16.msra.mxu1 %v150_v30  ;;  %1067 = vmatpush3.bf16.msra.mxu0 %v441_v27  ;;  %v148_v31 = vpop.permute.xlu1 %147 }
  0x86   :  { %v508_v32 = vpop.permute.xlu0 %507 }
  0x87   :  { %v516_v33 = vsel %vm515_vm3, %v508_v32, %v510_v28 }
  0x88   :  { %1072 = vmatprep.subr.bf16.mxu0 %v516_v33  ;;  %1069 = vmatmul.mubr.msk.bf16.vlgmr.msra.gmra.mrb[0].mxu0 %vm154_vm0, %v1256_v9 }
  0x89   :  { %1073 = vmatpush3.bf16.msra.mxu0 %v516_v33  ;;  %v514_v34 = vpop.permute.xlu1 %513 }
  0x8a   :  { %v146_v35 = vpop.permute.xlu0 %145 }
  0x8b   :  { %v151_v36 = vsel %vm149_vm2, %v146_v35, %v148_v31 }
  0x8c   :  { %1034 = vmatprep.subr.bf16.mxu1 %v151_v36 }
  0x8d   :  { %1035 = vmatpush3.bf16.msra.mxu1 %v151_v36  ;;  %v504_v37 = vpop.permute.xlu1 %503 }
  0x8e   :  { %v512_v38 = vpop.permute.xlu0 %511  ;;  %1076 = vmatprep.mubr.msk.bf16.mxu0 %vm154_vm0, %v504_v37  ;;  %1040 = vmatprep.subr.bf16.mxu1 %v1244_v8 }
  0x8f   :  { %v517_v39 = vsel %vm515_vm3, %v512_v38, %v514_v34 }
  0x90   :  { %1074 = vmatprep.subr.bf16.mxu0 %v517_v39 }
  0x91   :  { %1075 = vmatpush3.bf16.msra.mxu0 %v517_v39  ;;  %v506_v40 = vpop.permute.xlu1 %505 }
  0x92   :  { %v134_v41 = vpop.permute.xlu0 %133 }
  0x93   :  { %1036 = vmatprep.mubr.msk.bf16.mxu1 %vm154_vm0, %v134_v41 }
  0x94   :  { %1077 = vmatmul.mubr.msk.bf16.vlgmr.msra.gmra.mrb[0].mxu0 %vm154_vm0, %v506_v40 }
  0x95   :  { %v586_v42 = vpop.permute.xlu1 %585 }
  0x96   :  { %v136_v43 = vpop.permute.xlu0 %135 }
  0x97   :  { %1037 = vmatmul.mubr.msk.bf16.vlgmr.msra.gmra.mrb[0].mxu1 %vm154_vm0, %v136_v43 }
  0x98   :  { %1041 = vmatpush3.bf16.msra.mxu1 %v1244_v8  ;;  %1044 = vmatprep.mubr.msk.bf16.mxu1 %vm154_vm0, %v1262_v10 }
  0x99   :  { %v590_v44 = vpop.permute.xlu1 %589  ;;  %1042 = vmatprep.subr.bf16.mxu1 %v1242_v7 }
  0x9a   :  { %v584_v45 = vpop.permute.xlu0 %583 }
  0x9b   :  { %v592_v46 = vsel %vm591_vm4, %v584_v45, %v586_v42 }
  0x9c   :  { %1080 = vmatprep.subr.bf16.mxu0 %v592_v46  ;;  %1043 = vmatpush3.bf16.msra.mxu1 %v1242_v7 }
  0x9d   :  { %1081 = vmatpush3.bf16.msra.mxu0 %v592_v46  ;;  %v582_v47 = vpop.permute.xlu1 %581 }
  0x9e   :  { %v588_v48 = vpop.permute.xlu0 %587 }
  0x9f   :  { %v593_v49 = vsel %vm591_vm4, %v588_v48, %v590_v44 }
  0xa0   :  { %1082 = vmatprep.subr.bf16.mxu0 %v593_v49 }
  0xa1   :  { %1083 = vmatpush3.bf16.msra.mxu0 %v593_v49  ;;  %v272_v50 = vpop.permute.xlu1 %271 }
  0xa2   :  { %v580_v51 = vpop.permute.xlu0 %579 }
  0xa3   :  { %1084 = vmatprep.mubr.msk.bf16.mxu0 %vm154_vm0, %v580_v51  ;;  %1045 = vmatmul.mubr.msk.bf16.vlgmr.msra.gmra.mrb[0].mxu1 %vm154_vm0, %v1269_v11 }
  0xa4   :  { %1085 = vmatmul.mubr.msk.bf16.vlgmr.msra.gmra.mrb[0].mxu0 %vm154_vm0, %v582_v47 }
  0xa5   :  { %v662_v52 = vpop.permute.xlu1 %661 }
  0xa6   :  { %v270_v53 = vpop.permute.xlu0 %269 }
  0xa7   :  { %v278_v54 = vsel %vm277_vm5, %v270_v53, %v272_v50  ;;  %v1169_v50 = vld [vmem:[%s1375_s4 + $0x8] sm:$0xff]  }
  0xa8   :  { %1048 = vmatprep.subr.bf16.mxu1 %v278_v54 }
  0xa9   :  { %1049 = vmatpush3.bf16.msra.mxu1 %v278_v54  ;;  %v276_v55 = vpop.permute.xlu1 %275 }
  0xaa   :  { %v660_v56 = vpop.permute.xlu0 %659 }
  0xab   :  { %v668_v57 = vsel %vm667_vm6, %v660_v56, %v662_v52 }
  0xac   :  { %1088 = vmatprep.subr.bf16.mxu0 %v668_v57 }
  0xad   :  { %1089 = vmatpush3.bf16.msra.mxu0 %v668_v57  ;;  %v666_v58 = vpop.permute.xlu1 %665 }
  0xae   :  { %v274_v59 = vpop.permute.xlu0 %273 }
  0xaf   :  { %v279_v60 = vsel %vm277_vm5, %v274_v59, %v276_v55 }
  0xb0   :  { %1050 = vmatprep.subr.bf16.mxu1 %v279_v60 }
  0xb1   :  { %1051 = vmatpush3.bf16.msra.mxu1 %v279_v60  ;;  %v656_v61 = vpop.permute.xlu1 %655 }
  0xb2   :  { %v664_v62 = vpop.permute.xlu0 %663  ;;  %1092 = vmatprep.mubr.msk.bf16.mxu0 %vm154_vm0, %v656_v61 }
  0xb3   :  { %v669_v63 = vsel %vm667_vm6, %v664_v62, %v666_v58 }
  0xb4   :  { %1090 = vmatprep.subr.bf16.mxu0 %v669_v63 }
  0xb5   :  { %1091 = vmatpush3.bf16.msra.mxu0 %v669_v63  ;;  %v658_v0 = vpop.permute.xlu1 %657 }
  0xb6   :  { %v266_v2 = vpop.permute.xlu0 %265 }
  0xb7   :  { %1052 = vmatprep.mubr.msk.bf16.mxu1 %vm154_vm0, %v266_v2 }
  0xb8   :  { %1093 = vmatmul.mubr.msk.bf16.vlgmr.msra.gmra.mrb[0].mxu0 %vm154_vm0, %v658_v0 }
  0xb9   :  { %v348_v3 = vpop.permute.xlu1 %347  ;;  %1100 = vmatprep.mubr.msk.bf16.mxu0 %vm154_vm0, %v1166_v1 }
  0xba   :  { %v268_v4 = vpop.permute.xlu0 %267 }
  0xbb   :  { %1053 = vmatmul.mubr.msk.bf16.vlgmr.msra.gmra.mrb[0].mxu1 %vm154_vm0, %v268_v4 }
  0xbd   :  { %v748_v5 = vpop.permute.xlu1 %747 }
  0xbe   :  { %v346_v6 = vpop.permute.xlu0 %345 }
  0xbf   :  { %v354_v7 = vsel %vm353_vm7, %v346_v6, %v348_v3 }
  0xc0   :  { %1056 = vmatprep.subr.bf16.mxu1 %v354_v7 }
  0xc1   :  { %1057 = vmatpush3.bf16.msra.mxu1 %v354_v7  ;;  %v352_v8 = vpop.permute.xlu1 %351 }
  0xc2   :  { %v746_v9 = vpop.permute.xlu0 %745 }
  0xc3   :  { %v754_v10 = vsel %vm753_vm8, %v746_v9, %v748_v5 }
  0xc4   :  { %1096 = vmatprep.subr.bf16.mxu0 %v754_v10 }
  0xc5   :  { %1097 = vmatpush3.bf16.msra.mxu0 %v754_v10  ;;  %v752_v13 = vpop.permute.xlu1 %751 }
  0xc6   :  { %v350_v11 = vpop.permute.xlu0 %349 }
  0xc7   :  { %v355_v12 = vsel %vm353_vm7, %v350_v11, %v352_v8 }
  0xc8   :  { %1058 = vmatprep.subr.bf16.mxu1 %v355_v12 }
  0xc9   :  { %1059 = vmatpush3.bf16.msra.mxu1 %v355_v12  ;;  %v344_v17 = vpop.permute.xlu1 %343 }
  0xca   :  { %v750_v14 = vpop.permute.xlu0 %749 }
  0xcb   :  { %v755_v15 = vsel %vm753_vm8, %v750_v14, %v752_v13 }
  0xcc   :  { %1098 = vmatprep.subr.bf16.mxu0 %v755_v15 }
  0xcd   :  { %1099 = vmatpush3.bf16.msra.mxu0 %v755_v15 }
  0xce   :  { %v342_v18 = vpop.permute.xlu0 %341 }
  0xcf   :  { %1060 = vmatprep.mubr.msk.bf16.mxu1 %vm154_vm0, %v342_v18 }
  0xd0   :  { %1061 = vmatmul.mubr.msk.bf16.vlgmr.msra.gmra.mrb[0].mxu1 %vm154_vm0, %v344_v17  ;;  %1101 = vmatmul.mubr.msk.bf16.vlgmr.msra.gmra.mrb[0].mxu0 %vm154_vm0, %v1167_v16 }
  0xd1   :  { %1108 = vmatprep.mubr.msk.bf16.mxu1 %vm154_vm0, %v1168_v19 }
  0xda   :  { %v829_v20 = vpop.permute.xlu1 %828 }
  0xde   :  { %v834_v22 = vpop.permute.xlu1 %833 }
  0xdf   :  { %v824_v21 = vpop.permute.xlu0 %823 }
  0xe2   :  { %v866_v51 = vpop.permute.xlu1 %865 }
  0xe3   :  { %v839_v35 = vpop.permute.xlu0 %838 }
  0xe6   :  { %v876_v53 = vpop.permute.xlu1 %875 }
  0xe7   :  { %v871_v52 = vpop.permute.xlu0 %870 }
  0xeb   :  { %v881_v57 = vpop.permute.xlu0 %880 }
 0x1a3   :  { %v1062_v23 = vpop.f32.mrb[0].mxu1  ;;  %v1102_v24 = vpop.f32.mrb[0].mxu0 }
 0x1a4   :  { %v1112_v25 = vadd.f32 %v1102_v24, %v1062_v23  ;;  %v398_v26 = vpop.f32.mrb[1].mxu1  ;;  %v798_v27 = vpop.f32.mrb[1].mxu0 }
 0x1a5   :  { %v1113_v28 = vadd.f32 %v798_v27, %v398_v26  ;;  %v1063_v29 = vpop.f32.mrb[2].mxu1  ;;  %v1103_v30 = vpop.f32.mrb[2].mxu0 }
 0x1a6   :  { %v843_v31 = vadd.f32 %v1112_v25, %v834_v22  ;;  %v1114_v32 = vadd.f32 %v1103_v30, %v1063_v29  ;;  %v401_v33 = vpop.f32.mrb[3].mxu1  ;;  %v801_v34 = vpop.f32.mrb[3].mxu0 }
 0x1a7   :  { %v841_v36 = vadd.f32 %v1113_v28, %v824_v21  ;;  %v1115_v37 = vadd.f32 %v801_v34, %v401_v33 }
 0x1a8   :  { %v847_v38 = vmul.f32 0.01, %v843_v31  ;;  %v844_v39 = vadd.f32 %v1114_v32, %v839_v35 }
 0x1a9   :  { %v845_v40 = vmul.f32 0.01, %v841_v36  ;;  %v842_v41 = vadd.f32 %v1115_v37, %v829_v20 }
 0x1aa   :  { %v848_v42 = vmul.f32 0.01, %v844_v39  ;;  %v851_v44 = vmax.f32 %v843_v31, %v847_v38 }
 0x1ab   :  { %v846_v43 = vmul.f32 0.01, %v842_v41  ;;  %v849_v46 = vmax.f32 %v841_v36, %v845_v40 }
 0x1ac   :  { %v852_v45 = vmax.f32 %v844_v39, %v848_v42 }
 0x1ad   :  { %v850_v47 = vmax.f32 %v842_v41, %v846_v43 }
 0x1ae   :  { %v858_v48 = vpack.c.bf16 %v852_v45, %v851_v44 }
 0x1af   :  { %v857_v49 = vpack.c.bf16 %v850_v47, %v849_v46 }
 0x1b1   :  { %1104 = vmatprep.subr.bf16.mxu1 %v857_v49 }
 0x1b2   :  { %1105 = vmatpush3.bf16.msra.mxu1 %v857_v49 }
 0x1b3   :  { %1106 = vmatprep.subr.bf16.mxu1 %v858_v48 }
 0x1b6   :  { %1107 = vmatpush3.bf16.msra.mxu1 %v858_v48 }
 0x1b9   :  { %1109 = vmatmul.mubr.msk.bf16.vlgmr.msra.gmra.mrb[4].mxu1 %vm154_vm0, %v1169_v50 }
 0x28c   :  { %v1110_v54 = vpop.f32.mrb[4].mxu1 }
 0x28d   :  { %v942_v55 = vadd.f32 %v1110_v54, %v876_v53  ;;  %v933_v56 = vpop.f32.mrb[5].mxu1 }
 0x28e   :  { %v934_v58 = vadd.f32 %v933_v56, %v866_v51  ;;  %v1111_v59 = vpop.f32.mrb[6].mxu1 }
 0x28f   :  { %950 = vst [vmem:[%s1377_s6 + $0x10] sm:$0xff] %v942_v55  ;;  %v945_v60 = vadd.f32 %v1111_v59, %v881_v57  ;;  %v936_v61 = vpop.f32.mrb[7].mxu1 }
 0x290   :  { %948 = vst [vmem:[%s1377_s6] sm:$0xff] %v934_v58  ;;  %v937_v62 = vadd.f32 %v936_v61, %v871_v52 }
 0x291   :  { %951 = vst [vmem:[%s1377_s6 + $0x18] sm:$0xff] %v945_v60 }
 0x292   :  { %949 = vst [vmem:[%s1377_s6 + $0x8] sm:$0xff] %v937_v62 }

// kernel: feature_net.18
= control target key start
LH: loop header
LB: loop body
LE: loop exit
PB: predicated region body
PF: predicated region fallthrough
CT: control target
= control target key end

     0   :  { %s1086_s19 = smov 121   ;;  %s1087_s27 = smov 127   ;;  %vm148_vm0 = vcmask 261120   ;;  %v1097_v12 = vmov 0   ;;  %vm433_vm1 = vcmask 990208   ;;  %vm143_vm2 = vcmask 1039360   ;;  %s1251_s0 = inlined_call_operand.vmem [shape: bf16[32,288], index: 0, kind: input, shape index: {}]   ;;  %s1252_s1 = inlined_call_operand.vmem [shape: bf16[32,256], index: 1, kind: input, shape index: {}]   ;;  %s1253_s2 = inlined_call_operand.vmem [shape: bf16[1,32,128], index: 2, kind: input, shape index: {}]   ;;  %s1254_s3 = inlined_call_operand.vmem [shape: f32[32,1], index: 3, kind: input, shape index: {}]   ;;  %s1255_s4 = inlined_call_operand.vmem [shape: bf16[32,128], index: 4, kind: output, shape index: {}]  }
   0x1   :  { %v1126_v0 = vld [vmem:[%s1253_s2 + $0x8] sm:$0xff]   ;;  %v1077_v1 = vld [vmem:[%s1253_s2] sm:$0xff]   ;;  %v32_v2 = vld [vmem:[%s1252_s1 + $0x10] sm:$0xf]  ;;  %s1088_s30 = smov 120   ;;  %s1090_s11 = smov 116   ;;  %1075 = vset.pattern.permute.xlu1 %v1097_v12  ;;  %1074 = vset.pattern.permute.xlu0 %v1097_v12 }
   0x2   :  { %431 = vrot.lane.b32.xlu1 %v1126_v0, %s1086_s19  ;;  %v34_v3 = vld [vmem:[%s1252_s1 + $0x18] sm:$0xf]  ;;  %v28_v4 = vld [vmem:[%s1252_s1] sm:$0xf]  ;;  %427 = vrot.lane.b32.xlu0 %v1077_v1, %s1086_s19  ;;  %33 = vst [vmem:[#allocation3 + $0x8] sm:$0xf] %v32_v2 }
   0x3   :  { %35 = vst [vmem:[#allocation3 + $0xc] sm:$0xf] %v34_v3  ;;  %29 = vst [vmem:[#allocation3] sm:$0xf] %v28_v4  ;;  %v30_v5 = vld [vmem:[%s1252_s1 + $0x8] sm:$0xf] }
   0x4   :  { %31 = vst [vmem:[#allocation3 + $0x4] sm:$0xf] %v30_v5  ;;  %v1080_v6 = vld [vmem:[%s1251_s0 + $0x4] ss:$12 sps:$4 sm:$0xff]   ;;  %s1089_s1 = smov 96   ;;  %s1091_s12 = smov 64  }
   0x5   :  { %994 = vmatprep.mubr.msk.bf16.mxu0 %vm148_vm0, %v1080_v6  ;;  %v1162_v9 = vld [vmem:[%s1251_s0 + $0x1c] ss:$12 sps:$4 sm:$0xff]   ;;  %v1168_v10 = vld [vmem:[%s1251_s0] ss:$12 sps:$4 sm:$0xff]   ;;  %v1175_v11 = vld [vmem:[%s1251_s0 + $0x18] ss:$12 sps:$4 sm:$0xff]  }
   0x6   :  { %137 = vrot.lane.b32.xlu1 %v1077_v1, %s1087_s27  ;;  %s1092_s13 = smov 126   ;;  %s1093_s14 = smov 115   ;;  %v812_v13 = vld [vmem:[%s1254_s3 + $0x8] sm:$0xff]  ;;  %v813_v14 = vld [vmem:[%s1254_s3 + $0x10] sm:$0xff]  ;;  %v811_v15 = vld [vmem:[%s1254_s3] sm:$0xff]  ;;  %vm509_vm3 = vcmask 982016  }
   0x7   :  { %s1094_s15 = smov 32   ;;  %s1095_s16 = smov 122   ;;  %v814_v16 = vld [vmem:[%s1254_s3 + $0x18] sm:$0xff]  ;;  %vm585_vm4 = vcmask 949248   ;;  %vm271_vm5 = vcmask 1031168   ;;  %vm661_vm6 = vcmask 941056  }
   0x8   :  { %s1096_s17 = smov 114   ;;  %v1084_v61 = vld [vmem:[%s1251_s0 + $0x8] ss:$12 sps:$4 sm:$0xff]   ;;  %vm347_vm7 = vcmask 998400   ;;  %vm747_vm8 = vcmask 932864  }
   0x9   :  { %v1085_v12 = vld [vmem:[%s1251_s0 + $0x20] ss:$12 sps:$4 sm:$0xff]  }
   0xa   :  { %v1148_v7 = vld [vmem:[#allocation3 + $0x8] sm:$0xff]  }
   0xb   :  { %v1150_v8 = vld [vmem:[#allocation3] sm:$0xff]   ;;  %429 = vrot.lane.b32.xlu1 %v1148_v7, %s1086_s19 }
   0xc   :  { %425 = vrot.lane.b32.xlu0 %v1150_v8, %s1086_s19 }
   0xf   :  { %503 = vrot.lane.b32.xlu1 %v1077_v1, %s1088_s30 }
  0x10   :  { %135 = vrot.lane.b32.xlu0 %v1150_v8, %s1087_s27 }
  0x13   :  { %141 = vrot.lane.b32.xlu1 %v1126_v0, %s1087_s27 }
  0x14   :  { %501 = vrot.lane.b32.xlu0 %v1150_v8, %s1088_s30 }
  0x17   :  { %507 = vrot.lane.b32.xlu1 %v1126_v0, %s1088_s30 }
  0x18   :  { %139 = vrot.lane.b32.xlu0 %v1148_v7, %s1087_s27 }
  0x1b   :  { %497 = vrot.lane.b32.xlu1 %v1080_v6, %s1089_s1 }
  0x1c   :  { %505 = vrot.lane.b32.xlu0 %v1148_v7, %s1088_s30 }
  0x1f   :  { %499 = vrot.lane.b32.xlu1 %v1162_v9, %s1089_s1 }
  0x20   :  { %127 = vrot.lane.b32.xlu0 %v1168_v10, %s1089_s1 }
  0x23   :  { %579 = vrot.lane.b32.xlu1 %v1077_v1, %s1090_s11 }
  0x24   :  { %129 = vrot.lane.b32.xlu0 %v1175_v11, %s1089_s1 }
  0x27   :  { %583 = vrot.lane.b32.xlu1 %v1126_v0, %s1090_s11 }
  0x28   :  { %577 = vrot.lane.b32.xlu0 %v1150_v8, %s1090_s11 }
  0x2b   :  { %575 = vrot.lane.b32.xlu1 %v1162_v9, %s1091_s12 }
  0x2c   :  { %581 = vrot.lane.b32.xlu0 %v1148_v7, %s1090_s11 }
  0x2f   :  { %265 = vrot.lane.b32.xlu1 %v1077_v1, %s1092_s13 }
  0x30   :  { %573 = vrot.lane.b32.xlu0 %v1080_v6, %s1091_s12 }
  0x33   :  { %655 = vrot.lane.b32.xlu1 %v1077_v1, %s1093_s14 }
  0x34   :  { %263 = vrot.lane.b32.xlu0 %v1150_v8, %s1092_s13 }
  0x37   :  { %269 = vrot.lane.b32.xlu1 %v1126_v0, %s1092_s13 }
  0x38   :  { %653 = vrot.lane.b32.xlu0 %v1150_v8, %s1093_s14 }
  0x3b   :  { %659 = vrot.lane.b32.xlu1 %v1126_v0, %s1093_s14 }
  0x3c   :  { %267 = vrot.lane.b32.xlu0 %v1148_v7, %s1092_s13 }
  0x3f   :  { %649 = vrot.lane.b32.xlu1 %v1080_v6, %s1094_s15 }
  0x40   :  { %657 = vrot.lane.b32.xlu0 %v1148_v7, %s1093_s14 }
  0x43   :  { %651 = vrot.lane.b32.xlu1 %v1162_v9, %s1094_s15 }
  0x44   :  { %259 = vrot.lane.b32.xlu0 %v1168_v10, %s1091_s12 }
  0x47   :  { %341 = vrot.lane.b32.xlu1 %v1077_v1, %s1095_s16 }
  0x48   :  { %261 = vrot.lane.b32.xlu0 %v1175_v11, %s1091_s12 }
  0x4b   :  { %741 = vrot.lane.b32.xlu1 %v1077_v1, %s1096_s17 }
  0x4c   :  { %339 = vrot.lane.b32.xlu0 %v1150_v8, %s1095_s16 }
  0x4f   :  { %345 = vrot.lane.b32.xlu1 %v1126_v0, %s1095_s16 }
  0x50   :  { %739 = vrot.lane.b32.xlu0 %v1150_v8, %s1096_s17 }
  0x53   :  { %745 = vrot.lane.b32.xlu1 %v1126_v0, %s1096_s17 }
  0x54   :  { %343 = vrot.lane.b32.xlu0 %v1148_v7, %s1095_s16 }
  0x57   :  { %337 = vrot.lane.b32.xlu1 %v1175_v11, %s1094_s15 }
  0x58   :  { %743 = vrot.lane.b32.xlu0 %v1148_v7, %s1096_s17 }
  0x5b   :  { %822 = vperm.xlu1 %1075, %v812_v13  }
  0x5c   :  { %335 = vrot.lane.b32.xlu0 %v1168_v10, %s1094_s15 }
  0x5f   :  { %827 = vperm.xlu1 %1075, %v813_v14  }
  0x60   :  { %817 = vperm.xlu0 %1074, %v811_v15  }
  0x64   :  { %832 = vperm.xlu0 %1074, %v814_v16  }
  0x74   :  { %v432_v17 = vpop.permute.xlu1 %431  ;;  %v428_v19 = vpop.permute.xlu0 %427 }
  0x78   :  { %v138_v18 = vpop.permute.xlu1 %137 }
  0x7d   :  { %v430_v20 = vpop.permute.xlu1 %429 }
  0x7e   :  { %v426_v21 = vpop.permute.xlu0 %425  ;;  %v435_v23 = vsel %vm433_vm1, %v430_v20, %v432_v17 }
  0x7f   :  { %v434_v22 = vsel %vm433_vm1, %v426_v21, %v428_v19 }
  0x80   :  { %990 = vmatprep.subr.bf16.mxu0 %v434_v22 }
  0x81   :  { %991 = vmatpush3.bf16.msra.mxu0 %v434_v22  ;;  %v504_v24 = vpop.permute.xlu1 %503 }
  0x82   :  { %992 = vmatprep.subr.bf16.mxu0 %v435_v23  ;;  %v136_v25 = vpop.permute.xlu0 %135 }
  0x83   :  { %v144_v26 = vsel %vm143_vm2, %v136_v25, %v138_v18 }
  0x84   :  { %958 = vmatprep.subr.bf16.mxu1 %v144_v26 }
  0x85   :  { %959 = vmatpush3.bf16.msra.mxu1 %v144_v26  ;;  %993 = vmatpush3.bf16.msra.mxu0 %v435_v23  ;;  %v142_v27 = vpop.permute.xlu1 %141 }
  0x86   :  { %v502_v28 = vpop.permute.xlu0 %501 }
  0x87   :  { %v510_v29 = vsel %vm509_vm3, %v502_v28, %v504_v24 }
  0x88   :  { %998 = vmatprep.subr.bf16.mxu0 %v510_v29  ;;  %995 = vmatmul.mubr.msk.bf16.vlgmr.msra.gmra.mrb[0].mxu0 %vm148_vm0, %v1162_v9 }
  0x89   :  { %999 = vmatpush3.bf16.msra.mxu0 %v510_v29  ;;  %v508_v30 = vpop.permute.xlu1 %507 }
  0x8a   :  { %v140_v31 = vpop.permute.xlu0 %139 }
  0x8b   :  { %v145_v32 = vsel %vm143_vm2, %v140_v31, %v142_v27 }
  0x8c   :  { %960 = vmatprep.subr.bf16.mxu1 %v145_v32 }
  0x8d   :  { %961 = vmatpush3.bf16.msra.mxu1 %v145_v32  ;;  %v498_v33 = vpop.permute.xlu1 %497 }
  0x8e   :  { %v506_v34 = vpop.permute.xlu0 %505  ;;  %1002 = vmatprep.mubr.msk.bf16.mxu0 %vm148_vm0, %v498_v33  ;;  %966 = vmatprep.subr.bf16.mxu1 %v1150_v8 }
  0x8f   :  { %v511_v35 = vsel %vm509_vm3, %v506_v34, %v508_v30 }
  0x90   :  { %1000 = vmatprep.subr.bf16.mxu0 %v511_v35 }
  0x91   :  { %1001 = vmatpush3.bf16.msra.mxu0 %v511_v35  ;;  %v500_v36 = vpop.permute.xlu1 %499 }
  0x92   :  { %v128_v37 = vpop.permute.xlu0 %127 }
  0x93   :  { %962 = vmatprep.mubr.msk.bf16.mxu1 %vm148_vm0, %v128_v37 }
  0x94   :  { %1003 = vmatmul.mubr.msk.bf16.vlgmr.msra.gmra.mrb[0].mxu0 %vm148_vm0, %v500_v36 }
  0x95   :  { %v580_v38 = vpop.permute.xlu1 %579 }
  0x96   :  { %v130_v39 = vpop.permute.xlu0 %129 }
  0x97   :  { %963 = vmatmul.mubr.msk.bf16.vlgmr.msra.gmra.mrb[0].mxu1 %vm148_vm0, %v130_v39 }
  0x98   :  { %967 = vmatpush3.bf16.msra.mxu1 %v1150_v8  ;;  %970 = vmatprep.mubr.msk.bf16.mxu1 %vm148_vm0, %v1168_v10 }
  0x99   :  { %v584_v40 = vpop.permute.xlu1 %583  ;;  %968 = vmatprep.subr.bf16.mxu1 %v1148_v7 }
  0x9a   :  { %v578_v41 = vpop.permute.xlu0 %577 }
  0x9b   :  { %v586_v42 = vsel %vm585_vm4, %v578_v41, %v580_v38 }
  0x9c   :  { %1006 = vmatprep.subr.bf16.mxu0 %v586_v42  ;;  %969 = vmatpush3.bf16.msra.mxu1 %v1148_v7 }
  0x9d   :  { %1007 = vmatpush3.bf16.msra.mxu0 %v586_v42  ;;  %v576_v43 = vpop.permute.xlu1 %575 }
  0x9e   :  { %v582_v44 = vpop.permute.xlu0 %581 }
  0x9f   :  { %v587_v45 = vsel %vm585_vm4, %v582_v44, %v584_v40 }
  0xa0   :  { %1008 = vmatprep.subr.bf16.mxu0 %v587_v45 }
  0xa1   :  { %1009 = vmatpush3.bf16.msra.mxu0 %v587_v45  ;;  %v266_v46 = vpop.permute.xlu1 %265 }
  0xa2   :  { %v574_v47 = vpop.permute.xlu0 %573 }
  0xa3   :  { %1010 = vmatprep.mubr.msk.bf16.mxu0 %vm148_vm0, %v574_v47  ;;  %971 = vmatmul.mubr.msk.bf16.vlgmr.msra.gmra.mrb[0].mxu1 %vm148_vm0, %v1175_v11 }
  0xa4   :  { %1011 = vmatmul.mubr.msk.bf16.vlgmr.msra.gmra.mrb[0].mxu0 %vm148_vm0, %v576_v43 }
  0xa5   :  { %v656_v48 = vpop.permute.xlu1 %655 }
  0xa6   :  { %v264_v49 = vpop.permute.xlu0 %263 }
  0xa7   :  { %v272_v50 = vsel %vm271_vm5, %v264_v49, %v266_v46 }
  0xa8   :  { %974 = vmatprep.subr.bf16.mxu1 %v272_v50 }
  0xa9   :  { %975 = vmatpush3.bf16.msra.mxu1 %v272_v50  ;;  %v270_v51 = vpop.permute.xlu1 %269 }
  0xaa   :  { %v654_v52 = vpop.permute.xlu0 %653 }
  0xab   :  { %v662_v53 = vsel %vm661_vm6, %v654_v52, %v656_v48 }
  0xac   :  { %1014 = vmatprep.subr.bf16.mxu0 %v662_v53 }
  0xad   :  { %1015 = vmatpush3.bf16.msra.mxu0 %v662_v53  ;;  %v660_v54 = vpop.permute.xlu1 %659 }
  0xae   :  { %v268_v55 = vpop.permute.xlu0 %267 }
  0xaf   :  { %v273_v56 = vsel %vm271_vm5, %v268_v55, %v270_v51 }
  0xb0   :  { %976 = vmatprep.subr.bf16.mxu1 %v273_v56 }
  0xb1   :  { %977 = vmatpush3.bf16.msra.mxu1 %v273_v56  ;;  %v650_v57 = vpop.permute.xlu1 %649 }
  0xb2   :  { %v658_v58 = vpop.permute.xlu0 %657  ;;  %1018 = vmatprep.mubr.msk.bf16.mxu0 %vm148_vm0, %v650_v57 }
  0xb3   :  { %v663_v59 = vsel %vm661_vm6, %v658_v58, %v660_v54 }
  0xb4   :  { %1016 = vmatprep.subr.bf16.mxu0 %v663_v59 }
  0xb5   :  { %1017 = vmatpush3.bf16.msra.mxu0 %v663_v59  ;;  %v652_v60 = vpop.permute.xlu1 %651 }
  0xb6   :  { %v260_v62 = vpop.permute.xlu0 %259 }
  0xb7   :  { %978 = vmatprep.mubr.msk.bf16.mxu1 %vm148_vm0, %v260_v62 }
  0xb8   :  { %1019 = vmatmul.mubr.msk.bf16.vlgmr.msra.gmra.mrb[0].mxu0 %vm148_vm0, %v652_v60 }
  0xb9   :  { %v342_v63 = vpop.permute.xlu1 %341  ;;  %1026 = vmatprep.mubr.msk.bf16.mxu0 %vm148_vm0, %v1084_v61 }
  0xba   :  { %v262_v0 = vpop.permute.xlu0 %261 }
  0xbb   :  { %979 = vmatmul.mubr.msk.bf16.vlgmr.msra.gmra.mrb[0].mxu1 %vm148_vm0, %v262_v0 }
  0xbd   :  { %v742_v1 = vpop.permute.xlu1 %741 }
  0xbe   :  { %v340_v2 = vpop.permute.xlu0 %339 }
  0xbf   :  { %v348_v3 = vsel %vm347_vm7, %v340_v2, %v342_v63 }
  0xc0   :  { %982 = vmatprep.subr.bf16.mxu1 %v348_v3 }
  0xc1   :  { %983 = vmatpush3.bf16.msra.mxu1 %v348_v3  ;;  %v346_v4 = vpop.permute.xlu1 %345 }
  0xc2   :  { %v740_v5 = vpop.permute.xlu0 %739 }
  0xc3   :  { %v748_v6 = vsel %vm747_vm8, %v740_v5, %v742_v1 }
  0xc4   :  { %1022 = vmatprep.subr.bf16.mxu0 %v748_v6 }
  0xc5   :  { %1023 = vmatpush3.bf16.msra.mxu0 %v748_v6  ;;  %v746_v9 = vpop.permute.xlu1 %745 }
  0xc6   :  { %v344_v7 = vpop.permute.xlu0 %343 }
  0xc7   :  { %v349_v8 = vsel %vm347_vm7, %v344_v7, %v346_v4 }
  0xc8   :  { %984 = vmatprep.subr.bf16.mxu1 %v349_v8 }
  0xc9   :  { %985 = vmatpush3.bf16.msra.mxu1 %v349_v8  ;;  %v338_v13 = vpop.permute.xlu1 %337 }
  0xca   :  { %v744_v10 = vpop.permute.xlu0 %743 }
  0xcb   :  { %v749_v11 = vsel %vm747_vm8, %v744_v10, %v746_v9 }
  0xcc   :  { %1024 = vmatprep.subr.bf16.mxu0 %v749_v11 }
  0xcd   :  { %1025 = vmatpush3.bf16.msra.mxu0 %v749_v11 }
  0xce   :  { %v336_v14 = vpop.permute.xlu0 %335 }
  0xcf   :  { %986 = vmatprep.mubr.msk.bf16.mxu1 %vm148_vm0, %v336_v14 }
  0xd0   :  { %987 = vmatmul.mubr.msk.bf16.vlgmr.msra.gmra.mrb[0].mxu1 %vm148_vm0, %v338_v13  ;;  %1027 = vmatmul.mubr.msk.bf16.vlgmr.msra.gmra.mrb[0].mxu0 %vm148_vm0, %v1085_v12 }
  0xda   :  { %v823_v15 = vpop.permute.xlu1 %822 }
  0xde   :  { %v828_v17 = vpop.permute.xlu1 %827 }
  0xdf   :  { %v818_v16 = vpop.permute.xlu0 %817 }
  0xe3   :  { %v833_v32 = vpop.permute.xlu0 %832 }
 0x1a3   :  { %v988_v18 = vpop.f32.mrb[0].mxu1  ;;  %v1028_v19 = vpop.f32.mrb[0].mxu0 }
 0x1a4   :  { %v1030_v20 = vadd.f32 %v1028_v19, %v988_v18  ;;  %v392_v21 = vpop.f32.mrb[1].mxu1  ;;  %v792_v22 = vpop.f32.mrb[1].mxu0 }
 0x1a5   :  { %v1031_v23 = vadd.f32 %v792_v22, %v392_v21  ;;  %v989_v24 = vpop.f32.mrb[2].mxu1  ;;  %v1029_v25 = vpop.f32.mrb[2].mxu0 }
 0x1a6   :  { %v837_v26 = vadd.f32 %v1030_v20, %v828_v17  ;;  %v1032_v27 = vadd.f32 %v1029_v25, %v989_v24  ;;  %v395_v28 = vpop.f32.mrb[3].mxu1  ;;  %v795_v29 = vpop.f32.mrb[3].mxu0 }
 0x1a7   :  { %v835_v30 = vadd.f32 %v1031_v23, %v818_v16  ;;  %v1033_v31 = vadd.f32 %v795_v29, %v395_v28 }
 0x1a8   :  { %v841_v33 = vmul.f32 0.01, %v837_v26  ;;  %v838_v34 = vadd.f32 %v1032_v27, %v833_v32 }
 0x1a9   :  { %v839_v35 = vmul.f32 0.01, %v835_v30  ;;  %v836_v36 = vadd.f32 %v1033_v31, %v823_v15 }
 0x1aa   :  { %v842_v37 = vmul.f32 0.01, %v838_v34  ;;  %v845_v39 = vmax.f32 %v837_v26, %v841_v33 }
 0x1ab   :  { %v840_v38 = vmul.f32 0.01, %v836_v36  ;;  %v843_v41 = vmax.f32 %v835_v30, %v839_v35 }
 0x1ac   :  { %v846_v40 = vmax.f32 %v838_v34, %v842_v37 }
 0x1ad   :  { %v844_v42 = vmax.f32 %v836_v36, %v840_v38 }
 0x1ae   :  { %v919_v43 = vpack.c.bf16 %v846_v40, %v845_v39 }
 0x1af   :  { %v914_v44 = vpack.c.bf16 %v844_v42, %v843_v41 }
 0x1b0   :  { %921 = vst [vmem:[%s1255_s4 + $0x8] sm:$0xff] %v919_v43  }
 0x1b1   :  { %915 = vst [vmem:[%s1255_s4] sm:$0xff] %v914_v44  }

// kernel: feature_net.20
= control target key start
LH: loop header
LB: loop body
LE: loop exit
PB: predicated region body
PF: predicated region fallthrough
CT: control target
= control target key end

     0   :  { %vm109_vm0 = vcmask 130048   ;;  %v253_v4 = vmov 0   ;;  %s317_s0 = inlined_call_operand.vmem [shape: bf16[32,16], index: 0, kind: input, shape index: {}]   ;;  %s318_s1 = inlined_call_operand.vmem [shape: bf16[16,256], index: 1, kind: input, shape index: {}]   ;;  %s319_s2 = inlined_call_operand.vmem [shape: f32[32,1], index: 2, kind: input, shape index: {}]   ;;  %s320_s3 = inlined_call_operand.vmem [shape: bf16[32,128], index: 3, kind: input, shape index: {}]   ;;  %s321_s4 = inlined_call_operand.vmem [shape: bf16[32,128], index: 4, kind: output, shape index: {}]  }
   0x1   :  { %v28_v0 = vld [vmem:[%s318_s1] sm:$0xf]  ;;  %v30_v1 = vld [vmem:[%s318_s1 + $0x8] sm:$0xf]  ;;  %v71_v3 = vld [vmem:[%s319_s2 + $0x10] sm:$0xff]  ;;  %249 = vset.pattern.permute.xlu1 %v253_v4  ;;  %248 = vset.pattern.permute.xlu0 %v253_v4 }
   0x2   :  { %29 = vst [vmem:[#allocation2] sm:$0xf] %v28_v0  ;;  %31 = vst [vmem:[#allocation2 + $0x4] sm:$0xf] %v30_v1  ;;  %v251_v2 = vld [vmem:[%s317_s0] sm:$0xff]   ;;  %85 = vperm.xlu1 %249, %v71_v3   ;;  %v72_v6 = vld [vmem:[%s319_s2 + $0x18] sm:$0xff] }
   0x3   :  { %243 = vmatprep.mubr.msk.bf16.mxu0 %vm109_vm0, %v251_v2  ;;  %v69_v5 = vld [vmem:[%s319_s2] sm:$0xff]  ;;  %v70_v7 = vld [vmem:[%s319_s2 + $0x8] sm:$0xff] }
   0x4   :  { %75 = vperm.xlu0 %248, %v69_v5   ;;  %v252_v9 = vld [vmem:[%s317_s0 + $0x8] sm:$0xff]   ;;  %v219_v13 = vld [vmem:[%s320_s3] sm:$0xff]  }
   0x5   :  { %v236_v12 = vld [vmem:[%s320_s3 + $0x8] sm:$0xff]   ;;  %v220_v21 = vunpack.c.l.bf16 %v219_v13  ;;  %v221_v23 = vunpack.c.h.bf16 %v219_v13 }
   0x6   :  { %90 = vperm.xlu1 %249, %v72_v6   ;;  %v224_v16 = vunpack.c.l.bf16 %v236_v12  ;;  %v225_v18 = vunpack.c.h.bf16 %v236_v12 }
   0x8   :  { %80 = vperm.xlu0 %248, %v70_v7  }
   0x9   :  { %v250_v8 = vld [vmem:[#allocation2] sm:$0xff]  }
   0xa   :  { %241 = vmatprep.subr.bf16.mxu0 %v250_v8 }
   0xb   :  { %242 = vmatpush3.bf16.msra.mxu0 %v250_v8 }
   0xe   :  { %244 = vmatmul.mubr.msk.bf16.vlgmr.msra.gmra.mrb[0].mxu0 %vm109_vm0, %v252_v9 }
  0x81   :  { %v86_v10 = vpop.permute.xlu1 %85 }
  0x83   :  { %v76_v11 = vpop.permute.xlu0 %75 }
  0x85   :  { %v91_v19 = vpop.permute.xlu1 %90 }
  0x87   :  { %v81_v24 = vpop.permute.xlu0 %80 }
  0xe1   :  { %v245_v14 = vpop.f32.mrb[0].mxu0 }
  0xe2   :  { %v159_v15 = vadd.f32 %v245_v14, %v86_v10  ;;  %v150_v17 = vpop.f32.mrb[1].mxu0 }
  0xe3   :  { %v151_v20 = vadd.f32 %v150_v17, %v76_v11  ;;  %v246_v22 = vpop.f32.mrb[2].mxu0 }
  0xe4   :  { %v162_v25 = vadd.f32 %v246_v22, %v91_v19  ;;  %v153_v26 = vpop.f32.mrb[3].mxu0  ;;  %v175_v28 = vadd.f32 %v224_v16, %v159_v15 }
  0xe5   :  { %v154_v27 = vadd.f32 %v153_v26, %v81_v24  ;;  %v173_v30 = vadd.f32 %v220_v21, %v151_v20 }
  0xe6   :  { %v176_v29 = vadd.f32 %v225_v18, %v162_v25 }
  0xe7   :  { %v174_v31 = vadd.f32 %v221_v23, %v154_v27 }
  0xe8   :  { %v234_v32 = vpack.c.bf16 %v176_v29, %v175_v28 }
  0xe9   :  { %v229_v33 = vpack.c.bf16 %v174_v31, %v173_v30 }
  0xea   :  { %237 = vst [vmem:[%s321_s4 + $0x8] sm:$0xff] %v234_v32  }
  0xeb   :  { %230 = vst [vmem:[%s321_s4] sm:$0xff] %v229_v33  }

// kernel: feature_net.21
= control target key start
LH: loop header
LB: loop body
LE: loop exit
PB: predicated region body
PF: predicated region fallthrough
CT: control target
= control target key end

     0   :  { %s657_s15 = smov 0   ;;  %s659_s16 = smov 0   ;;  %s742_s0 = inlined_call_operand.vmem [shape: bf16[32,8], index: 0, kind: input, shape index: {}]   ;;  %s743_s1 = inlined_call_operand.vmem [shape: bf16[8,640], index: 1, kind: input, shape index: {}]   ;;  %s744_s2 = inlined_call_operand.vmem [shape: f32[32,1], index: 2, kind: input, shape index: {}]   ;;  %s745_s3 = inlined_call_operand.vmem [shape: bf16[32,512], index: 3, kind: input, shape index: {}]   ;;  %s746_s4 = inlined_call_operand.vmem [shape: bf16[32,512], index: 4, kind: output, shape index: {}]  }
   0x1   :  { %s661_s17 = smov 0  }
   0x2 LB: > { %s673_s18 = sadd.s32 4294967295, %s629_s17   ;;  %s676_s19 = sadd.s32 1, %s629_s17   ;;  %s629_s17 = sphi %s661_s17, %s750_s17   ;;  %s625_s16 = sphi %s659_s16, %s749_s16   ;;  %s621_s15 = sphi %s657_s15, %s748_s15  }
   0x3   : > { %s86_s20 = ssub.s32 %s629_s17, %s676_s19  ;;  %s89_s21 = sadd.s32 1, %s625_s16 }
   0x4   : > { %p87_p0 = scmp.eq.s32.totalorder %s86_s20, 0  ;;  %p96_p1 = scmp.ne.s32.totalorder %s625_s16, %s621_s15 }
   0x5   : > { %p97_p2 = scmp.eq.s32.totalorder %s629_s17, 0  ;;  %p126_p3 = scmp.eq.s32.totalorder %s673_s18, 3 }
   0x6   : > { %s686_s22 = scalar_select %p87_p0, %s625_s16, %s89_s21  }
   0x7   : > { %p98_p4 = por %p97_p2, %p96_p1  ;;  %p688_p5 = por %p126_p3, %p96_p1 }
   0x8   : > { %p525_p6 = scmp.ge.s32.totalorder %s629_s17, 4 }
   0xa   : > { %154 = sbr.rel (%p525_p6) target bundleno = 24 (0x18), region = 24 }
  0x11   : > { %164 = sbr.rel (!%p98_p4) target bundleno = 24 (0x18), region = 32  ;;  %s166_s24 = sand.u32 (%p98_p4), 1, %s625_s16  }
  0x12   : > { %s527_s25 = sshll.u32 (%p98_p4), %s629_s17, 2  ;;  %s526_s26 = sshll.u32 (%p98_p4), %s166_s24, 4 }
  0x13   : > { %s170_s29 = scalar_lea.vmem (%p98_p4), %s745_s3, %s527_s25  ;;  %s168_s30 = scalar_lea.vmem (%p98_p4), [#allocation2], %s526_s26 }
  0x14   : > { %v186_v0 = vld [vmem:[%s170_s29] sm:$0xf] (%p98_p4)  ;;  %v188_v1 = vld [vmem:[%s170_s29 + $0x10] sm:$0xf] (%p98_p4) }
  0x15   : > { %187 = vst [vmem:[%s168_s30] sm:$0xf] (%p98_p4), %v186_v0  ;;  %189 = vst [vmem:[%s168_s30 + $0x4] sm:$0xf] (%p98_p4), %v188_v1  ;;  %v190_v2 = vld [vmem:[%s170_s29 + $0x20] sm:$0xf] (%p98_p4) }
  0x16   : > { %v192_v3 = vld [vmem:[%s170_s29 + $0x30] sm:$0xf] (%p98_p4)  ;;  %191 = vst [vmem:[%s168_s30 + $0x8] sm:$0xf] (%p98_p4), %v190_v2 }
  0x17   : > { %193 = vst [vmem:[%s168_s30 + $0xc] sm:$0xf] (%p98_p4), %v192_v3 }
  0x18 PF: > { %p528_p7 = scmp.ge.s32.totalorder %s629_s17, 1  ;;  %p223_p8 = scmp.lt.s32.totalorder %s629_s17, 5 }
  0x1a   : > { %p224_p9 = pnand %p528_p7, %p223_p8 }
  0x1b   : > { %p258_p10 = scmp.lt.s32.totalorder (!%p224_p9), %s673_s18, 4  ;;  %v605_v4 = vld [vmem:[%s742_s0] sm:$0xff] (!%p224_p9)   ;;  %vm302_vm0 = vcmask (!%p224_p9), 64512   ;;  %v270_v5 = vld [vmem:[%s744_s2 + $0x10] sm:$0xff] (!%p224_p9)  ;;  %v631_v7 = vmov (!%p224_p9), 0   ;;  %vm309_vm1 = vcmask (!%p224_p9), 1043456  }
  0x1c   : > { %227 = sbr.rel (%p224_p9) target bundleno = 275 (0x113), region = 73  ;;  %v268_v6 = vld [vmem:[%s744_s2] sm:$0xff] (!%p224_p9)  ;;  %573 = vmatprep.mubr.msk.bf16.mxu0 (!%p224_p9), %vm302_vm0, %v605_v4  ;;  %604 = vset.pattern.permute.xlu1 (!%p224_p9), %v631_v7  ;;  %v271_v8 = vld [vmem:[%s744_s2 + $0x18] sm:$0xff] (!%p224_p9)  ;;  %v269_v10 = vld [vmem:[%s744_s2 + $0x8] sm:$0xff] (!%p224_p9)  ;;  %s230_s28 = sand.u32 (!%p224_p9), 1, %s621_s15  }
  0x1d   : > { %603 = vset.pattern.permute.xlu0 (!%p224_p9), %v631_v7  ;;  %284 = vperm.xlu1 (!%p224_p9), %604, %v270_v5   ;;  %v606_v12 = vld [vmem:[%s742_s0 + $0x8] sm:$0xff] (!%p224_p9)   ;;  %s529_s29 = sshll.u32 (!%p224_p9), %s230_s28, 4 }
  0x1e   : > { %274 = vperm.xlu0 (!%p224_p9), %603, %v268_v6   ;;  %s232_s30 = scalar_lea.vmem (!%p224_p9), [#allocation2], %s529_s29  ;;  %s257_s15 = scalar_lea.vmem (!%p224_p9), [#allocation3], %s529_s29 }
  0x1f   : > { %v566_v15 = vld [vmem:[%s232_s30 + $0x8] sm:$0xff] (!%p224_p9)   ;;  %v549_v16 = vld [vmem:[%s232_s30] sm:$0xff] (!%p224_p9)  }
  0x20   : > { %v554_v19 = vunpack.c.l.bf16 (!%p224_p9), %v566_v15  ;;  %v555_v21 = vunpack.c.h.bf16 (!%p224_p9), %v566_v15  ;;  %v550_v24 = vunpack.c.l.bf16 (!%p224_p9), %v549_v16  ;;  %v551_v26 = vunpack.c.h.bf16 (!%p224_p9), %v549_v16 }
  0x21   : > { %289 = vperm.xlu1 (!%p224_p9), %604, %v271_v8  }
  0x22   : > { %279 = vperm.xlu0 (!%p224_p9), %603, %v269_v10  }
  0x23   : > { %s259_s7 = scalar_select %p258_p10, %s673_s18, 4 }
  0x24   : > { %s541_s5 = sshll.u32 (%p688_p5), %s673_s18, 2 }
  0x25   : > { %s531_s12 = sshll.u32 %s259_s7, 2  ;;  %s402_s8 = scalar_lea.vmem (%p688_p5), %s746_s4, %s541_s5 }
  0x26   : > { %s261_s17 = scalar_lea.vmem %s743_s1, %s531_s12 }
  0x27   : > { %v263_v9 = vld [vmem:[%s261_s17] sm:$0xf] }
  0x28   : > { %577 = vmatprep.subr.msk.bf16.mxu0 %vm309_vm1, %v263_v9  ;;  %v311_v11 = vsel %vm309_vm1, %v263_v9, 0 }
  0x29   : > { %572 = vmatpush3.bf16.msra.mxu0 %v311_v11 }
  0x2c   : > { %574 = vmatmul.mubr.msk.bf16.vlgmr.msra.gmra.mrb[0].mxu0 %vm302_vm0, %v606_v12 }
  0x9c   : > { %v285_v13 = vpop.permute.xlu1 %284 }
  0x9d   : > { %v275_v14 = vpop.permute.xlu0 %274 }
  0xa0   : > { %v290_v22 = vpop.permute.xlu1 %289 }
  0xa1   : > { %v280_v27 = vpop.permute.xlu0 %279 }
  0xff   : > { %v575_v17 = vpop.f32.mrb[0].mxu0 }
 0x100   : > { %v356_v18 = vadd.f32 %v575_v17, %v285_v13  ;;  %v347_v20 = vpop.f32.mrb[1].mxu0 }
 0x101   : > { %v348_v23 = vadd.f32 %v347_v20, %v275_v14  ;;  %v576_v25 = vpop.f32.mrb[2].mxu0 }
 0x102   : > { %v359_v28 = vadd.f32 %v576_v25, %v290_v22  ;;  %v350_v29 = vpop.f32.mrb[3].mxu0  ;;  %v372_v31 = vadd.f32 %v554_v19, %v356_v18 }
 0x103   : > { %v351_v30 = vadd.f32 %v350_v29, %v280_v27  ;;  %v370_v33 = vadd.f32 %v550_v24, %v348_v23  ;;  %400 = sbr.rel (!%p688_p5) target bundleno = 275 (0x113), region = 81 }
 0x104   : > { %v373_v32 = vadd.f32 %v555_v21, %v359_v28 }
 0x105   : > { %v371_v34 = vadd.f32 %v551_v26, %v351_v30 }
 0x106   : > { %v564_v35 = vpack.c.bf16 %v373_v32, %v372_v31 }
 0x107   : > { %v559_v36 = vpack.c.bf16 %v371_v34, %v370_v33 }
 0x108   : > { %567 = vst [vmem:[%s257_s15 + $0x8] sm:$0xff] %v564_v35  }
 0x109   : > { %560 = vst [vmem:[%s257_s15] sm:$0xff] %v559_v36  }
 0x10f   : > { %v422_v39 = vld [vmem:[%s257_s15 + $0x8] sm:$0xf]  ;;  %v424_v40 = vld [vmem:[%s257_s15 + $0xc] sm:$0xf] }
 0x110   : > { %v418_v37 = vld [vmem:[%s257_s15] sm:$0xf]  ;;  %v420_v38 = vld [vmem:[%s257_s15 + $0x4] sm:$0xf]  ;;  %423 = vst [vmem:[%s402_s8 + $0x20] sm:$0xf] %v422_v39 }
 0x111   : > { %419 = vst [vmem:[%s402_s8] sm:$0xf] %v418_v37  ;;  %421 = vst [vmem:[%s402_s8 + $0x10] sm:$0xf] %v420_v38 }
 0x112   : > { %425 = vst [vmem:[%s402_s8 + $0x30] sm:$0xf] %v424_v40 }
 0x113 PF: > { %p11_p11 = scmp.ge.s32.totalorder %s676_s19, 6   ;;  %s748_s15 = smov %s625_s16 }
 0x114   : > { %s749_s16 = smov %s686_s22  ;;  %s750_s17 = smov %s676_s19 }
 0x115   :  { %13 = sbr.rel (!%p11_p11) target bundleno = 2 (0x2), region = 156 }

// kernel: feature_net.23
= control target key start
LH: loop header
LB: loop body
LE: loop exit
PB: predicated region body
PF: predicated region fallthrough
CT: control target
= control target key end

     0   :  { %s1156_s15 = smov 0   ;;  %s1158_s16 = smov 0   ;;  %s1348_s0 = inlined_call_operand.vmem [shape: bf16[8,288], index: 0, kind: input, shape index: {}]   ;;  %s1349_s1 = inlined_call_operand.vmem [shape: bf16[32,1024], index: 1, kind: input, shape index: {}]   ;;  %s1350_s2 = inlined_call_operand.vmem [shape: bf16[3,32,128], index: 2, kind: input, shape index: {}]   ;;  %s1351_s3 = inlined_call_operand.vmem [shape: f32[8,1], index: 3, kind: input, shape index: {}]   ;;  %s1352_s4 = inlined_call_operand.vmem [shape: f32[8,768], index: 4, kind: output, shape index: {}]  }
   0x1   :  { %s1160_s17 = smov 0  }
   0x2 LB: > { %s1172_s18 = sadd.s32 4294967295, %s1117_s17   ;;  %s1175_s19 = sadd.s32 1, %s1117_s17   ;;  %s1117_s17 = sphi %s1160_s17, %s1355_s17   ;;  %s1113_s16 = sphi %s1158_s16, %s1354_s16   ;;  %s1109_s15 = sphi %s1156_s15, %s1353_s15  }
   0x3   : > { %s39_s20 = ssub.s32 %s1117_s17, %s1175_s19  ;;  %s42_s21 = sadd.s32 1, %s1113_s16 }
   0x4   : > { %p40_p0 = scmp.eq.s32.totalorder %s39_s20, 0  ;;  %p49_p1 = scmp.ne.s32.totalorder %s1113_s16, %s1109_s15 }
   0x5   : > { %p50_p2 = scmp.eq.s32.totalorder %s1117_s17, 0  ;;  %p1017_p4 = scmp.ge.s32.totalorder %s1117_s17, 3 }
   0x6   : > { %s1184_s22 = scalar_select %p40_p0, %s1113_s16, %s42_s21  }
   0x7   : > { %p51_p3 = por %p50_p2, %p49_p1  ;;  %154 = sbr.rel (%p1017_p4) target bundleno = 22 (0x16), region = 24 }
   0xe   : > { %157 = sbr.rel (!%p51_p3) target bundleno = 22 (0x16), region = 28  ;;  %s159_s23 = sand.u32 (%p51_p3), 1, %s1113_s16  }
   0xf   : > { %s1046_s24 = sshll.u32 (%p51_p3), %s1117_s17, 3  ;;  %s1018_s25 = sshll.u32 (%p51_p3), %s159_s23, 5 }
  0x10   : > { %s164_s28 = scalar_lea.vmem (%p51_p3), %s1349_s1, %s1046_s24  ;;  %s161_s29 = scalar_lea.vmem (%p51_p3), [#allocation3], %s1018_s25 }
  0x11   : > { %v198_v0 = vld [vmem:[%s164_s28] sm:$0xff] (%p51_p3) }
  0x12   : > { %v200_v1 = vld [vmem:[%s164_s28 + $0x20] sm:$0xff] (%p51_p3)  ;;  %199 = vst [vmem:[%s161_s29] sm:$0xff] (%p51_p3), %v198_v0 }
  0x13   : > { %v202_v2 = vld [vmem:[%s164_s28 + $0x40] sm:$0xff] (%p51_p3)  ;;  %201 = vst [vmem:[%s161_s29 + $0x8] sm:$0xff] (%p51_p3), %v200_v1 }
  0x14   : > { %203 = vst [vmem:[%s161_s29 + $0x10] sm:$0xff] (%p51_p3), %v202_v2  ;;  %v204_v3 = vld [vmem:[%s164_s28 + $0x60] sm:$0xff] (%p51_p3) }
  0x15   : > { %205 = vst [vmem:[%s161_s29 + $0x18] sm:$0xff] %v204_v3 }
  0x16 PF: > { %p1021_p5 = scmp.ge.s32.totalorder %s1117_s17, 1  ;;  %p218_p6 = scmp.lt.s32.totalorder %s1117_s17, 4 }
  0x18   : > { %p219_p7 = pnand %p1021_p5, %p218_p6 }
  0x19   : > { %s225_s30 = sand.u32 (!%p219_p7), 1, %s1109_s15   ;;  %p256_p8 = scmp.lt.s32.totalorder (!%p219_p7), %s1172_s18, 2  ;;  %v1120_v8 = vmov (!%p219_p7), 0   ;;  %vm357_vm0 = vcmask (!%p219_p7), 261120   ;;  %v318_v11 = vld [vmem:[%s1348_s0] sm:$0xf] (!%p219_p7) }
  0x1a   : > { %222 = sbr.rel (%p219_p7) target bundleno = 475 (0x1db), region = 70  ;;  %s1022_s5 = sshll.u32 (!%p219_p7), %s225_s30, 5  ;;  %393 = vmatprep.mubr.bf16.mxu0 (!%p219_p7), %v1120_v8  ;;  %437 = vmatprep.mubr.bf16.mxu1 (!%p219_p7), %v1120_v8  ;;  %v1033_v12 = vcombine.low (!%p219_p7), %v318_v11, %v318_v11  ;;  %v1265_v13 = vld [vmem:[%s1348_s0 + $0x4] sm:$0xf] (!%p219_p7)  ;;  %vm348_vm1 = vcmask (!%p219_p7), 1039360   ;;  %vm460_vm2 = vcmask (!%p219_p7), 1031168  }
  0x1b   : > { %s227_s6 = scalar_lea.vmem (!%p219_p7), [#allocation3], %s1022_s5  ;;  %s1119_s8 = smov (!%p219_p7), 127   ;;  %1084 = vset.pattern.permute.xlu0 (!%p219_p7), %v1120_v8  ;;  %v1039_v14 = vcombine.low (!%p219_p7), %v1265_v13, %v1265_v13  ;;  %v930_v15 = vld [vmem:[%s1351_s3] sm:$0xff] (!%p219_p7)  ;;  %vm529_vm3 = vcmask (!%p219_p7), 900096   ;;  %vm597_vm4 = vcmask (!%p219_p7), 891904   ;;  %vm669_vm5 = vcmask (!%p219_p7), 883712  }
  0x1c   : > { %v1196_v4 = vld [vmem:[%s227_s6 + $0x4] ss:$8 sps:$4 sm:$0xff] (!%p219_p7)   ;;  %v1199_v5 = vld [vmem:[%s227_s6] ss:$8 sps:$4 sm:$0xff] (!%p219_p7)   ;;  %v1202_v6 = vld [vmem:[%s227_s6 + $0x14] ss:$8 sps:$4 sm:$0xff] (!%p219_p7)  }
  0x1d   : > { %338 = vrot.lane.b32.xlu0 (!%p219_p7), %v1196_v4, %s1119_s8  ;;  %405 = vmatprep.subr.bf16.mxu1 (!%p219_p7), %v1196_v4  ;;  %v1214_v9 = vld [vmem:[%s227_s6 + $0x10] ss:$8 sps:$4 sm:$0xff] (!%p219_p7)   ;;  %s1121_s15 = smov (!%p219_p7), 126   ;;  %s1122_s17 = smov (!%p219_p7), 96   ;;  %vm738_vm6 = vcmask (!%p219_p7), 752640   ;;  %vm807_vm7 = vcmask (!%p219_p7), 744448  }
  0x1e   : > { %336 = vrot.lane.b32.xlu1 (!%p219_p7), %v1199_v5, %s1119_s8  ;;  %406 = vmatpush1.bf16.msra.mxu1 (!%p219_p7), %v1199_v5  ;;  %s1123_s20 = smov (!%p219_p7), 110   ;;  %s1124_s21 = smov (!%p219_p7), 109   ;;  %vm875_vm8 = vcmask (!%p219_p7), 736256  }
  0x1f   : > { %407 = vmatprep.subr.bf16.mxu1 (!%p219_p7), %v1202_v6  ;;  %s1125_s23 = smov (!%p219_p7), 64   ;;  %s1126_s24 = smov (!%p219_p7), 108  }
  0x20   : > { %s1127_s25 = smov (!%p219_p7), 32   ;;  %s1128_s26 = smov (!%p219_p7), 92  }
  0x21   : > { %s257_s7 = scalar_select %p256_p8, %s1172_s18, 2 }
  0x22   : > { %344 = vrot.lane.b32.xlu1 %v1202_v6, %s1119_s8  ;;  %408 = vmatpush1.bf16.msra.mxu1 %v1214_v9  ;;  %s1129_s29 = smov 91   ;;  %s1130_s30 = smov 90  }
  0x23   : > { %s1047_s9 = sshll.u32 %s257_s7, 4 }
  0x24   : > { %s260_s12 = scalar_lea.vmem %s1350_s2, %s1047_s9  ;;  %s1025_s9 = sshll.u32 %s1172_s18, 1 }
  0x25   : > { %v1210_v7 = vld [vmem:[%s260_s12] sm:$0xff]   ;;  %v1219_v10 = vld [vmem:[%s260_s12 + $0x8] sm:$0xff]   ;;  %1035 = vmatmul.mubr.msk.bf16.vlgmr.msra.gmra.mrb[0].mxu1 %vm357_vm0, %v318_v11  ;;  %p262_p9 = scmp.lt.s32.totalorder %s1025_s9, 5 }
  0x26   : > { %340 = vrot.lane.b32.xlu0 %v1210_v7, %s1119_s8  ;;  %342 = vrot.lane.b32.xlu1 %v1214_v9, %s1119_s8 }
  0x27   : > { %573 = vmatprep.mubr.bf16.mxu1 %v1120_v8  ;;  %s1357_s9 = smov (!%p262_p9, %s1025_s9), 5 }
  0x28   : > { %s1026_s10 = sshll.u32 %s1357_s9, 3 }
  0x29   : > { %s265_s13 = scalar_lea.vmem %s1352_s4, %s1026_s10 }
  0x2a   : > { %346 = vrot.lane.b32.xlu0 %v1219_v10, %s1119_s8  ;;  %452 = vrot.lane.b32.xlu1 %v1210_v7, %s1121_s15 }
  0x2e   : > { %450 = vrot.lane.b32.xlu0 %v1196_v4, %s1121_s15  ;;  %448 = vrot.lane.b32.xlu1 %v1199_v5, %s1121_s15 }
  0x32   : > { %328 = vrot.lane.b32.xlu0 %v1033_v12, %s1122_s17  ;;  %458 = vrot.lane.b32.xlu1 %v1219_v10, %s1121_s15 }
  0x36   : > { %456 = vrot.lane.b32.xlu0 %v1202_v6, %s1121_s15  ;;  %519 = vrot.lane.b32.xlu1 %v1196_v4, %s1123_s20 }
  0x3a   : > { %454 = vrot.lane.b32.xlu0 %v1214_v9, %s1121_s15  ;;  %517 = vrot.lane.b32.xlu1 %v1199_v5, %s1123_s20 }
  0x3e   : > { %521 = vrot.lane.b32.xlu0 %v1210_v7, %s1123_s20  ;;  %589 = vrot.lane.b32.xlu1 %v1210_v7, %s1124_s21 }
  0x42   : > { %587 = vrot.lane.b32.xlu0 %v1196_v4, %s1124_s21  ;;  %585 = vrot.lane.b32.xlu1 %v1199_v5, %s1124_s21 }
  0x46   : > { %446 = vrot.lane.b32.xlu0 %v1033_v12, %s1125_s23  ;;  %527 = vrot.lane.b32.xlu1 %v1219_v10, %s1123_s20 }
  0x4a   : > { %525 = vrot.lane.b32.xlu0 %v1202_v6, %s1123_s20  ;;  %593 = vrot.lane.b32.xlu1 %v1202_v6, %s1124_s21 }
  0x4e   : > { %523 = vrot.lane.b32.xlu0 %v1214_v9, %s1123_s20  ;;  %591 = vrot.lane.b32.xlu1 %v1214_v9, %s1124_s21 }
  0x52   : > { %595 = vrot.lane.b32.xlu0 %v1219_v10, %s1124_s21  ;;  %661 = vrot.lane.b32.xlu1 %v1210_v7, %s1126_s24 }
  0x56   : > { %659 = vrot.lane.b32.xlu0 %v1196_v4, %s1126_s24  ;;  %657 = vrot.lane.b32.xlu1 %v1199_v5, %s1126_s24 }
  0x5a   : > { %515 = vrot.lane.b32.xlu0 %v1033_v12, %s1127_s25  ;;  %730 = vrot.lane.b32.xlu1 %v1210_v7, %s1128_s26 }
  0x5e   : > { %728 = vrot.lane.b32.xlu0 %v1196_v4, %s1128_s26  ;;  %665 = vrot.lane.b32.xlu1 %v1202_v6, %s1126_s24 }
  0x62   : > { %726 = vrot.lane.b32.xlu0 %v1199_v5, %s1128_s26  ;;  %663 = vrot.lane.b32.xlu1 %v1214_v9, %s1126_s24 }
  0x66   : > { %667 = vrot.lane.b32.xlu0 %v1219_v10, %s1126_s24  ;;  %736 = vrot.lane.b32.xlu1 %v1219_v10, %s1128_s26 }
  0x6a   : > { %734 = vrot.lane.b32.xlu0 %v1202_v6, %s1128_s26  ;;  %797 = vrot.lane.b32.xlu1 %v1196_v4, %s1129_s29 }
  0x6e   : > { %732 = vrot.lane.b32.xlu0 %v1214_v9, %s1128_s26  ;;  %655 = vrot.lane.b32.xlu1 %v1039_v14, %s1122_s17 }
  0x72   : > { %799 = vrot.lane.b32.xlu0 %v1210_v7, %s1129_s29  ;;  %865 = vrot.lane.b32.xlu1 %v1196_v4, %s1130_s30 }
  0x76   : > { %795 = vrot.lane.b32.xlu0 %v1199_v5, %s1129_s29  ;;  %724 = vrot.lane.b32.xlu1 %v1039_v14, %s1125_s23 }
  0x7a   : > { %867 = vrot.lane.b32.xlu0 %v1210_v7, %s1130_s30  ;;  %803 = vrot.lane.b32.xlu1 %v1202_v6, %s1129_s29 }
  0x7e   : > { %863 = vrot.lane.b32.xlu0 %v1199_v5, %s1130_s30  ;;  %801 = vrot.lane.b32.xlu1 %v1214_v9, %s1129_s29 }
  0x82   : > { %805 = vrot.lane.b32.xlu0 %v1219_v10, %s1129_s29  ;;  %873 = vrot.lane.b32.xlu1 %v1219_v10, %s1130_s30 }
  0x86   : > { %871 = vrot.lane.b32.xlu0 %v1202_v6, %s1130_s30  ;;  %793 = vrot.lane.b32.xlu1 %v1039_v14, %s1127_s25 }
  0x8a   : > { %869 = vrot.lane.b32.xlu0 %v1214_v9, %s1130_s30 }
  0x8e   : > { %933 = vperm.xlu0 %1084, %v930_v15  }
  0x8f   : > { %v339_v16 = vpop.permute.xlu0 %338 }
  0x90   : > { %v337_v17 = vpop.permute.xlu1 %336 }
  0x91   : > { %v349_v21 = vsel %vm348_vm1, %v337_v17, %v339_v16 }
  0x94   : > { %v345_v19 = vpop.permute.xlu1 %344 }
  0x98   : > { %v341_v18 = vpop.permute.xlu0 %340  ;;  %v343_v23 = vpop.permute.xlu1 %342 }
  0x99   : > { %v350_v20 = vsel %vm348_vm1, %v339_v16, %v341_v18  ;;  %v351_v25 = vsel %vm348_vm1, %v343_v23, %v345_v19 }
  0x9a   : > { %361 = vmatprep.subr.bf16.mxu0 %v350_v20 }
  0x9b   : > { %362 = vmatpush1.bf16.msra.mxu0 %v349_v21 }
  0x9c   : > { %v347_v22 = vpop.permute.xlu0 %346  ;;  %v453_v27 = vpop.permute.xlu1 %452 }
  0x9d   : > { %v352_v24 = vsel %vm348_vm1, %v345_v19, %v347_v22 }
  0x9e   : > { %363 = vmatprep.subr.bf16.mxu0 %v352_v24 }
  0x9f   : > { %364 = vmatpush1.bf16.msra.mxu0 %v351_v25 }
  0xa0   : > { %v451_v26 = vpop.permute.xlu0 %450  ;;  %v449_v30 = vpop.permute.xlu1 %448 }
  0xa1   : > { %v462_v28 = vsel %vm460_vm2, %v451_v26, %v453_v27  ;;  %v461_v31 = vsel %vm460_vm2, %v449_v30, %v451_v26 }
  0xa2   : > { %472 = vmatprep.subr.bf16.mxu0 %v462_v28 }
  0xa4   : > { %v329_v29 = vpop.permute.xlu0 %328  ;;  %v459_v33 = vpop.permute.xlu1 %458 }
  0xa5   : > { %1034 = vmatmul.mubr.msk.bf16.vlgmr.msra.gmra.mrb[0].mxu0 %vm357_vm0, %v329_v29 }
  0xa6   : > { %504 = vmatprep.mubr.bf16.mxu0 %v1120_v8  ;;  %473 = vmatpush1.bf16.msra.mxu0 %v461_v31 }
  0xa8   : > { %v457_v32 = vpop.permute.xlu0 %456  ;;  %v520_v37 = vpop.permute.xlu1 %519 }
  0xa9   : > { %v464_v34 = vsel %vm460_vm2, %v457_v32, %v459_v33 }
  0xaa   : > { %474 = vmatprep.subr.bf16.mxu0 %v464_v34 }
  0xac   : > { %v455_v35 = vpop.permute.xlu0 %454  ;;  %v518_v39 = vpop.permute.xlu1 %517 }
  0xad   : > { %v463_v36 = vsel %vm460_vm2, %v455_v35, %v457_v32  ;;  %v530_v41 = vsel %vm529_vm3, %v518_v39, %v520_v37  ;;  %v862_v39 = vld [vmem:[%s1348_s0 + $0x8] sm:$0xf] }
  0xae   : > { %475 = vmatpush1.bf16.msra.mxu0 %v463_v36 }
  0xb0   : > { %v522_v38 = vpop.permute.xlu0 %521  ;;  %v590_v43 = vpop.permute.xlu1 %589 }
  0xb1   : > { %v531_v40 = vsel %vm529_vm3, %v520_v37, %v522_v38 }
  0xb2   : > { %541 = vmatprep.subr.bf16.mxu1 %v531_v40 }
  0xb3   : > { %542 = vmatpush1.bf16.msra.mxu1 %v530_v41 }
  0xb4   : > { %v588_v42 = vpop.permute.xlu0 %587  ;;  %v586_v46 = vpop.permute.xlu1 %585 }
  0xb5   : > { %v599_v44 = vsel %vm597_vm4, %v588_v42, %v590_v43  ;;  %v598_v47 = vsel %vm597_vm4, %v586_v46, %v588_v42 }
  0xb6   : > { %609 = vmatprep.subr.bf16.mxu0 %v599_v44 }
  0xb8   : > { %v447_v45 = vpop.permute.xlu0 %446  ;;  %v528_v49 = vpop.permute.xlu1 %527 }
  0xb9   : > { %1036 = vmatmul.mubr.msk.bf16.vlgmr.msra.gmra.mrb[4].mxu0 %vm357_vm0, %v447_v45 }
  0xba   : > { %641 = vmatprep.mubr.bf16.mxu0 %v1120_v8  ;;  %610 = vmatpush1.bf16.msra.mxu0 %v598_v47 }
  0xbc   : > { %v526_v48 = vpop.permute.xlu0 %525  ;;  %v594_v53 = vpop.permute.xlu1 %593 }
  0xbd   : > { %v533_v50 = vsel %vm529_vm3, %v526_v48, %v528_v49 }
  0xbe   : > { %543 = vmatprep.subr.bf16.mxu1 %v533_v50 }
  0xc0   : > { %v524_v51 = vpop.permute.xlu0 %523  ;;  %v592_v55 = vpop.permute.xlu1 %591 }
  0xc1   : > { %v532_v52 = vsel %vm529_vm3, %v524_v51, %v526_v48  ;;  %v600_v57 = vsel %vm597_vm4, %v592_v55, %v594_v53 }
  0xc2   : > { %544 = vmatpush1.bf16.msra.mxu1 %v532_v52 }
  0xc4   : > { %v596_v54 = vpop.permute.xlu0 %595  ;;  %v662_v59 = vpop.permute.xlu1 %661 }
  0xc5   : > { %v601_v56 = vsel %vm597_vm4, %v594_v53, %v596_v54 }
  0xc6   : > { %611 = vmatprep.subr.bf16.mxu0 %v601_v56 }
  0xc7   : > { %612 = vmatpush1.bf16.msra.mxu0 %v600_v57 }
  0xc8   : > { %v660_v58 = vpop.permute.xlu0 %659  ;;  %v658_v62 = vpop.permute.xlu1 %657 }
  0xc9   : > { %v671_v60 = vsel %vm669_vm5, %v660_v58, %v662_v59  ;;  %v670_v63 = vsel %vm669_vm5, %v658_v62, %v660_v58 }
  0xca   : > { %1038 = vmatmul.mubr.msk.bf16.vlgmr.msra.gmra.mrb[8].mxu0 %vm357_vm0, %v1265_v13  ;;  %681 = vmatprep.subr.bf16.mxu1 %v671_v60 }
  0xcb   : > { %782 = vmatprep.mubr.bf16.mxu0 %v1120_v8 }
  0xcc   : > { %v516_v61 = vpop.permute.xlu0 %515  ;;  %v731_v1 = vpop.permute.xlu1 %730 }
  0xcd   : > { %1037 = vmatmul.mubr.msk.bf16.vlgmr.msra.gmra.mrb[4].mxu1 %vm357_vm0, %v516_v61 }
  0xce   : > { %713 = vmatprep.mubr.bf16.mxu1 %v1120_v8  ;;  %682 = vmatpush1.bf16.msra.mxu1 %v670_v63 }
  0xd0   : > { %v729_v0 = vpop.permute.xlu0 %728  ;;  %v666_v5 = vpop.permute.xlu1 %665 }
  0xd1   : > { %v740_v2 = vsel %vm738_vm6, %v729_v0, %v731_v1 }
  0xd2   : > { %750 = vmatprep.subr.bf16.mxu0 %v740_v2 }
  0xd4   : > { %v727_v3 = vpop.permute.xlu0 %726  ;;  %v664_v7 = vpop.permute.xlu1 %663 }
  0xd5   : > { %v739_v4 = vsel %vm738_vm6, %v727_v3, %v729_v0  ;;  %v672_v10 = vsel %vm669_vm5, %v664_v7, %v666_v5 }
  0xd6   : > { %751 = vmatpush1.bf16.msra.mxu0 %v739_v4 }
  0xd8   : > { %v668_v6 = vpop.permute.xlu0 %667  ;;  %v737_v12 = vpop.permute.xlu1 %736 }
  0xd9   : > { %v673_v9 = vsel %vm669_vm5, %v666_v5, %v668_v6 }
  0xda   : > { %683 = vmatprep.subr.bf16.mxu1 %v673_v9 }
  0xdb   : > { %684 = vmatpush1.bf16.msra.mxu1 %v672_v10 }
  0xdc   : > { %v735_v11 = vpop.permute.xlu0 %734  ;;  %v798_v16 = vpop.permute.xlu1 %797 }
  0xdd   : > { %v742_v13 = vsel %vm738_vm6, %v735_v11, %v737_v12 }
  0xde   : > { %752 = vmatprep.subr.bf16.mxu0 %v742_v13 }
  0xe0   : > { %v733_v14 = vpop.permute.xlu0 %732  ;;  %v656_v18 = vpop.permute.xlu1 %655 }
  0xe1   : > { %v741_v15 = vsel %vm738_vm6, %v733_v14, %v735_v11  ;;  %1040 = vmatmul.mubr.msk.bf16.vlgmr.msra.gmra.mrb[8].mxu1 %vm357_vm0, %v656_v18 }
  0xe2   : > { %753 = vmatpush1.bf16.msra.mxu0 %v741_v15  ;;  %851 = vmatprep.mubr.bf16.mxu1 %v1120_v8 }
  0xe4   : > { %v800_v17 = vpop.permute.xlu0 %799  ;;  %v866_v22 = vpop.permute.xlu1 %865 }
  0xe5   : > { %v809_v19 = vsel %vm807_vm7, %v798_v16, %v800_v17 }
  0xe6   : > { %819 = vmatprep.subr.bf16.mxu1 %v809_v19 }
  0xe8   : > { %v796_v20 = vpop.permute.xlu0 %795  ;;  %v725_v24 = vpop.permute.xlu1 %724 }
  0xe9   : > { %v808_v21 = vsel %vm807_vm7, %v796_v20, %v798_v16  ;;  %1041 = vmatmul.mubr.msk.bf16.vlgmr.msra.gmra.mrb[12].mxu0 %vm357_vm0, %v725_v24 }
  0xea   : > { %820 = vmatpush1.bf16.msra.mxu1 %v808_v21  ;;  %919 = vmatprep.mubr.bf16.mxu0 %v1120_v8 }
  0xec   : > { %v868_v23 = vpop.permute.xlu0 %867  ;;  %v804_v28 = vpop.permute.xlu1 %803 }
  0xed   : > { %v877_v25 = vsel %vm875_vm8, %v866_v22, %v868_v23 }
  0xee   : > { %887 = vmatprep.subr.bf16.mxu0 %v877_v25 }
  0xf0   : > { %v864_v26 = vpop.permute.xlu0 %863  ;;  %v802_v30 = vpop.permute.xlu1 %801 }
  0xf1   : > { %v876_v27 = vsel %vm875_vm8, %v864_v26, %v866_v22  ;;  %v810_v32 = vsel %vm807_vm7, %v802_v30, %v804_v28 }
  0xf2   : > { %888 = vmatpush1.bf16.msra.mxu0 %v876_v27 }
  0xf4   : > { %v806_v29 = vpop.permute.xlu0 %805  ;;  %v874_v34 = vpop.permute.xlu1 %873 }
  0xf5   : > { %v811_v31 = vsel %vm807_vm7, %v804_v28, %v806_v29 }
  0xf6   : > { %821 = vmatprep.subr.bf16.mxu1 %v811_v31 }
  0xf7   : > { %822 = vmatpush1.bf16.msra.mxu1 %v810_v32 }
  0xf8   : > { %v872_v33 = vpop.permute.xlu0 %871  ;;  %v794_v37 = vpop.permute.xlu1 %793 }
  0xf9   : > { %v879_v35 = vsel %vm875_vm8, %v872_v33, %v874_v34  ;;  %v439_v38 = vpop.f32.mrb[0].mxu1 }
  0xfa   : > { %889 = vmatprep.subr.bf16.mxu0 %v879_v35  ;;  %1042 = vmatmul.mubr.msk.bf16.vlgmr.msra.gmra.mrb[12].mxu1 %vm357_vm0, %v794_v37  ;;  %v441_v40 = vpop.f32.mrb[1].mxu1 }
  0xfb   : > { %v443_v41 = vpop.f32.mrb[2].mxu1 }
  0xfc   : > { %v870_v36 = vpop.permute.xlu0 %869  ;;  %v444_v42 = vpop.f32.mrb[3].mxu1 }
  0xfd   : > { %v878_v8 = vsel %vm875_vm8, %v870_v36, %v872_v33 }
  0xfe   : > { %890 = vmatpush1.bf16.msra.mxu0 %v878_v8 }
 0x101   : > { %1043 = vmatmul.mubr.msk.bf16.vlgmr.msra.gmra.mrb[16].mxu0 %vm357_vm0, %v862_v39 }
 0x10d   : > { %v934_v21 = vpop.permute.xlu0 %933 }
 0x178   : > { %v395_v43 = vpop.f32.mrb[0].mxu0 }
 0x179   : > { %v440_v44 = vadd.f32 %v439_v38, %v395_v43  ;;  %v397_v45 = vpop.f32.mrb[1].mxu0 }
 0x17a   : > { %v442_v46 = vadd.f32 %v441_v40, %v397_v45  ;;  %v399_v47 = vpop.f32.mrb[2].mxu0 }
 0x17b   : > { %v400_v48 = vpop.f32.mrb[3].mxu0 }
 0x18c   : > { %v506_v49 = vpop.f32.mrb[4].mxu0 }
 0x18d   : > { %v513_v50 = vadd.f32 %v506_v49, %v440_v44  ;;  %v508_v51 = vpop.f32.mrb[5].mxu0 }
 0x18e   : > { %v514_v52 = vadd.f32 %v508_v51, %v442_v46  ;;  %v510_v53 = vpop.f32.mrb[6].mxu0 }
 0x18f   : > { %v511_v54 = vpop.f32.mrb[7].mxu0 }
 0x19d   : > { %v643_v55 = vpop.f32.mrb[8].mxu0 }
 0x19e   : > { %v645_v56 = vpop.f32.mrb[9].mxu0 }
 0x19f   : > { %v647_v57 = vpop.f32.mrb[10].mxu0 }
 0x1a0   : > { %v575_v58 = vpop.f32.mrb[4].mxu1  ;;  %v648_v59 = vpop.f32.mrb[11].mxu0 }
 0x1a1   : > { %v582_v60 = vadd.f32 %v575_v58, %v513_v50  ;;  %v577_v61 = vpop.f32.mrb[5].mxu1 }
 0x1a2   : > { %v583_v62 = vadd.f32 %v577_v61, %v514_v52  ;;  %v579_v63 = vpop.f32.mrb[6].mxu1 }
 0x1a3   : > { %v650_v0 = vadd.f32 %v643_v55, %v582_v60  ;;  %v580_v1 = vpop.f32.mrb[7].mxu1 }
 0x1a4   : > { %v651_v2 = vadd.f32 %v645_v56, %v583_v62 }
 0x1b4   : > { %v715_v3 = vpop.f32.mrb[8].mxu1 }
 0x1b5   : > { %v722_v4 = vadd.f32 %v715_v3, %v650_v0  ;;  %v717_v5 = vpop.f32.mrb[9].mxu1 }
 0x1b6   : > { %v723_v6 = vadd.f32 %v717_v5, %v651_v2  ;;  %v719_v7 = vpop.f32.mrb[10].mxu1 }
 0x1b7   : > { %v720_v9 = vpop.f32.mrb[11].mxu1 }
 0x1bc   : > { %v784_v10 = vpop.f32.mrb[12].mxu0 }
 0x1bd   : > { %v791_v11 = vadd.f32 %v784_v10, %v722_v4  ;;  %v786_v12 = vpop.f32.mrb[13].mxu0 }
 0x1be   : > { %v792_v13 = vadd.f32 %v786_v12, %v723_v6  ;;  %v788_v14 = vpop.f32.mrb[14].mxu0 }
 0x1bf   : > { %v789_v15 = vpop.f32.mrb[15].mxu0 }
 0x1cd   : > { %v853_v16 = vpop.f32.mrb[12].mxu1 }
 0x1ce   : > { %v860_v17 = vadd.f32 %v853_v16, %v791_v11  ;;  %v855_v18 = vpop.f32.mrb[13].mxu1 }
 0x1cf   : > { %v861_v19 = vadd.f32 %v855_v18, %v792_v13  ;;  %v857_v20 = vpop.f32.mrb[14].mxu1 }
 0x1d0   : > { %v858_v22 = vpop.f32.mrb[15].mxu1 }
 0x1d4   : > { %v921_v23 = vpop.f32.mrb[16].mxu0 }
 0x1d5   : > { %v928_v24 = vadd.f32 %v921_v23, %v860_v17  ;;  %v923_v25 = vpop.f32.mrb[17].mxu0 }
 0x1d6   : > { %v929_v26 = vadd.f32 %v923_v25, %v861_v19  ;;  %v925_v27 = vpop.f32.mrb[18].mxu0 }
 0x1d7   : > { %v936_v28 = vadd.f32 %v934_v21, %v928_v24  ;;  %v926_v29 = vpop.f32.mrb[19].mxu0 }
 0x1d8   : > { %v937_v30 = vadd.f32 %v934_v21, %v929_v26 }
 0x1d9   : > { %938 = vst [vmem:[%s265_s13] sm:$0xff] %v936_v28 }
 0x1da   : > { %939 = vst [vmem:[%s265_s13 + $0x8] sm:$0xff] %v937_v30 }
 0x1db PF: > { %p11_p10 = scmp.ge.s32.totalorder %s1175_s19, 5   ;;  %s1353_s15 = smov %s1113_s16 }
 0x1dc   : > { %s1354_s16 = smov %s1184_s22  ;;  %s1355_s17 = smov %s1175_s19 }
 0x1dd   :  { %13 = sbr.rel (!%p11_p10) target bundleno = 2 (0x2), region = 112 }

// kernel: feature_net.22
= control target key start
LH: loop header
LB: loop body
LE: loop exit
PB: predicated region body
PF: predicated region fallthrough
CT: control target
= control target key end

     0   :  { %s1230_s15 = smov 0   ;;  %s1232_s16 = smov 0   ;;  %s1384_s0 = inlined_call_operand.vmem [shape: bf16[16,288], index: 0, kind: input, shape index: {}]   ;;  %s1385_s1 = inlined_call_operand.vmem [shape: bf16[32,384], index: 1, kind: input, shape index: {}]   ;;  %s1386_s2 = inlined_call_operand.vmem [shape: bf16[2,32,128], index: 2, kind: input, shape index: {}]   ;;  %s1387_s3 = inlined_call_operand.vmem [shape: f32[16,1], index: 3, kind: input, shape index: {}]   ;;  %s1388_s4 = inlined_call_operand.vmem [shape: f32[16,256], index: 4, kind: output, shape index: {}]  }
   0x1   :  { %s1234_s17 = smov 0  }
   0x2 LB: > { %s1246_s18 = sadd.s32 4294967295, %s1189_s17   ;;  %s1249_s19 = sadd.s32 1, %s1189_s17   ;;  %s1189_s17 = sphi %s1234_s17, %s1392_s17   ;;  %s1185_s16 = sphi %s1232_s16, %s1391_s16   ;;  %s1181_s15 = sphi %s1230_s15, %s1390_s15  }
   0x3   : > { %s39_s20 = ssub.s32 %s1189_s17, %s1249_s19  ;;  %s42_s21 = sadd.s32 1, %s1185_s16 }
   0x4   : > { %p40_p0 = scmp.eq.s32.totalorder %s39_s20, 0  ;;  %p49_p1 = scmp.ne.s32.totalorder %s1185_s16, %s1181_s15 }
   0x5   : > { %p50_p2 = scmp.eq.s32.totalorder %s1189_s17, 0  ;;  %p126_p3 = scmp.eq.s32.totalorder %s1246_s18, 1 }
   0x6   : > { %s1259_s22 = scalar_select %p40_p0, %s1185_s16, %s42_s21  }
   0x7   : > { %p51_p4 = por %p50_p2, %p49_p1  ;;  %p1261_p5 = por %p126_p3, %p49_p1 }
   0x8   : > { %p992_p6 = scmp.ge.s32.totalorder %s1189_s17, 2 }
   0xa   : > { %154 = sbr.rel (%p992_p6) target bundleno = 24 (0x18), region = 24 }
  0x11   : > { %157 = sbr.rel (!%p51_p4) target bundleno = 24 (0x18), region = 28  ;;  %s159_s24 = sand.u32 (%p51_p4), 1, %s1185_s16  }
  0x12   : > { %s994_s25 = sshll.u32 (%p51_p4), %s1189_s17, 2  ;;  %s993_s26 = sshll.u32 (%p51_p4), %s159_s24, 4 }
  0x13   : > { %s163_s29 = scalar_lea.vmem (%p51_p4), %s1385_s1, %s994_s25  ;;  %s161_s30 = scalar_lea.vmem (%p51_p4), [#allocation3], %s993_s26 }
  0x14   : > { %v179_v0 = vld [vmem:[%s163_s29] sm:$0xf] (%p51_p4)  ;;  %v181_v1 = vld [vmem:[%s163_s29 + $0xc] sm:$0xf] (%p51_p4)  ;;  %v183_v2 = vld [vmem:[%s163_s29 + $0x18] sm:$0xf] (%p51_p4) }
  0x15   : > { %180 = vst [vmem:[%s161_s30] sm:$0xf] (%p51_p4), %v179_v0  ;;  %182 = vst [vmem:[%s161_s30 + $0x4] sm:$0xf] (%p51_p4), %v181_v1  ;;  %v185_v3 = vld [vmem:[%s163_s29 + $0x24] sm:$0xf] (%p51_p4) }
  0x16   : > { %184 = vst [vmem:[%s161_s30 + $0x8] sm:$0xf] (%p51_p4), %v183_v2  ;;  %186 = vst [vmem:[%s161_s30 + $0xc] sm:$0xf] (%p51_p4), %v185_v3 }
  0x18 PF: > { %p995_p7 = scmp.ge.s32.totalorder %s1189_s17, 1  ;;  %p224_p8 = scmp.lt.s32.totalorder %s1189_s17, 3 }
  0x1a   : > { %p225_p9 = pnand %p995_p7, %p224_p8 }
  0x1b   : > { %v1160_v4 = vld [vmem:[%s1384_s0] ss:$12 sps:$4 sm:$0xff] (!%p225_p9)   ;;  %s231_s7 = sand.u32 (!%p225_p9), 1, %s1181_s15   ;;  %s1191_s8 = smov (!%p225_p9), 96   ;;  %v1192_v5 = vmov (!%p225_p9), 0.0   ;;  %vm1194_vm0 = vmmov (!%p225_p9), 0  }
  0x1c   : > { %228 = sbr.rel (%p225_p9) target bundleno = 450 (0x1c2), region = 73  ;;  %315 = vrot.lane.b32.xlu0 (!%p225_p9), %v1160_v4, %s1191_s8  ;;  %s1278_s9 = sshll.u32 (!%p225_p9), %s231_s7, 4  ;;  %1048 = vmatprep.subr.bf16.mxu0 (!%p225_p9), %v1192_v5  ;;  %vm334_vm1 = vcmask (!%p225_p9), 261120   ;;  %v1309_v10 = vld [vmem:[%s1384_s0 + $0x4] ss:$12 sps:$4 sm:$0xff] (!%p225_p9)   ;;  %v1204_v11 = vmov (!%p225_p9), 0  }
  0x1d   : > { %1056 = vmatprep.subr.bf16.mxu1 (!%p225_p9), %v1192_v5  ;;  %s233_s10 = scalar_lea.vmem (!%p225_p9), [#allocation3], %s1278_s9  ;;  %p260_p10 = scmp.lt.s32.totalorder (!%p225_p9), %s1246_s18, 1  ;;  %1052 = vmatprep.mubr.msk.bf16.mxu0 (!%p225_p9), %vm1194_vm0, %v1192_v5  ;;  %v860_v12 = vld [vmem:[%s1387_s3] sm:$0xff] (!%p225_p9)  ;;  %v861_v13 = vld [vmem:[%s1387_s3 + $0x8] sm:$0xff] (!%p225_p9)  ;;  %vm329_vm2 = vcmask (!%p225_p9), 1039360   ;;  %vm433_vm3 = vcmask (!%p225_p9), 1031168  }
  0x1e   : > { %v1283_v6 = vld [vmem:[%s233_s10 + $0x8] sm:$0xff] (!%p225_p9)   ;;  %v1162_v7 = vld [vmem:[%s233_s10] sm:$0xff] (!%p225_p9)   ;;  %s1193_s11 = smov (!%p225_p9), 127   ;;  %1060 = vmatprep.mubr.msk.bf16.mxu1 (!%p225_p9), %vm1194_vm0, %v1192_v5  ;;  %s1195_s20 = smov (!%p225_p9), 126   ;;  %1159 = vset.pattern.permute.xlu1 (!%p225_p9), %v1204_v11  ;;  %vm494_vm4 = vcmask (!%p225_p9), 965632   ;;  %vm560_vm5 = vcmask (!%p225_p9), 957440  }
  0x1f   : > { %325 = vrot.lane.b32.xlu1 (!%p225_p9), %v1283_v6, %s1193_s11  ;;  %1057 = vmatpush3.bf16.msra.mxu1 (!%p225_p9), %v1162_v7  ;;  %s1196_s21 = smov (!%p225_p9), 118   ;;  %s1197_s24 = smov (!%p225_p9), 64   ;;  %vm621_vm6 = vcmask (!%p225_p9), 949248   ;;  %vm682_vm7 = vcmask (!%p225_p9), 883712   ;;  %vm743_vm8 = vcmask (!%p225_p9), 875520   ;;  %vm809_vm9 = vcmask (!%p225_p9), 867328  }
  0x20   : > { %321 = vrot.lane.b32.xlu0 (!%p225_p9), %v1162_v7, %s1193_s11  ;;  %1058 = vmatprep.subr.bf16.mxu1 (!%p225_p9), %v1192_v5  ;;  %s1198_s25 = smov (!%p225_p9), 117   ;;  %s1199_s26 = smov (!%p225_p9), 32   ;;  %v1166_v3 = vld [vmem:[%s1384_s0 + $0x8] ss:$12 sps:$4 sm:$0xff] (!%p225_p9)  }
  0x21   : > { %s1200_s27 = smov (!%p225_p9), 116   ;;  %s1201_s28 = smov (!%p225_p9), 108   ;;  %1158 = vset.pattern.permute.xlu0 (!%p225_p9), %v1204_v11 }
  0x22   : > { %s1202_s5 = smov (!%p225_p9), 107   ;;  %s1203_s6 = smov (!%p225_p9), 106  }
  0x23   : > { %s261_s12 = scalar_select %p260_p10, %s1246_s18, 1  ;;  %425 = vrot.lane.b32.xlu1 %v1162_v7, %s1195_s20  ;;  %1059 = vmatpush3.bf16.msra.mxu1 %v1283_v6 }
  0x24   : > { %1072 = vmatprep.subr.bf16.mxu1 %v1192_v5  ;;  %s259_s14 = scalar_lea.vmem [#allocation4], %s1278_s9  ;;  %s1017_s15 = sshll.u32 (%p1261_p5), %s1246_s18, 3 }
  0x25   : > { %s1020_s13 = sshll.u32 %s261_s12, 4 }
  0x26   : > { %s264_s17 = scalar_lea.vmem %s1386_s2, %s1020_s13  ;;  %1061 = vmatmul.mubr.msk.bf16.vlgmr.msra.gmra.mrb[0].mxu1 %vm334_vm1, %v1160_v4 }
  0x27   : > { %v1163_v8 = vld [vmem:[%s264_s17] sm:$0xff]   ;;  %v1164_v9 = vld [vmem:[%s264_s17 + $0x8] sm:$0xff]   ;;  %1076 = vmatprep.mubr.msk.bf16.mxu1 %vm1194_vm0, %v1192_v5 }
  0x28   : > { %323 = vrot.lane.b32.xlu0 %v1163_v8, %s1193_s11  ;;  %327 = vrot.lane.b32.xlu1 %v1164_v9, %s1193_s11 }
  0x2c   : > { %427 = vrot.lane.b32.xlu0 %v1163_v8, %s1195_s20  ;;  %429 = vrot.lane.b32.xlu1 %v1283_v6, %s1195_s20 }
  0x30   : > { %431 = vrot.lane.b32.xlu0 %v1164_v9, %s1195_s20  ;;  %486 = vrot.lane.b32.xlu1 %v1162_v7, %s1196_s21 }
  0x34   : > { %488 = vrot.lane.b32.xlu0 %v1163_v8, %s1196_s21  ;;  %423 = vrot.lane.b32.xlu1 %v1160_v4, %s1197_s24 }
  0x38   : > { %552 = vrot.lane.b32.xlu0 %v1162_v7, %s1198_s25  ;;  %554 = vrot.lane.b32.xlu1 %v1163_v8, %s1198_s25 }
  0x3c   : > { %490 = vrot.lane.b32.xlu0 %v1283_v6, %s1196_s21  ;;  %492 = vrot.lane.b32.xlu1 %v1164_v9, %s1196_s21  ;;  %s884_s21 = scalar_lea.vmem (%p1261_p5), %s1388_s4, %s1017_s15 }
  0x40   : > { %556 = vrot.lane.b32.xlu0 %v1283_v6, %s1198_s25  ;;  %558 = vrot.lane.b32.xlu1 %v1164_v9, %s1198_s25 }
  0x44   : > { %484 = vrot.lane.b32.xlu0 %v1160_v4, %s1199_s26  ;;  %613 = vrot.lane.b32.xlu1 %v1162_v7, %s1200_s27 }
  0x48   : > { %615 = vrot.lane.b32.xlu0 %v1163_v8, %s1200_s27  ;;  %674 = vrot.lane.b32.xlu1 %v1162_v7, %s1201_s28 }
  0x4c   : > { %676 = vrot.lane.b32.xlu0 %v1163_v8, %s1201_s28  ;;  %617 = vrot.lane.b32.xlu1 %v1283_v6, %s1200_s27 }
  0x50   : > { %619 = vrot.lane.b32.xlu0 %v1164_v9, %s1200_s27  ;;  %678 = vrot.lane.b32.xlu1 %v1283_v6, %s1201_s28 }
  0x54   : > { %680 = vrot.lane.b32.xlu0 %v1164_v9, %s1201_s28  ;;  %611 = vrot.lane.b32.xlu1 %v1309_v10, %s1191_s8 }
  0x58   : > { %735 = vrot.lane.b32.xlu0 %v1162_v7, %s1202_s5  ;;  %737 = vrot.lane.b32.xlu1 %v1163_v8, %s1202_s5 }
  0x5c   : > { %672 = vrot.lane.b32.xlu0 %v1309_v10, %s1197_s24  ;;  %801 = vrot.lane.b32.xlu1 %v1162_v7, %s1203_s6 }
  0x60   : > { %803 = vrot.lane.b32.xlu0 %v1163_v8, %s1203_s6  ;;  %739 = vrot.lane.b32.xlu1 %v1283_v6, %s1202_s5 }
  0x64   : > { %741 = vrot.lane.b32.xlu0 %v1164_v9, %s1202_s5  ;;  %805 = vrot.lane.b32.xlu1 %v1283_v6, %s1203_s6 }
  0x68   : > { %807 = vrot.lane.b32.xlu0 %v1164_v9, %s1203_s6  ;;  %733 = vrot.lane.b32.xlu1 %v1309_v10, %s1199_s26 }
  0x6c   : > { %864 = vperm.xlu0 %1158, %v860_v12   ;;  %869 = vperm.xlu1 %1159, %v861_v13  }
  0x8e   : > { %v316_v14 = vpop.permute.xlu0 %315 }
  0x91   : > { %v326_v15 = vpop.permute.xlu1 %325 }
  0x92   : > { %v322_v16 = vpop.permute.xlu0 %321 }
  0x95   : > { %v426_v17 = vpop.permute.xlu1 %425 }
  0x9a   : > { %v324_v18 = vpop.permute.xlu0 %323  ;;  %v328_v20 = vpop.permute.xlu1 %327 }
  0x9b   : > { %v330_v19 = vsel %vm329_vm2, %v322_v16, %v324_v18  ;;  %v331_v21 = vsel %vm329_vm2, %v326_v15, %v328_v20 }
  0x9c   : > { %1049 = vmatpush3.bf16.msra.mxu0 %v330_v19 }
  0x9d   : > { %1050 = vmatprep.subr.bf16.mxu0 %v1192_v5 }
  0x9e   : > { %v428_v22 = vpop.permute.xlu0 %427  ;;  %v430_v23 = vpop.permute.xlu1 %429 }
  0x9f   : > { %v434_v25 = vsel %vm433_vm3, %v426_v17, %v428_v22 }
  0xa0   : > { %1051 = vmatpush3.bf16.msra.mxu0 %v331_v21 }
  0xa1   : > { %1064 = vmatprep.subr.bf16.mxu0 %v1192_v5 }
  0xa2   : > { %v432_v24 = vpop.permute.xlu0 %431  ;;  %v487_v26 = vpop.permute.xlu1 %486 }
  0xa3   : > { %1053 = vmatmul.mubr.msk.bf16.vlgmr.msra.gmra.mrb[0].mxu0 %vm334_vm1, %v316_v14  ;;  %v435_v28 = vsel %vm433_vm3, %v430_v23, %v432_v24 }
  0xa4   : > { %1065 = vmatpush3.bf16.msra.mxu0 %v434_v25  ;;  %1068 = vmatprep.mubr.msk.bf16.mxu0 %vm1194_vm0, %v1192_v5 }
  0xa5   : > { %1066 = vmatprep.subr.bf16.mxu0 %v1192_v5 }
  0xa6   : > { %v489_v27 = vpop.permute.xlu0 %488  ;;  %v424_v30 = vpop.permute.xlu1 %423 }
  0xa7   : > { %v495_v29 = vsel %vm494_vm4, %v487_v26, %v489_v27 }
  0xa8   : > { %1067 = vmatpush3.bf16.msra.mxu0 %v435_v28  ;;  %1073 = vmatpush3.bf16.msra.mxu1 %v495_v29 }
  0xa9   : > { %1080 = vmatprep.subr.bf16.mxu0 %v1192_v5  ;;  %1074 = vmatprep.subr.bf16.mxu1 %v1192_v5 }
  0xaa   : > { %v553_v31 = vpop.permute.xlu0 %552  ;;  %v555_v32 = vpop.permute.xlu1 %554 }
  0xab   : > { %1069 = vmatmul.mubr.msk.bf16.vlgmr.msra.gmra.mrb[4].mxu0 %vm334_vm1, %v424_v30  ;;  %v561_v33 = vsel %vm560_vm5, %v553_v31, %v555_v32 }
  0xac   : > { %1084 = vmatprep.mubr.msk.bf16.mxu0 %vm1194_vm0, %v1192_v5  ;;  %1081 = vmatpush3.bf16.msra.mxu0 %v561_v33 }
  0xad   : > { %1082 = vmatprep.subr.bf16.mxu0 %v1192_v5 }
  0xae   : > { %v491_v34 = vpop.permute.xlu0 %490  ;;  %v493_v35 = vpop.permute.xlu1 %492 }
  0xaf   : > { %v496_v36 = vsel %vm494_vm4, %v491_v34, %v493_v35 }
  0xb0   : > { %1075 = vmatpush3.bf16.msra.mxu1 %v496_v36 }
  0xb1   : > { %1088 = vmatprep.subr.bf16.mxu1 %v1192_v5 }
  0xb2   : > { %v557_v37 = vpop.permute.xlu0 %556  ;;  %v559_v38 = vpop.permute.xlu1 %558 }
  0xb3   : > { %v562_v39 = vsel %vm560_vm5, %v557_v37, %v559_v38 }
  0xb4   : > { %1083 = vmatpush3.bf16.msra.mxu0 %v562_v39 }
  0xb5   : > { %1096 = vmatprep.subr.bf16.mxu0 %v1192_v5 }
  0xb6   : > { %v485_v40 = vpop.permute.xlu0 %484  ;;  %v614_v41 = vpop.permute.xlu1 %613 }
  0xb7   : > { %1077 = vmatmul.mubr.msk.bf16.vlgmr.msra.gmra.mrb[4].mxu1 %vm334_vm1, %v485_v40  ;;  %1085 = vmatmul.mubr.msk.bf16.vlgmr.msra.gmra.mrb[8].mxu0 %vm334_vm1, %v1309_v10 }
  0xb8   : > { %1092 = vmatprep.mubr.msk.bf16.mxu1 %vm1194_vm0, %v1192_v5  ;;  %1100 = vmatprep.mubr.msk.bf16.mxu0 %vm1194_vm0, %v1192_v5 }
  0xba   : > { %v616_v42 = vpop.permute.xlu0 %615  ;;  %v675_v44 = vpop.permute.xlu1 %674 }
  0xbb   : > { %v622_v43 = vsel %vm621_vm6, %v614_v41, %v616_v42 }
  0xbc   : > { %1089 = vmatpush3.bf16.msra.mxu1 %v622_v43 }
  0xbd   : > { %1090 = vmatprep.subr.bf16.mxu1 %v1192_v5 }
  0xbe   : > { %v677_v45 = vpop.permute.xlu0 %676  ;;  %v618_v47 = vpop.permute.xlu1 %617 }
  0xbf   : > { %v683_v46 = vsel %vm682_vm7, %v675_v44, %v677_v45 }
  0xc0   : > { %1097 = vmatpush3.bf16.msra.mxu0 %v683_v46 }
  0xc1   : > { %1098 = vmatprep.subr.bf16.mxu0 %v1192_v5 }
  0xc2   : > { %v620_v48 = vpop.permute.xlu0 %619  ;;  %v679_v50 = vpop.permute.xlu1 %678 }
  0xc3   : > { %v623_v49 = vsel %vm621_vm6, %v618_v47, %v620_v48 }
  0xc4   : > { %1091 = vmatpush3.bf16.msra.mxu1 %v623_v49 }
  0xc5   : > { %1104 = vmatprep.subr.bf16.mxu1 %v1192_v5 }
  0xc6   : > { %v681_v51 = vpop.permute.xlu0 %680  ;;  %v612_v53 = vpop.permute.xlu1 %611 }
  0xc7   : > { %v684_v52 = vsel %vm682_vm7, %v679_v50, %v681_v51  ;;  %1093 = vmatmul.mubr.msk.bf16.vlgmr.msra.gmra.mrb[8].mxu1 %vm334_vm1, %v612_v53 }
  0xc8   : > { %1099 = vmatpush3.bf16.msra.mxu0 %v684_v52  ;;  %1108 = vmatprep.mubr.msk.bf16.mxu1 %vm1194_vm0, %v1192_v5 }
  0xc9   : > { %1112 = vmatprep.subr.bf16.mxu0 %v1192_v5 }
  0xca   : > { %v736_v54 = vpop.permute.xlu0 %735  ;;  %v738_v55 = vpop.permute.xlu1 %737 }
  0xcb   : > { %v744_v56 = vsel %vm743_vm8, %v736_v54, %v738_v55 }
  0xcc   : > { %1105 = vmatpush3.bf16.msra.mxu1 %v744_v56 }
  0xcd   : > { %1106 = vmatprep.subr.bf16.mxu1 %v1192_v5 }
  0xce   : > { %v673_v57 = vpop.permute.xlu0 %672  ;;  %v802_v58 = vpop.permute.xlu1 %801 }
  0xcf   : > { %1101 = vmatmul.mubr.msk.bf16.vlgmr.msra.gmra.mrb[12].mxu0 %vm334_vm1, %v673_v57 }
  0xd0   : > { %1116 = vmatprep.mubr.msk.bf16.mxu0 %vm1194_vm0, %v1192_v5 }
  0xd2   : > { %v804_v59 = vpop.permute.xlu0 %803  ;;  %v740_v61 = vpop.permute.xlu1 %739 }
  0xd3   : > { %v810_v60 = vsel %vm809_vm9, %v802_v58, %v804_v59 }
  0xd4   : > { %1113 = vmatpush3.bf16.msra.mxu0 %v810_v60 }
  0xd5   : > { %1114 = vmatprep.subr.bf16.mxu0 %v1192_v5 }
  0xd6   : > { %v742_v62 = vpop.permute.xlu0 %741  ;;  %v806_v0 = vpop.permute.xlu1 %805 }
  0xd7   : > { %v745_v63 = vsel %vm743_vm8, %v740_v61, %v742_v62 }
  0xd8   : > { %1107 = vmatpush3.bf16.msra.mxu1 %v745_v63 }
  0xda   : > { %v808_v1 = vpop.permute.xlu0 %807  ;;  %v734_v4 = vpop.permute.xlu1 %733 }
  0xdb   : > { %v811_v2 = vsel %vm809_vm9, %v806_v0, %v808_v1  ;;  %1109 = vmatmul.mubr.msk.bf16.vlgmr.msra.gmra.mrb[12].mxu1 %vm334_vm1, %v734_v4 }
  0xdc   : > { %1115 = vmatpush3.bf16.msra.mxu0 %v811_v2 }
  0xdf   : > { %1117 = vmatmul.mubr.msk.bf16.vlgmr.msra.gmra.mrb[16].mxu0 %vm334_vm1, %v1166_v3 }
  0xeb   : > { %v865_v48 = vpop.permute.xlu0 %864  ;;  %v870_v56 = vpop.permute.xlu1 %869 }
  0xf9   : > { %v416_v6 = vpop.f32.mrb[0].mxu1 }
  0xfa   : > { %v1062_v7 = vpop.f32.mrb[1].mxu1 }
  0xfb   : > { %v419_v5 = vpop.f32.mrb[2].mxu1 }
  0xfc   : > { %v1063_v8 = vpop.f32.mrb[3].mxu1 }
 0x176   : > { %v372_v9 = vpop.f32.mrb[0].mxu0 }
 0x177   : > { %v417_v10 = vadd.f32 %v416_v6, %v372_v9  ;;  %v1054_v11 = vpop.f32.mrb[1].mxu0 }
 0x178   : > { %v375_v12 = vpop.f32.mrb[2].mxu0 }
 0x179   : > { %v420_v13 = vadd.f32 %v419_v5, %v375_v12  ;;  %v1055_v14 = vpop.f32.mrb[3].mxu0 }
 0x17e   : > { %v475_v15 = vpop.f32.mrb[4].mxu0 }
 0x17f   : > { %v482_v16 = vadd.f32 %v475_v15, %v417_v10  ;;  %v1070_v17 = vpop.f32.mrb[5].mxu0 }
 0x180   : > { %v478_v18 = vpop.f32.mrb[6].mxu0 }
 0x181   : > { %v483_v19 = vadd.f32 %v478_v18, %v420_v13  ;;  %v1071_v20 = vpop.f32.mrb[7].mxu0 }
 0x18a   : > { %v536_v21 = vpop.f32.mrb[4].mxu1  ;;  %v602_v25 = vpop.f32.mrb[8].mxu0 }
 0x18b   : > { %v543_v22 = vadd.f32 %v536_v21, %v482_v16  ;;  %v1078_v23 = vpop.f32.mrb[5].mxu1  ;;  %v1086_v29 = vpop.f32.mrb[9].mxu0 }
 0x18c   : > { %v539_v24 = vpop.f32.mrb[6].mxu1  ;;  %v605_v30 = vpop.f32.mrb[10].mxu0 }
 0x18d   : > { %v544_v26 = vadd.f32 %v539_v24, %v483_v19  ;;  %v1079_v27 = vpop.f32.mrb[7].mxu1  ;;  %v609_v28 = vadd.f32 %v602_v25, %v543_v22  ;;  %v1087_v32 = vpop.f32.mrb[11].mxu0 }
 0x18f   : > { %v610_v31 = vadd.f32 %v605_v30, %v544_v26 }
 0x19a   : > { %v663_v33 = vpop.f32.mrb[8].mxu1 }
 0x19b   : > { %v670_v34 = vadd.f32 %v663_v33, %v609_v28  ;;  %v1094_v35 = vpop.f32.mrb[9].mxu1 }
 0x19c   : > { %v666_v36 = vpop.f32.mrb[10].mxu1 }
 0x19d   : > { %v671_v37 = vadd.f32 %v666_v36, %v610_v31  ;;  %v1095_v38 = vpop.f32.mrb[11].mxu1 }
 0x1a2   : > { %v724_v39 = vpop.f32.mrb[12].mxu0 }
 0x1a3   : > { %v731_v40 = vadd.f32 %v724_v39, %v670_v34  ;;  %v1102_v41 = vpop.f32.mrb[13].mxu0 }
 0x1a4   : > { %v727_v42 = vpop.f32.mrb[14].mxu0 }
 0x1a5   : > { %v732_v43 = vadd.f32 %v727_v42, %v671_v37  ;;  %v1103_v44 = vpop.f32.mrb[15].mxu0 }
 0x1ae   : > { %v785_v45 = vpop.f32.mrb[12].mxu1 }
 0x1af   : > { %v792_v46 = vadd.f32 %v785_v45, %v731_v40  ;;  %v1110_v47 = vpop.f32.mrb[13].mxu1 }
 0x1b0   : > { %v788_v50 = vpop.f32.mrb[14].mxu1 }
 0x1b1   : > { %v793_v52 = vadd.f32 %v788_v50, %v732_v43  ;;  %v1111_v54 = vpop.f32.mrb[15].mxu1 }
 0x1b2   : > { %v851_v49 = vpop.f32.mrb[16].mxu0 }
 0x1b3   : > { %v858_v51 = vadd.f32 %v851_v49, %v792_v46  ;;  %v1118_v53 = vpop.f32.mrb[17].mxu0  ;;  %882 = sbr.rel (!%p1261_p5) target bundleno = 450 (0x1c2), region = 81 }
 0x1b4   : > { %v854_v55 = vpop.f32.mrb[18].mxu0 }
 0x1b5   : > { %v859_v57 = vadd.f32 %v854_v55, %v793_v52  ;;  %v1119_v58 = vpop.f32.mrb[19].mxu0  ;;  %v872_v59 = vadd.f32 %v865_v48, %v858_v51 }
 0x1b7   : > { %874 = vst [vmem:[%s259_s14] sm:$0xff] %v872_v59  ;;  %v873_v60 = vadd.f32 %v870_v56, %v859_v57 }
 0x1b9   : > { %875 = vst [vmem:[%s259_s14 + $0x8] sm:$0xff] %v873_v60 }
 0x1be   : > { %v914_v61 = vld [vmem:[%s259_s14] sm:$0xff] }
 0x1bf   : > { %915 = vst [vmem:[%s884_s21] sm:$0xff] %v914_v61 }
 0x1c0   : > { %v916_v62 = vld [vmem:[%s259_s14 + $0x8] sm:$0xff] }
 0x1c1   : > { %917 = vst [vmem:[%s884_s21 + $0x10] sm:$0xff] %v916_v62 }
 0x1c2 PF: > { %p11_p11 = scmp.ge.s32.totalorder %s1249_s19, 4   ;;  %s1390_s15 = smov %s1185_s16 }
 0x1c3   : > { %s1391_s16 = smov %s1259_s22  ;;  %s1392_s17 = smov %s1249_s19 }
 0x1c4   :  { %13 = sbr.rel (!%p11_p11) target bundleno = 2 (0x2), region = 153 }

</bundles_post_ra>
